<compile_context>
chip_gen: v6e
topology: v6e:2x2x1
jax: 0.10.0
libtpu: 0.0.40
codegen_flags: <defaults>
</compile_context>

<pallas_src>
import functools
import math

import jax
import jax.numpy as jnp
from jax.experimental import pallas as pl
from jax.experimental.pallas import tpu as pltpu


# ----------------------------------------------------------------------------
# Fused Pallas kernel (everything resident in VMEM, single grid step)
# ----------------------------------------------------------------------------
def _inter_layer_kernel(size, L, H, nh, Dh, N, inter,
                        text_ref, pad_ref, graph_ref, adj_ref, allow_ref,
                        wqkv_t_ref, bqkv_t_ref, wo_t_ref, bo_t_ref,
                        gcn_w_ref, gcn_b_ref,
                        wqkv_g_ref, bqkv_g_ref, wo_g_ref, bo_g_ref,
                        tfc_ref, gfc_ref,
                        text_out_ref, graph_out_ref, attn_out_ref):
    f32 = jnp.float32
    neg_inf = -jnp.inf

    # ---------------- TextModule: multi-head self-attention ------------------
    x2d = text_ref[...].reshape(size * L, H)                       # (S*L, H)
    # key_padding_mask -> additive bias, built in-kernel (no HBM -inf tensor)
    kp_bias = jnp.where(pad_ref[...] > 0.5, neg_inf, 0.0)[:, None, :]   # (S,1,L)

    attn_sum = jnp.zeros((size, L, L), f32)
    txt_acc = jnp.zeros((size * L, H), f32)
    for h in range(nh):                                            # static unroll
        # scale 1/sqrt(Dh) is already folded into wqkv_t[0]/bqkv_t[0]
        q = (jnp.dot(x2d, wqkv_t_ref[0, h], preferred_element_type=f32)
             + bqkv_t_ref[0, h]).reshape(size, L, Dh)
        k = (jnp.dot(x2d, wqkv_t_ref[1, h], preferred_element_type=f32)
             + bqkv_t_ref[1, h]).reshape(size, L, Dh)
        v = (jnp.dot(x2d, wqkv_t_ref[2, h], preferred_element_type=f32)
             + bqkv_t_ref[2, h]).reshape(size, L, Dh)
        s = jnp.einsum('bqd,bkd->bqk', q, k, preferred_element_type=f32) + kp_bias
        m = jnp.max(s, axis=-1, keepdims=True)
        p = jnp.exp(s - m)
        p = p / jnp.sum(p, axis=-1, keepdims=True)
        attn_sum = attn_sum + p
        o = jnp.einsum('bqk,bkd->bqd', p, v, preferred_element_type=f32)
        # out-projection accumulated per head: concat_h(o_h) @ Wout.T == sum_h o_h @ Wo_h
        txt_acc = txt_acc + jnp.dot(o.reshape(size * L, Dh), wo_t_ref[h],
                                    preferred_element_type=f32)
    attn_out_ref[...] = (attn_sum * (1.0 / nh)).astype(attn_out_ref.dtype)
    text_out = (txt_acc + bo_t_ref[...]).reshape(size, L, H)

    # ---------------- GraphModule: GCNConv (self-loops + sym. normalization) -
    adj = adj_ref[...]                                             # A[dst, src] = 1
    rows = jax.lax.broadcasted_iota(jnp.int32, (N, N), 0)
    cols = jax.lax.broadcasted_iota(jnp.int32, (N, N), 1)
    a_loop = adj + jnp.where(rows == cols, 1.0, 0.0)               # add self-loops
    deg = jnp.sum(a_loop, axis=-1, keepdims=True)                  # (N, 1)
    dinv = jnp.where(deg > 0.0, jax.lax.rsqrt(deg), 0.0)
    xw = jnp.dot(graph_ref[...], gcn_w_ref[...], preferred_element_type=f32)
    # D^-1/2 A_loop D^-1/2 (X W) + b  without forming A_hat / transposing dinv
    res = dinv * jnp.dot(a_loop, dinv * xw, preferred_element_type=f32) + gcn_b_ref[...]

    # ---------------- neighbor-set attention == masked MHA over {i} U N(i) ---
    g_bias = jnp.where(allow_ref[...] > 0.5, 0.0, neg_inf)         # (S, N)
    res_q = res[:size, :]
    g_acc = jnp.zeros((size, H), f32)
    for h in range(nh):
        q = jnp.dot(res_q, wqkv_g_ref[0, h], preferred_element_type=f32) + bqkv_g_ref[0, h]
        k = jnp.dot(res, wqkv_g_ref[1, h], preferred_element_type=f32) + bqkv_g_ref[1, h]
        v = jnp.dot(res, wqkv_g_ref[2, h], preferred_element_type=f32) + bqkv_g_ref[2, h]
        s = jnp.einsum('qd,kd->qk', q, k, preferred_element_type=f32) + g_bias
        m = jnp.max(s, axis=-1, keepdims=True)
        p = jnp.exp(s - m)
        p = p / jnp.sum(p, axis=-1, keepdims=True)
        o = jnp.dot(p, v, preferred_element_type=f32)              # (S, Dh)
        g_acc = g_acc + jnp.dot(o, wo_g_ref[h], preferred_element_type=f32)
    users = g_acc + bo_g_ref[...]                                   # (S, H)

    # nodes >= size keep the plain GCN output
    graph_out_ref[...] = res.astype(graph_out_ref.dtype)

    if inter:
        # ---------------- InterHead fusion -----------------------------------
        t_head = text_out[:, 0, :]                                  # (S, H)
        g_head = users
        ts = jnp.dot(t_head, tfc_ref[...], preferred_element_type=f32)
        gs = jnp.dot(g_head, gfc_ref[...], preferred_element_type=f32)
        a_tt = jnp.sum(t_head * ts, axis=-1, keepdims=True)
        a_tg = jnp.sum(t_head * gs, axis=-1, keepdims=True)
        a_gt = jnp.sum(g_head * ts, axis=-1, keepdims=True)
        a_gg = jnp.sum(g_head * gs, axis=-1, keepdims=True)
        m1 = jnp.maximum(a_tt, a_tg)
        e_tt, e_tg = jnp.exp(a_tt - m1), jnp.exp(a_tg - m1)
        m2 = jnp.maximum(a_gt, a_gg)
        e_gt, e_gg = jnp.exp(a_gt - m2), jnp.exp(a_gg - m2)
        new_t = (e_tt * t_head + e_tg * g_head) / (e_tt + e_tg)
        # graph uses the *updated* text, matching the PyTorch reassignment order
        new_g = (e_gt * new_t + e_gg * g_head) / (e_gt + e_gg)

        seq_ids = jax.lax.broadcasted_iota(jnp.int32, (size, L, H), 1)
        text_final = jnp.where(seq_ids == 0, new_t[:, None, :], text_out)
        text_out_ref[...] = text_final.astype(text_out_ref.dtype)
        graph_out_ref[0:size, :] = new_g.astype(graph_out_ref.dtype)
    else:
        text_out_ref[...] = text_out.astype(text_out_ref.dtype)
        graph_out_ref[0:size, :] = users.astype(graph_out_ref.dtype)


def _full_spec(shape):
    zero = (0,) * len(shape)

    def index_map(i):
        return zero

    return pl.BlockSpec(shape, index_map)


# ----------------------------------------------------------------------------
# One-time parameter preparation (pre-transpose / per-head split / scale folding)
# ----------------------------------------------------------------------------
def _split_mha(p, hidden, num_heads):
    Dh = hidden // num_heads
    scale = 1.0 / math.sqrt(Dh)
    Wq, Wk, Wv = jnp.split(p["in_proj_w"].astype(jnp.float32), 3, axis=0)   # (H,H) each
    bq, bk, bv = jnp.split(p["in_proj_b"].astype(jnp.float32), 3)

    def heads(W, b, s):
        w = jnp.stack([(W[h * Dh:(h + 1) * Dh, :] * s).T for h in range(num_heads)])
        bb = jnp.stack([(b[h * Dh:(h + 1) * Dh] * s)[None, :] for h in range(num_heads)])
        return w, bb                                     # (nh, H, Dh), (nh, 1, Dh)

    wq, bq_h = heads(Wq, bq, scale)                      # fold 1/sqrt(Dh) into q
    wk, bk_h = heads(Wk, bk, 1.0)
    wv, bv_h = heads(Wv, bv, 1.0)
    Wo = p["out_proj_w"].astype(jnp.float32)             # torch (out, in)
    wo = jnp.stack([Wo[:, h * Dh:(h + 1) * Dh].T for h in range(num_heads)])  # (nh,Dh,H)
    bo = p["out_proj_b"].astype(jnp.float32)[None, :]                          # (1, H)
    return jnp.stack([wq, wk, wv]), jnp.stack([bq_h, bk_h, bv_h]), wo, bo


def prepare_params(params, hidden, num_heads):
    wqkv_t, bqkv_t, wo_t, bo_t = _split_mha(params["text_attn"], hidden, num_heads)
    wqkv_g, bqkv_g, wo_g, bo_g = _split_mha(params["graph_attn"], hidden, num_heads)
    return {
        "wqkv_t": wqkv_t, "bqkv_t": bqkv_t, "wo_t": wo_t, "bo_t": bo_t,
        "wqkv_g": wqkv_g, "bqkv_g": bqkv_g, "wo_g": wo_g, "bo_g": bo_g,
        "gcn_w": params["gcn_w"].astype(jnp.float32).T,
        "gcn_b": params["gcn_b"].astype(jnp.float32)[None, :],
        "text_fc": params["text_fc"].astype(jnp.float32).T,
        "graph_fc": params["graph_fc"].astype(jnp.float32).T,
    }


# ----------------------------------------------------------------------------
# InterLayer forward = single pallas_call
# ----------------------------------------------------------------------------
def inter_layer_forward(prep, text, padding_mask, graph, edge_index, edge_type,
                        *, size, num_heads, inter=True):
    # edge_type is unused for mode='gcn' (kept for signature parity with torch).
    H = text.shape[-1]
    L = text.shape[1]
    N = graph.shape[0]
    Dh = H // num_heads

    text_s = text[:size].astype(jnp.float32)
    # key_padding_mask with the always-valid "des" column prepended (1.0 == ignore)
    pad = jnp.pad(padding_mask[:size].astype(jnp.float32), ((0, 0), (1, 0)))
    # dense adjacency A[dst, src] = 1 (data-dependent scatter stays in XLA)
    src, dst = edge_index[0], edge_index[1]
    adj = jnp.zeros((N, N), jnp.float32).at[dst, src].set(1.0)
    # allow mask for the neighbor-set attention: {i} U N(i)  (undirected union + self)
    allow = jnp.minimum(adj + adj.T + jnp.eye(N, dtype=jnp.float32), 1.0)[:size]

    kernel = functools.partial(_inter_layer_kernel,
                               size, L, H, num_heads, Dh, N, inter)

    out_shape = (
        jax.ShapeDtypeStruct((size, L, H), jnp.float32),   # text (row 0 fused w/ InterHead)
        jax.ShapeDtypeStruct((N, H), jnp.float32),         # graph nodes
        jax.ShapeDtypeStruct((size, L, L), jnp.float32),   # head-averaged attention map
    )
    inputs = (text_s, pad, graph.astype(jnp.float32), adj, allow,
              prep["wqkv_t"], prep["bqkv_t"], prep["wo_t"], prep["bo_t"],
              prep["gcn_w"], prep["gcn_b"],
              prep["wqkv_g"], prep["bqkv_g"], prep["wo_g"], prep["bo_g"],
              prep["text_fc"], prep["graph_fc"])

    return pl.pallas_call(
        kernel,
        grid=(1,),
        in_specs=[_full_spec(x.shape) for x in inputs],
        out_specs=tuple(_full_spec(s.shape) for s in out_shape),
        out_shape=out_shape,
        compiler_params=pltpu.CompilerParams(dimension_semantics=("arbitrary",)),
    )(*inputs)


# ----------------------------------------------------------------------------
# Plain-JAX reference (direct transliteration of the PyTorch module, eval mode)
# ----------------------------------------------------------------------------
def reference_forward(params, text, padding_mask, graph, edge_index, edge_type,
                      *, size, num_heads, inter=True):
    H = text.shape[-1]
    Dh = H // num_heads
    text = text[:size]
    pm = jnp.concatenate([jnp.zeros((size, 1), bool), padding_mask[:size]], axis=1)

    def mha(q_in, k_in, v_in, bias, p):
        Wq, Wk, Wv = jnp.split(p["in_proj_w"], 3, axis=0)
        bq, bk, bv = jnp.split(p["in_proj_b"], 3)
        B, Lq, _ = q_in.shape
        Lk = k_in.shape[1]
        q = q_in @ Wq.T + bq
        k = k_in @ Wk.T + bk
        v = v_in @ Wv.T + bv
        qh = q.reshape(B, Lq, num_heads, Dh).transpose(0, 2, 1, 3)
        kh = k.reshape(B, Lk, num_heads, Dh).transpose(0, 2, 1, 3)
        vh = v.reshape(B, Lk, num_heads, Dh).transpose(0, 2, 1, 3)
        s = jnp.einsum('bhqd,bhkd->bhqk', qh, kh) / math.sqrt(Dh) + bias[:, None]
        pw = jax.nn.softmax(s, axis=-1)
        o = jnp.einsum('bhqk,bhkd->bhqd', pw, vh).transpose(0, 2, 1, 3).reshape(B, Lq, H)
        return o @ p["out_proj_w"].T + p["out_proj_b"], pw.mean(axis=1)

    text_bias = jnp.where(pm[:, None, :], -jnp.inf, 0.0)
    text_out, attn_map = mha(text, text, text, text_bias, params["text_attn"])

    N = graph.shape[0]
    src, dst = edge_index[0], edge_index[1]
    A = jnp.zeros((N, N), jnp.float32).at[dst, src].set(1.0)
    A_loop = A + jnp.eye(N, dtype=jnp.float32)
    deg = A_loop.sum(axis=1)
    dinv = 1.0 / jnp.sqrt(deg)
    A_hat = dinv[:, None] * A_loop * dinv[None, :]
    res = A_hat @ (graph @ params["gcn_w"].T) + params["gcn_b"]

    allow = ((A + A.T) > 0) | jnp.eye(N, dtype=bool)
    g_bias = jnp.where(allow[:size], 0.0, -jnp.inf)[None]
    users, _ = mha(res[None, :size], res[None], res[None], g_bias, params["graph_attn"])
    users = users[0]
    graph_res = jnp.concatenate([users, res[size:]], axis=0)
    if not inter:
        return text_out, graph_res, attn_map

    t_head = text_out[:, 0, :]
    g_head = graph_res[:size]
    ts = t_head @ params["text_fc"].T
    gs = g_head @ params["graph_fc"].T
    a_tt = (t_head * ts).sum(-1)
    a_tg = (t_head * gs).sum(-1)
    a_gt = (g_head * ts).sum(-1)
    a_gg = (g_head * gs).sum(-1)
    w1 = jax.nn.softmax(jnp.stack([a_tt, a_tg]), axis=0)
    w2 = jax.nn.softmax(jnp.stack([a_gt, a_gg]), axis=0)
    new_t = w1[0][:, None] * t_head + w1[1][:, None] * g_head
    new_g = w2[0][:, None] * new_t + w2[1][:, None] * g_head
    text_f = jnp.concatenate([new_t[:, None, :], text_out[:, 1:, :]], axis=1)
    graph_f = jnp.concatenate([new_g, graph_res[size:]], axis=0)
    return text_f, graph_f, attn_map


# ----------------------------------------------------------------------------
# Deterministic parameter init + example run
# ----------------------------------------------------------------------------
def init_params(key, hidden):
    ks = jax.random.split(key, 12)
    n = lambda k, s: (0.1 * jax.random.normal(k, s)).astype(jnp.float32)
    return {
        "text_attn": {
            "in_proj_w": n(ks[0], (3 * hidden, hidden)),
            "in_proj_b": n(ks[1], (3 * hidden,)),
            "out_proj_w": n(ks[2], (hidden, hidden)),
            "out_proj_b": n(ks[3], (hidden,)),
        },
        "graph_attn": {
            "in_proj_w": n(ks[4], (3 * hidden, hidden)),
            "in_proj_b": n(ks[5], (3 * hidden,)),
            "out_proj_w": n(ks[6], (hidden, hidden)),
            "out_proj_b": n(ks[7], (hidden,)),
        },
        "gcn_w": n(ks[8], (hidden, hidden)),
        "gcn_b": n(ks[9], (hidden,)),
        "text_fc": n(ks[10], (hidden, hidden)),   # Linear(H, H, bias=False) weight
        "graph_fc": n(ks[11], (hidden, hidden)),
    }


if __name__ == "__main__":
    hidden, num_heads, size = 32, 4, 4
    seq, n_nodes = 8, 6

    key = jax.random.PRNGKey(0)
    k_text, k_graph, k_par = jax.random.split(key, 3)

    text = jax.random.normal(k_text, (size + 1, seq, hidden), jnp.float32)
    padding_mask = jnp.array(
        [[False] * 5 + [True] * 2,
         [False] * 7,
         [False] * 6 + [True],
         [False] * 4 + [True] * 3,
         [False] * 7], dtype=bool)                                   # (size+1, seq-1)
    graph = jax.random.normal(k_graph, (n_nodes, hidden), jnp.float32)

    # directed edge list (no self-loops, no duplicates)
    pairs = [(0, 1), (1, 0), (1, 2), (2, 1), (2, 3), (3, 2), (4, 0),
             (0, 4), (5, 1), (1, 5), (2, 5), (5, 2), (3, 4), (4, 3)]
    edge_index = jnp.array([[s for s, d in pairs],
                            [d for s, d in pairs]], dtype=jnp.int32)
    edge_type = jnp.zeros((edge_index.shape[1],), jnp.int32)          # unused for 'gcn'

    params = init_params(k_par, hidden)
    prep = prepare_params(params, hidden, num_heads)                  # one-time prep

    fwd = jax.jit(functools.partial(inter_layer_forward,
                                    size=size, num_heads=num_heads, inter=True))
    text_o, graph_o, attn_map = fwd(prep, text, padding_mask, graph,
                                    edge_index, edge_type)
    jax.block_until_ready((text_o, graph_o, attn_map))

    assert text_o.shape == (size, seq, hidden)
    assert graph_o.shape == (n_nodes, hidden)
    assert attn_map.shape == (size, seq, seq)
    assert bool(jnp.all(jnp.isfinite(text_o))) and bool(jnp.all(jnp.isfinite(graph_o)))

    # cross-check against a plain-JAX transliteration of the PyTorch module
    t_ref, g_ref, a_ref = reference_forward(params, text, padding_mask, graph,
                                            edge_index, edge_type,
                                            size=size, num_heads=num_heads, inter=True)
    for got, want, name in ((text_o, t_ref, "text"),
                            (graph_o, g_ref, "graph"),
                            (attn_map, a_ref, "attn")):
        err = float(jnp.max(jnp.abs(got - want)))
        assert err < 5e-2, f"{name} mismatch: max abs err {err}"

    print("KERNEL_OK")
</pallas_src>

<mosaic_0001>
module attributes {stable_mosaic.version = 11 : i64} {
  func.func @_inter_layer_kernel(%arg0: i32, %arg1: memref<4x8x32xf32, #tpu.memory_space<vmem>>, %arg2: memref<4x8xf32, #tpu.memory_space<vmem>>, %arg3: memref<6x32xf32, #tpu.memory_space<vmem>>, %arg4: memref<6x6xf32, #tpu.memory_space<vmem>>, %arg5: memref<4x6xf32, #tpu.memory_space<vmem>>, %arg6: memref<3x4x32x8xf32, #tpu.memory_space<vmem>>, %arg7: memref<3x4x1x8xf32, #tpu.memory_space<vmem>>, %arg8: memref<4x8x32xf32, #tpu.memory_space<vmem>>, %arg9: memref<1x32xf32, #tpu.memory_space<vmem>>, %arg10: memref<32x32xf32, #tpu.memory_space<vmem>>, %arg11: memref<1x32xf32, #tpu.memory_space<vmem>>, %arg12: memref<3x4x32x8xf32, #tpu.memory_space<vmem>>, %arg13: memref<3x4x1x8xf32, #tpu.memory_space<vmem>>, %arg14: memref<4x8x32xf32, #tpu.memory_space<vmem>>, %arg15: memref<1x32xf32, #tpu.memory_space<vmem>>, %arg16: memref<32x32xf32, #tpu.memory_space<vmem>>, %arg17: memref<32x32xf32, #tpu.memory_space<vmem>>, %arg18: memref<4x8x32xf32, #tpu.memory_space<vmem>>, %arg19: memref<6x32xf32, #tpu.memory_space<vmem>>, %arg20: memref<4x8x8xf32, #tpu.memory_space<vmem>>) attributes {dimension_semantics = [#tpu.dimension_semantics<arbitrary>], iteration_bounds = array<i64: 1>, scalar_prefetch = 0 : i64, scratch_operands = 0 : i64, tpu.core_type = #tpu.core_type<tc>, window_params = [{pipeline_mode = #tpu.pipeline_mode<synchronous>, transform_indices = @transform_0, window_bounds = array<i64: 4, 8, 32>}, {pipeline_mode = #tpu.pipeline_mode<synchronous>, transform_indices = @transform_1, window_bounds = array<i64: 4, 8>}, {pipeline_mode = #tpu.pipeline_mode<synchronous>, transform_indices = @transform_2, window_bounds = array<i64: 6, 32>}, {pipeline_mode = #tpu.pipeline_mode<synchronous>, transform_indices = @transform_3, window_bounds = array<i64: 6, 6>}, {pipeline_mode = #tpu.pipeline_mode<synchronous>, transform_indices = @transform_4, window_bounds = array<i64: 4, 6>}, {pipeline_mode = #tpu.pipeline_mode<synchronous>, transform_indices = @transform_5, window_bounds = array<i64: 3, 4, 32, 8>}, {pipeline_mode = #tpu.pipeline_mode<synchronous>, transform_indices = @transform_6, window_bounds = array<i64: 3, 4, 1, 8>}, {pipeline_mode = #tpu.pipeline_mode<synchronous>, transform_indices = @transform_7, window_bounds = array<i64: 4, 8, 32>}, {pipeline_mode = #tpu.pipeline_mode<synchronous>, transform_indices = @transform_8, window_bounds = array<i64: 1, 32>}, {pipeline_mode = #tpu.pipeline_mode<synchronous>, transform_indices = @transform_9, window_bounds = array<i64: 32, 32>}, {pipeline_mode = #tpu.pipeline_mode<synchronous>, transform_indices = @transform_10, window_bounds = array<i64: 1, 32>}, {pipeline_mode = #tpu.pipeline_mode<synchronous>, transform_indices = @transform_11, window_bounds = array<i64: 3, 4, 32, 8>}, {pipeline_mode = #tpu.pipeline_mode<synchronous>, transform_indices = @transform_12, window_bounds = array<i64: 3, 4, 1, 8>}, {pipeline_mode = #tpu.pipeline_mode<synchronous>, transform_indices = @transform_13, window_bounds = array<i64: 4, 8, 32>}, {pipeline_mode = #tpu.pipeline_mode<synchronous>, transform_indices = @transform_14, window_bounds = array<i64: 1, 32>}, {pipeline_mode = #tpu.pipeline_mode<synchronous>, transform_indices = @transform_15, window_bounds = array<i64: 32, 32>}, {pipeline_mode = #tpu.pipeline_mode<synchronous>, transform_indices = @transform_16, window_bounds = array<i64: 32, 32>}, {pipeline_mode = #tpu.pipeline_mode<synchronous>, transform_indices = @transform_17, window_bounds = array<i64: 4, 8, 32>}, {pipeline_mode = #tpu.pipeline_mode<synchronous>, transform_indices = @transform_18, window_bounds = array<i64: 6, 32>}, {pipeline_mode = #tpu.pipeline_mode<synchronous>, transform_indices = @transform_19, window_bounds = array<i64: 4, 8, 8>}]} {
    %c0 = arith.constant 0 : index
    %c0_0 = arith.constant 0 : index
    %c0_1 = arith.constant 0 : index
    %0 = vector.load %arg1[%c0, %c0_0, %c0_1] : memref<4x8x32xf32, #tpu.memory_space<vmem>>, vector<4x8x32xf32>
    %1 = vector.shape_cast %0 : vector<4x8x32xf32> to vector<32x32xf32>
    %c0_2 = arith.constant 0 : index
    %c0_3 = arith.constant 0 : index
    %2 = vector.load %arg2[%c0_2, %c0_3] : memref<4x8xf32, #tpu.memory_space<vmem>>, vector<4x8xf32>
    %cst = arith.constant 5.000000e-01 : f32
    %3 = vector.broadcast %cst : f32 to vector<4x8xf32>
    %4 = arith.cmpf ogt, %2, %3 : vector<4x8xf32>
    %cst_4 = arith.constant 0xFF800000 : f32
    %cst_5 = arith.constant 0.000000e+00 : f32
    %5 = vector.broadcast %cst_4 : f32 to vector<4x8xf32>
    %6 = vector.broadcast %cst_5 : f32 to vector<4x8xf32>
    %7 = arith.select %4, %5, %6 : vector<4x8xi1>, vector<4x8xf32>
    %8 = vector.shape_cast %7 : vector<4x8xf32> to vector<4x1x8xf32>
    %cst_6 = arith.constant 0.000000e+00 : f32
    %9 = vector.broadcast %cst_6 : f32 to vector<4x8x8xf32>
    %cst_7 = arith.constant 0.000000e+00 : f32
    %10 = vector.broadcast %cst_7 : f32 to vector<32x32xf32>
    %c0_8 = arith.constant 0 : index
    %c0_9 = arith.constant 0 : index
    %c0_10 = arith.constant 0 : index
    %c0_11 = arith.constant 0 : index
    %11 = vector.load %arg6[%c0_8, %c0_9, %c0_10, %c0_11] : memref<3x4x32x8xf32, #tpu.memory_space<vmem>>, vector<1x1x32x8xf32>
    %12 = vector.shape_cast %11 : vector<1x1x32x8xf32> to vector<32x8xf32>
    %cst_12 = arith.constant dense<0.000000e+00> : vector<32x8xf32>
    %13 = tpu.matmul %1, %12, %cst_12 {dimension_numbers = #tpu.dot_dimension_numbers<[1], [0], [0], [1], [0, 0, 1, 1], [], []>} : vector<32x32xf32>, vector<32x8xf32>, vector<32x8xf32> -> vector<32x8xf32>
    %c0_13 = arith.constant 0 : index
    %c0_14 = arith.constant 0 : index
    %c0_15 = arith.constant 0 : index
    %c0_16 = arith.constant 0 : index
    %14 = vector.load %arg7[%c0_13, %c0_14, %c0_15, %c0_16] : memref<3x4x1x8xf32, #tpu.memory_space<vmem>>, vector<1x1x1x8xf32>
    %15 = vector.shape_cast %14 : vector<1x1x1x8xf32> to vector<1x8xf32>
    %16 = vector.broadcast %15 : vector<1x8xf32> to vector<32x8xf32>
    %17 = arith.addf %13, %16 : vector<32x8xf32>
    %18 = vector.shape_cast %17 : vector<32x8xf32> to vector<4x8x8xf32>
    %c1 = arith.constant 1 : index
    %c0_17 = arith.constant 0 : index
    %c0_18 = arith.constant 0 : index
    %c0_19 = arith.constant 0 : index
    %19 = vector.load %arg6[%c1, %c0_17, %c0_18, %c0_19] : memref<3x4x32x8xf32, #tpu.memory_space<vmem>>, vector<1x1x32x8xf32>
    %20 = vector.shape_cast %19 : vector<1x1x32x8xf32> to vector<32x8xf32>
    %cst_20 = arith.constant dense<0.000000e+00> : vector<32x8xf32>
    %21 = tpu.matmul %1, %20, %cst_20 {dimension_numbers = #tpu.dot_dimension_numbers<[1], [0], [0], [1], [0, 0, 1, 1], [], []>} : vector<32x32xf32>, vector<32x8xf32>, vector<32x8xf32> -> vector<32x8xf32>
    %c1_21 = arith.constant 1 : index
    %c0_22 = arith.constant 0 : index
    %c0_23 = arith.constant 0 : index
    %c0_24 = arith.constant 0 : index
    %22 = vector.load %arg7[%c1_21, %c0_22, %c0_23, %c0_24] : memref<3x4x1x8xf32, #tpu.memory_space<vmem>>, vector<1x1x1x8xf32>
    %23 = vector.shape_cast %22 : vector<1x1x1x8xf32> to vector<1x8xf32>
    %24 = vector.broadcast %23 : vector<1x8xf32> to vector<32x8xf32>
    %25 = arith.addf %21, %24 : vector<32x8xf32>
    %26 = vector.shape_cast %25 : vector<32x8xf32> to vector<4x8x8xf32>
    %c2 = arith.constant 2 : index
    %c0_25 = arith.constant 0 : index
    %c0_26 = arith.constant 0 : index
    %c0_27 = arith.constant 0 : index
    %27 = vector.load %arg6[%c2, %c0_25, %c0_26, %c0_27] : memref<3x4x32x8xf32, #tpu.memory_space<vmem>>, vector<1x1x32x8xf32>
    %28 = vector.shape_cast %27 : vector<1x1x32x8xf32> to vector<32x8xf32>
    %cst_28 = arith.constant dense<0.000000e+00> : vector<32x8xf32>
    %29 = tpu.matmul %1, %28, %cst_28 {dimension_numbers = #tpu.dot_dimension_numbers<[1], [0], [0], [1], [0, 0, 1, 1], [], []>} : vector<32x32xf32>, vector<32x8xf32>, vector<32x8xf32> -> vector<32x8xf32>
    %c2_29 = arith.constant 2 : index
    %c0_30 = arith.constant 0 : index
    %c0_31 = arith.constant 0 : index
    %c0_32 = arith.constant 0 : index
    %30 = vector.load %arg7[%c2_29, %c0_30, %c0_31, %c0_32] : memref<3x4x1x8xf32, #tpu.memory_space<vmem>>, vector<1x1x1x8xf32>
    %31 = vector.shape_cast %30 : vector<1x1x1x8xf32> to vector<1x8xf32>
    %32 = vector.broadcast %31 : vector<1x8xf32> to vector<32x8xf32>
    %33 = arith.addf %29, %32 : vector<32x8xf32>
    %34 = vector.shape_cast %33 : vector<32x8xf32> to vector<4x8x8xf32>
    "tpu.trace_start"() <{level = 10 : i32, message = "bqd,bkd->bqk"}> : () -> ()
    %cst_33 = arith.constant dense<0.000000e+00> : vector<4x8x8xf32>
    %35 = tpu.matmul %18, %26, %cst_33 {dimension_numbers = #tpu.dot_dimension_numbers<[2], [2], [1], [1], [0, 0, 0, 1, 1, 1], [0], [0]>} : vector<4x8x8xf32>, vector<4x8x8xf32>, vector<4x8x8xf32> -> vector<4x8x8xf32>
    "tpu.trace_stop"() : () -> ()
    %36 = vector.broadcast %8 : vector<4x1x8xf32> to vector<4x8x8xf32>
    %37 = arith.addf %35, %36 : vector<4x8x8xf32>
    %cst_34 = arith.constant dense<0xFF800000> : vector<4x8xf32>
    %38 = vector.multi_reduction <maximumf>, %37, %cst_34 [2] : vector<4x8x8xf32> to vector<4x8xf32>
    %39 = vector.shape_cast %38 : vector<4x8xf32> to vector<4x8x1xf32>
    %40 = vector.broadcast %39 : vector<4x8x1xf32> to vector<4x8x8xf32>
    %41 = arith.subf %37, %40 : vector<4x8x8xf32>
    %42 = math.exp %41 : vector<4x8x8xf32>
    %cst_35 = arith.constant dense<0.000000e+00> : vector<4x8xf32>
    %43 = vector.multi_reduction <add>, %42, %cst_35 [2] : vector<4x8x8xf32> to vector<4x8xf32>
    %44 = vector.shape_cast %43 : vector<4x8xf32> to vector<4x8x1xf32>
    %45 = vector.broadcast %44 : vector<4x8x1xf32> to vector<4x8x8xf32>
    %46 = arith.divf %42, %45 : vector<4x8x8xf32>
    %47 = arith.addf %9, %46 : vector<4x8x8xf32>
    "tpu.trace_start"() <{level = 10 : i32, message = "bqk,bkd->bqd"}> : () -> ()
    %cst_36 = arith.constant dense<0.000000e+00> : vector<4x8x8xf32>
    %48 = tpu.matmul %46, %34, %cst_36 {dimension_numbers = #tpu.dot_dimension_numbers<[2], [1], [1], [2], [0, 0, 0, 1, 1, 2], [0], [0]>} : vector<4x8x8xf32>, vector<4x8x8xf32>, vector<4x8x8xf32> -> vector<4x8x8xf32>
    "tpu.trace_stop"() : () -> ()
    %49 = vector.shape_cast %48 : vector<4x8x8xf32> to vector<32x8xf32>
    %c0_37 = arith.constant 0 : index
    %c0_38 = arith.constant 0 : index
    %c0_39 = arith.constant 0 : index
    %50 = vector.load %arg8[%c0_37, %c0_38, %c0_39] : memref<4x8x32xf32, #tpu.memory_space<vmem>>, vector<1x8x32xf32>
    %51 = vector.shape_cast %50 : vector<1x8x32xf32> to vector<8x32xf32>
    %cst_40 = arith.constant dense<0.000000e+00> : vector<32x32xf32>
    %52 = tpu.matmul %49, %51, %cst_40 {dimension_numbers = #tpu.dot_dimension_numbers<[1], [0], [0], [1], [0, 0, 1, 1], [], []>} : vector<32x8xf32>, vector<8x32xf32>, vector<32x32xf32> -> vector<32x32xf32>
    %53 = arith.addf %10, %52 : vector<32x32xf32>
    %c0_41 = arith.constant 0 : index
    %c1_42 = arith.constant 1 : index
    %c0_43 = arith.constant 0 : index
    %c0_44 = arith.constant 0 : index
    %54 = vector.load %arg6[%c0_41, %c1_42, %c0_43, %c0_44] : memref<3x4x32x8xf32, #tpu.memory_space<vmem>>, vector<1x1x32x8xf32>
    %55 = vector.shape_cast %54 : vector<1x1x32x8xf32> to vector<32x8xf32>
    %cst_45 = arith.constant dense<0.000000e+00> : vector<32x8xf32>
    %56 = tpu.matmul %1, %55, %cst_45 {dimension_numbers = #tpu.dot_dimension_numbers<[1], [0], [0], [1], [0, 0, 1, 1], [], []>} : vector<32x32xf32>, vector<32x8xf32>, vector<32x8xf32> -> vector<32x8xf32>
    %c0_46 = arith.constant 0 : index
    %c1_47 = arith.constant 1 : index
    %c0_48 = arith.constant 0 : index
    %c0_49 = arith.constant 0 : index
    %57 = vector.load %arg7[%c0_46, %c1_47, %c0_48, %c0_49] : memref<3x4x1x8xf32, #tpu.memory_space<vmem>>, vector<1x1x1x8xf32>
    %58 = vector.shape_cast %57 : vector<1x1x1x8xf32> to vector<1x8xf32>
    %59 = vector.broadcast %58 : vector<1x8xf32> to vector<32x8xf32>
    %60 = arith.addf %56, %59 : vector<32x8xf32>
    %61 = vector.shape_cast %60 : vector<32x8xf32> to vector<4x8x8xf32>
    %c1_50 = arith.constant 1 : index
    %c1_51 = arith.constant 1 : index
    %c0_52 = arith.constant 0 : index
    %c0_53 = arith.constant 0 : index
    %62 = vector.load %arg6[%c1_50, %c1_51, %c0_52, %c0_53] : memref<3x4x32x8xf32, #tpu.memory_space<vmem>>, vector<1x1x32x8xf32>
    %63 = vector.shape_cast %62 : vector<1x1x32x8xf32> to vector<32x8xf32>
    %cst_54 = arith.constant dense<0.000000e+00> : vector<32x8xf32>
    %64 = tpu.matmul %1, %63, %cst_54 {dimension_numbers = #tpu.dot_dimension_numbers<[1], [0], [0], [1], [0, 0, 1, 1], [], []>} : vector<32x32xf32>, vector<32x8xf32>, vector<32x8xf32> -> vector<32x8xf32>
    %c1_55 = arith.constant 1 : index
    %c1_56 = arith.constant 1 : index
    %c0_57 = arith.constant 0 : index
    %c0_58 = arith.constant 0 : index
    %65 = vector.load %arg7[%c1_55, %c1_56, %c0_57, %c0_58] : memref<3x4x1x8xf32, #tpu.memory_space<vmem>>, vector<1x1x1x8xf32>
    %66 = vector.shape_cast %65 : vector<1x1x1x8xf32> to vector<1x8xf32>
    %67 = vector.broadcast %66 : vector<1x8xf32> to vector<32x8xf32>
    %68 = arith.addf %64, %67 : vector<32x8xf32>
    %69 = vector.shape_cast %68 : vector<32x8xf32> to vector<4x8x8xf32>
    %c2_59 = arith.constant 2 : index
    %c1_60 = arith.constant 1 : index
    %c0_61 = arith.constant 0 : index
    %c0_62 = arith.constant 0 : index
    %70 = vector.load %arg6[%c2_59, %c1_60, %c0_61, %c0_62] : memref<3x4x32x8xf32, #tpu.memory_space<vmem>>, vector<1x1x32x8xf32>
    %71 = vector.shape_cast %70 : vector<1x1x32x8xf32> to vector<32x8xf32>
    %cst_63 = arith.constant dense<0.000000e+00> : vector<32x8xf32>
    %72 = tpu.matmul %1, %71, %cst_63 {dimension_numbers = #tpu.dot_dimension_numbers<[1], [0], [0], [1], [0, 0, 1, 1], [], []>} : vector<32x32xf32>, vector<32x8xf32>, vector<32x8xf32> -> vector<32x8xf32>
    %c2_64 = arith.constant 2 : index
    %c1_65 = arith.constant 1 : index
    %c0_66 = arith.constant 0 : index
    %c0_67 = arith.constant 0 : index
    %73 = vector.load %arg7[%c2_64, %c1_65, %c0_66, %c0_67] : memref<3x4x1x8xf32, #tpu.memory_space<vmem>>, vector<1x1x1x8xf32>
    %74 = vector.shape_cast %73 : vector<1x1x1x8xf32> to vector<1x8xf32>
    %75 = vector.broadcast %74 : vector<1x8xf32> to vector<32x8xf32>
    %76 = arith.addf %72, %75 : vector<32x8xf32>
    %77 = vector.shape_cast %76 : vector<32x8xf32> to vector<4x8x8xf32>
    "tpu.trace_start"() <{level = 10 : i32, message = "bqd,bkd->bqk"}> : () -> ()
    %cst_68 = arith.constant dense<0.000000e+00> : vector<4x8x8xf32>
    %78 = tpu.matmul %61, %69, %cst_68 {dimension_numbers = #tpu.dot_dimension_numbers<[2], [2], [1], [1], [0, 0, 0, 1, 1, 1], [0], [0]>} : vector<4x8x8xf32>, vector<4x8x8xf32>, vector<4x8x8xf32> -> vector<4x8x8xf32>
    "tpu.trace_stop"() : () -> ()
    %79 = vector.broadcast %8 : vector<4x1x8xf32> to vector<4x8x8xf32>
    %80 = arith.addf %78, %79 : vector<4x8x8xf32>
    %cst_69 = arith.constant dense<0xFF800000> : vector<4x8xf32>
    %81 = vector.multi_reduction <maximumf>, %80, %cst_69 [2] : vector<4x8x8xf32> to vector<4x8xf32>
    %82 = vector.shape_cast %81 : vector<4x8xf32> to vector<4x8x1xf32>
    %83 = vector.broadcast %82 : vector<4x8x1xf32> to vector<4x8x8xf32>
    %84 = arith.subf %80, %83 : vector<4x8x8xf32>
    %85 = math.exp %84 : vector<4x8x8xf32>
    %cst_70 = arith.constant dense<0.000000e+00> : vector<4x8xf32>
    %86 = vector.multi_reduction <add>, %85, %cst_70 [2] : vector<4x8x8xf32> to vector<4x8xf32>
    %87 = vector.shape_cast %86 : vector<4x8xf32> to vector<4x8x1xf32>
    %88 = vector.broadcast %87 : vector<4x8x1xf32> to vector<4x8x8xf32>
    %89 = arith.divf %85, %88 : vector<4x8x8xf32>
    %90 = arith.addf %47, %89 : vector<4x8x8xf32>
    "tpu.trace_start"() <{level = 10 : i32, message = "bqk,bkd->bqd"}> : () -> ()
    %cst_71 = arith.constant dense<0.000000e+00> : vector<4x8x8xf32>
    %91 = tpu.matmul %89, %77, %cst_71 {dimension_numbers = #tpu.dot_dimension_numbers<[2], [1], [1], [2], [0, 0, 0, 1, 1, 2], [0], [0]>} : vector<4x8x8xf32>, vector<4x8x8xf32>, vector<4x8x8xf32> -> vector<4x8x8xf32>
    "tpu.trace_stop"() : () -> ()
    %92 = vector.shape_cast %91 : vector<4x8x8xf32> to vector<32x8xf32>
    %c1_72 = arith.constant 1 : index
    %c0_73 = arith.constant 0 : index
    %c0_74 = arith.constant 0 : index
    %93 = vector.load %arg8[%c1_72, %c0_73, %c0_74] : memref<4x8x32xf32, #tpu.memory_space<vmem>>, vector<1x8x32xf32>
    %94 = vector.shape_cast %93 : vector<1x8x32xf32> to vector<8x32xf32>
    %cst_75 = arith.constant dense<0.000000e+00> : vector<32x32xf32>
    %95 = tpu.matmul %92, %94, %cst_75 {dimension_numbers = #tpu.dot_dimension_numbers<[1], [0], [0], [1], [0, 0, 1, 1], [], []>} : vector<32x8xf32>, vector<8x32xf32>, vector<32x32xf32> -> vector<32x32xf32>
    %96 = arith.addf %53, %95 : vector<32x32xf32>
    %c0_76 = arith.constant 0 : index
    %c2_77 = arith.constant 2 : index
    %c0_78 = arith.constant 0 : index
    %c0_79 = arith.constant 0 : index
    %97 = vector.load %arg6[%c0_76, %c2_77, %c0_78, %c0_79] : memref<3x4x32x8xf32, #tpu.memory_space<vmem>>, vector<1x1x32x8xf32>
    %98 = vector.shape_cast %97 : vector<1x1x32x8xf32> to vector<32x8xf32>
    %cst_80 = arith.constant dense<0.000000e+00> : vector<32x8xf32>
    %99 = tpu.matmul %1, %98, %cst_80 {dimension_numbers = #tpu.dot_dimension_numbers<[1], [0], [0], [1], [0, 0, 1, 1], [], []>} : vector<32x32xf32>, vector<32x8xf32>, vector<32x8xf32> -> vector<32x8xf32>
    %c0_81 = arith.constant 0 : index
    %c2_82 = arith.constant 2 : index
    %c0_83 = arith.constant 0 : index
    %c0_84 = arith.constant 0 : index
    %100 = vector.load %arg7[%c0_81, %c2_82, %c0_83, %c0_84] : memref<3x4x1x8xf32, #tpu.memory_space<vmem>>, vector<1x1x1x8xf32>
    %101 = vector.shape_cast %100 : vector<1x1x1x8xf32> to vector<1x8xf32>
    %102 = vector.broadcast %101 : vector<1x8xf32> to vector<32x8xf32>
    %103 = arith.addf %99, %102 : vector<32x8xf32>
    %104 = vector.shape_cast %103 : vector<32x8xf32> to vector<4x8x8xf32>
    %c1_85 = arith.constant 1 : index
    %c2_86 = arith.constant 2 : index
    %c0_87 = arith.constant 0 : index
    %c0_88 = arith.constant 0 : index
    %105 = vector.load %arg6[%c1_85, %c2_86, %c0_87, %c0_88] : memref<3x4x32x8xf32, #tpu.memory_space<vmem>>, vector<1x1x32x8xf32>
    %106 = vector.shape_cast %105 : vector<1x1x32x8xf32> to vector<32x8xf32>
    %cst_89 = arith.constant dense<0.000000e+00> : vector<32x8xf32>
    %107 = tpu.matmul %1, %106, %cst_89 {dimension_numbers = #tpu.dot_dimension_numbers<[1], [0], [0], [1], [0, 0, 1, 1], [], []>} : vector<32x32xf32>, vector<32x8xf32>, vector<32x8xf32> -> vector<32x8xf32>
    %c1_90 = arith.constant 1 : index
    %c2_91 = arith.constant 2 : index
    %c0_92 = arith.constant 0 : index
    %c0_93 = arith.constant 0 : index
    %108 = vector.load %arg7[%c1_90, %c2_91, %c0_92, %c0_93] : memref<3x4x1x8xf32, #tpu.memory_space<vmem>>, vector<1x1x1x8xf32>
    %109 = vector.shape_cast %108 : vector<1x1x1x8xf32> to vector<1x8xf32>
    %110 = vector.broadcast %109 : vector<1x8xf32> to vector<32x8xf32>
    %111 = arith.addf %107, %110 : vector<32x8xf32>
    %112 = vector.shape_cast %111 : vector<32x8xf32> to vector<4x8x8xf32>
    %c2_94 = arith.constant 2 : index
    %c2_95 = arith.constant 2 : index
    %c0_96 = arith.constant 0 : index
    %c0_97 = arith.constant 0 : index
    %113 = vector.load %arg6[%c2_94, %c2_95, %c0_96, %c0_97] : memref<3x4x32x8xf32, #tpu.memory_space<vmem>>, vector<1x1x32x8xf32>
    %114 = vector.shape_cast %113 : vector<1x1x32x8xf32> to vector<32x8xf32>
    %cst_98 = arith.constant dense<0.000000e+00> : vector<32x8xf32>
    %115 = tpu.matmul %1, %114, %cst_98 {dimension_numbers = #tpu.dot_dimension_numbers<[1], [0], [0], [1], [0, 0, 1, 1], [], []>} : vector<32x32xf32>, vector<32x8xf32>, vector<32x8xf32> -> vector<32x8xf32>
    %c2_99 = arith.constant 2 : index
    %c2_100 = arith.constant 2 : index
    %c0_101 = arith.constant 0 : index
    %c0_102 = arith.constant 0 : index
    %116 = vector.load %arg7[%c2_99, %c2_100, %c0_101, %c0_102] : memref<3x4x1x8xf32, #tpu.memory_space<vmem>>, vector<1x1x1x8xf32>
    %117 = vector.shape_cast %116 : vector<1x1x1x8xf32> to vector<1x8xf32>
    %118 = vector.broadcast %117 : vector<1x8xf32> to vector<32x8xf32>
    %119 = arith.addf %115, %118 : vector<32x8xf32>
    %120 = vector.shape_cast %119 : vector<32x8xf32> to vector<4x8x8xf32>
    "tpu.trace_start"() <{level = 10 : i32, message = "bqd,bkd->bqk"}> : () -> ()
    %cst_103 = arith.constant dense<0.000000e+00> : vector<4x8x8xf32>
    %121 = tpu.matmul %104, %112, %cst_103 {dimension_numbers = #tpu.dot_dimension_numbers<[2], [2], [1], [1], [0, 0, 0, 1, 1, 1], [0], [0]>} : vector<4x8x8xf32>, vector<4x8x8xf32>, vector<4x8x8xf32> -> vector<4x8x8xf32>
    "tpu.trace_stop"() : () -> ()
    %122 = vector.broadcast %8 : vector<4x1x8xf32> to vector<4x8x8xf32>
    %123 = arith.addf %121, %122 : vector<4x8x8xf32>
    %cst_104 = arith.constant dense<0xFF800000> : vector<4x8xf32>
    %124 = vector.multi_reduction <maximumf>, %123, %cst_104 [2] : vector<4x8x8xf32> to vector<4x8xf32>
    %125 = vector.shape_cast %124 : vector<4x8xf32> to vector<4x8x1xf32>
    %126 = vector.broadcast %125 : vector<4x8x1xf32> to vector<4x8x8xf32>
    %127 = arith.subf %123, %126 : vector<4x8x8xf32>
    %128 = math.exp %127 : vector<4x8x8xf32>
    %cst_105 = arith.constant dense<0.000000e+00> : vector<4x8xf32>
    %129 = vector.multi_reduction <add>, %128, %cst_105 [2] : vector<4x8x8xf32> to vector<4x8xf32>
    %130 = vector.shape_cast %129 : vector<4x8xf32> to vector<4x8x1xf32>
    %131 = vector.broadcast %130 : vector<4x8x1xf32> to vector<4x8x8xf32>
    %132 = arith.divf %128, %131 : vector<4x8x8xf32>
    %133 = arith.addf %90, %132 : vector<4x8x8xf32>
    "tpu.trace_start"() <{level = 10 : i32, message = "bqk,bkd->bqd"}> : () -> ()
    %cst_106 = arith.constant dense<0.000000e+00> : vector<4x8x8xf32>
    %134 = tpu.matmul %132, %120, %cst_106 {dimension_numbers = #tpu.dot_dimension_numbers<[2], [1], [1], [2], [0, 0, 0, 1, 1, 2], [0], [0]>} : vector<4x8x8xf32>, vector<4x8x8xf32>, vector<4x8x8xf32> -> vector<4x8x8xf32>
    "tpu.trace_stop"() : () -> ()
    %135 = vector.shape_cast %134 : vector<4x8x8xf32> to vector<32x8xf32>
    %c2_107 = arith.constant 2 : index
    %c0_108 = arith.constant 0 : index
    %c0_109 = arith.constant 0 : index
    %136 = vector.load %arg8[%c2_107, %c0_108, %c0_109] : memref<4x8x32xf32, #tpu.memory_space<vmem>>, vector<1x8x32xf32>
    %137 = vector.shape_cast %136 : vector<1x8x32xf32> to vector<8x32xf32>
    %cst_110 = arith.constant dense<0.000000e+00> : vector<32x32xf32>
    %138 = tpu.matmul %135, %137, %cst_110 {dimension_numbers = #tpu.dot_dimension_numbers<[1], [0], [0], [1], [0, 0, 1, 1], [], []>} : vector<32x8xf32>, vector<8x32xf32>, vector<32x32xf32> -> vector<32x32xf32>
    %139 = arith.addf %96, %138 : vector<32x32xf32>
    %c0_111 = arith.constant 0 : index
    %c3 = arith.constant 3 : index
    %c0_112 = arith.constant 0 : index
    %c0_113 = arith.constant 0 : index
    %140 = vector.load %arg6[%c0_111, %c3, %c0_112, %c0_113] : memref<3x4x32x8xf32, #tpu.memory_space<vmem>>, vector<1x1x32x8xf32>
    %141 = vector.shape_cast %140 : vector<1x1x32x8xf32> to vector<32x8xf32>
    %cst_114 = arith.constant dense<0.000000e+00> : vector<32x8xf32>
    %142 = tpu.matmul %1, %141, %cst_114 {dimension_numbers = #tpu.dot_dimension_numbers<[1], [0], [0], [1], [0, 0, 1, 1], [], []>} : vector<32x32xf32>, vector<32x8xf32>, vector<32x8xf32> -> vector<32x8xf32>
    %c0_115 = arith.constant 0 : index
    %c3_116 = arith.constant 3 : index
    %c0_117 = arith.constant 0 : index
    %c0_118 = arith.constant 0 : index
    %143 = vector.load %arg7[%c0_115, %c3_116, %c0_117, %c0_118] : memref<3x4x1x8xf32, #tpu.memory_space<vmem>>, vector<1x1x1x8xf32>
    %144 = vector.shape_cast %143 : vector<1x1x1x8xf32> to vector<1x8xf32>
    %145 = vector.broadcast %144 : vector<1x8xf32> to vector<32x8xf32>
    %146 = arith.addf %142, %145 : vector<32x8xf32>
    %147 = vector.shape_cast %146 : vector<32x8xf32> to vector<4x8x8xf32>
    %c1_119 = arith.constant 1 : index
    %c3_120 = arith.constant 3 : index
    %c0_121 = arith.constant 0 : index
    %c0_122 = arith.constant 0 : index
    %148 = vector.load %arg6[%c1_119, %c3_120, %c0_121, %c0_122] : memref<3x4x32x8xf32, #tpu.memory_space<vmem>>, vector<1x1x32x8xf32>
    %149 = vector.shape_cast %148 : vector<1x1x32x8xf32> to vector<32x8xf32>
    %cst_123 = arith.constant dense<0.000000e+00> : vector<32x8xf32>
    %150 = tpu.matmul %1, %149, %cst_123 {dimension_numbers = #tpu.dot_dimension_numbers<[1], [0], [0], [1], [0, 0, 1, 1], [], []>} : vector<32x32xf32>, vector<32x8xf32>, vector<32x8xf32> -> vector<32x8xf32>
    %c1_124 = arith.constant 1 : index
    %c3_125 = arith.constant 3 : index
    %c0_126 = arith.constant 0 : index
    %c0_127 = arith.constant 0 : index
    %151 = vector.load %arg7[%c1_124, %c3_125, %c0_126, %c0_127] : memref<3x4x1x8xf32, #tpu.memory_space<vmem>>, vector<1x1x1x8xf32>
    %152 = vector.shape_cast %151 : vector<1x1x1x8xf32> to vector<1x8xf32>
    %153 = vector.broadcast %152 : vector<1x8xf32> to vector<32x8xf32>
    %154 = arith.addf %150, %153 : vector<32x8xf32>
    %155 = vector.shape_cast %154 : vector<32x8xf32> to vector<4x8x8xf32>
    %c2_128 = arith.constant 2 : index
    %c3_129 = arith.constant 3 : index
    %c0_130 = arith.constant 0 : index
    %c0_131 = arith.constant 0 : index
    %156 = vector.load %arg6[%c2_128, %c3_129, %c0_130, %c0_131] : memref<3x4x32x8xf32, #tpu.memory_space<vmem>>, vector<1x1x32x8xf32>
    %157 = vector.shape_cast %156 : vector<1x1x32x8xf32> to vector<32x8xf32>
    %cst_132 = arith.constant dense<0.000000e+00> : vector<32x8xf32>
    %158 = tpu.matmul %1, %157, %cst_132 {dimension_numbers = #tpu.dot_dimension_numbers<[1], [0], [0], [1], [0, 0, 1, 1], [], []>} : vector<32x32xf32>, vector<32x8xf32>, vector<32x8xf32> -> vector<32x8xf32>
    %c2_133 = arith.constant 2 : index
    %c3_134 = arith.constant 3 : index
    %c0_135 = arith.constant 0 : index
    %c0_136 = arith.constant 0 : index
    %159 = vector.load %arg7[%c2_133, %c3_134, %c0_135, %c0_136] : memref<3x4x1x8xf32, #tpu.memory_space<vmem>>, vector<1x1x1x8xf32>
    %160 = vector.shape_cast %159 : vector<1x1x1x8xf32> to vector<1x8xf32>
    %161 = vector.broadcast %160 : vector<1x8xf32> to vector<32x8xf32>
    %162 = arith.addf %158, %161 : vector<32x8xf32>
    %163 = vector.shape_cast %162 : vector<32x8xf32> to vector<4x8x8xf32>
    "tpu.trace_start"() <{level = 10 : i32, message = "bqd,bkd->bqk"}> : () -> ()
    %cst_137 = arith.constant dense<0.000000e+00> : vector<4x8x8xf32>
    %164 = tpu.matmul %147, %155, %cst_137 {dimension_numbers = #tpu.dot_dimension_numbers<[2], [2], [1], [1], [0, 0, 0, 1, 1, 1], [0], [0]>} : vector<4x8x8xf32>, vector<4x8x8xf32>, vector<4x8x8xf32> -> vector<4x8x8xf32>
    "tpu.trace_stop"() : () -> ()
    %165 = vector.broadcast %8 : vector<4x1x8xf32> to vector<4x8x8xf32>
    %166 = arith.addf %164, %165 : vector<4x8x8xf32>
    %cst_138 = arith.constant dense<0xFF800000> : vector<4x8xf32>
    %167 = vector.multi_reduction <maximumf>, %166, %cst_138 [2] : vector<4x8x8xf32> to vector<4x8xf32>
    %168 = vector.shape_cast %167 : vector<4x8xf32> to vector<4x8x1xf32>
    %169 = vector.broadcast %168 : vector<4x8x1xf32> to vector<4x8x8xf32>
    %170 = arith.subf %166, %169 : vector<4x8x8xf32>
    %171 = math.exp %170 : vector<4x8x8xf32>
    %cst_139 = arith.constant dense<0.000000e+00> : vector<4x8xf32>
    %172 = vector.multi_reduction <add>, %171, %cst_139 [2] : vector<4x8x8xf32> to vector<4x8xf32>
    %173 = vector.shape_cast %172 : vector<4x8xf32> to vector<4x8x1xf32>
    %174 = vector.broadcast %173 : vector<4x8x1xf32> to vector<4x8x8xf32>
    %175 = arith.divf %171, %174 : vector<4x8x8xf32>
    %176 = arith.addf %133, %175 : vector<4x8x8xf32>
    "tpu.trace_start"() <{level = 10 : i32, message = "bqk,bkd->bqd"}> : () -> ()
    %cst_140 = arith.constant dense<0.000000e+00> : vector<4x8x8xf32>
    %177 = tpu.matmul %175, %163, %cst_140 {dimension_numbers = #tpu.dot_dimension_numbers<[2], [1], [1], [2], [0, 0, 0, 1, 1, 2], [0], [0]>} : vector<4x8x8xf32>, vector<4x8x8xf32>, vector<4x8x8xf32> -> vector<4x8x8xf32>
    "tpu.trace_stop"() : () -> ()
    %178 = vector.shape_cast %177 : vector<4x8x8xf32> to vector<32x8xf32>
    %c3_141 = arith.constant 3 : index
    %c0_142 = arith.constant 0 : index
    %c0_143 = arith.constant 0 : index
    %179 = vector.load %arg8[%c3_141, %c0_142, %c0_143] : memref<4x8x32xf32, #tpu.memory_space<vmem>>, vector<1x8x32xf32>
    %180 = vector.shape_cast %179 : vector<1x8x32xf32> to vector<8x32xf32>
    %cst_144 = arith.constant dense<0.000000e+00> : vector<32x32xf32>
    %181 = tpu.matmul %178, %180, %cst_144 {dimension_numbers = #tpu.dot_dimension_numbers<[1], [0], [0], [1], [0, 0, 1, 1], [], []>} : vector<32x8xf32>, vector<8x32xf32>, vector<32x32xf32> -> vector<32x32xf32>
    %182 = arith.addf %139, %181 : vector<32x32xf32>
    %cst_145 = arith.constant 2.500000e-01 : f32
    %183 = vector.broadcast %cst_145 : f32 to vector<4x8x8xf32>
    %184 = arith.mulf %176, %183 : vector<4x8x8xf32>
    %c0_146 = arith.constant 0 : index
    %c0_147 = arith.constant 0 : index
    %c0_148 = arith.constant 0 : index
    %185 = vector.load %arg20[%c0_146, %c0_147, %c0_148] : memref<4x8x8xf32, #tpu.memory_space<vmem>>, vector<4x8x8xf32>
    tpu.vector_store %arg20[%c0_146, %c0_147, %c0_148], %184 {strides = array<i32>} : memref<4x8x8xf32, #tpu.memory_space<vmem>>, vector<4x8x8xf32>,
    %c0_149 = arith.constant 0 : index
    %c0_150 = arith.constant 0 : index
    %186 = vector.load %arg9[%c0_149, %c0_150] : memref<1x32xf32, #tpu.memory_space<vmem>>, vector<1x32xf32>
    %187 = vector.broadcast %186 : vector<1x32xf32> to vector<32x32xf32>
    %188 = arith.addf %182, %187 : vector<32x32xf32>
    %189 = vector.shape_cast %188 : vector<32x32xf32> to vector<4x8x32xf32>
    %c0_151 = arith.constant 0 : index
    %c0_152 = arith.constant 0 : index
    %190 = vector.load %arg4[%c0_151, %c0_152] : memref<6x6xf32, #tpu.memory_space<vmem>>, vector<6x6xf32>
    %191 = tpu.iota {dimensions = array<i32: 0>} : vector<6x6xi32>
    %192 = tpu.iota {dimensions = array<i32: 1>} : vector<6x6xi32>
    %193 = arith.cmpi eq, %191, %192 : vector<6x6xi32>
    %cst_153 = arith.constant 1.000000e+00 : f32
    %cst_154 = arith.constant 0.000000e+00 : f32
    %194 = vector.broadcast %cst_153 : f32 to vector<6x6xf32>
    %195 = vector.broadcast %cst_154 : f32 to vector<6x6xf32>
    %196 = arith.select %193, %194, %195 : vector<6x6xi1>, vector<6x6xf32>
    %197 = arith.addf %190, %196 : vector<6x6xf32>
    %cst_155 = arith.constant dense<0.000000e+00> : vector<6xf32>
    %198 = vector.multi_reduction <add>, %197, %cst_155 [1] : vector<6x6xf32> to vector<6xf32>
    %199 = vector.shape_cast %198 : vector<6xf32> to vector<6x1xf32>
    %cst_156 = arith.constant 0.000000e+00 : f32
    %200 = vector.broadcast %cst_156 : f32 to vector<6x1xf32>
    %201 = arith.cmpf ogt, %199, %200 : vector<6x1xf32>
    %202 = math.rsqrt %199 : vector<6x1xf32>
    %cst_157 = arith.constant 0.000000e+00 : f32
    %203 = vector.broadcast %cst_157 : f32 to vector<6x1xf32>
    %204 = arith.select %201, %202, %203 : vector<6x1xi1>, vector<6x1xf32>
    %c0_158 = arith.constant 0 : index
    %c0_159 = arith.constant 0 : index
    %205 = vector.load %arg3[%c0_158, %c0_159] : memref<6x32xf32, #tpu.memory_space<vmem>>, vector<6x32xf32>
    %c0_160 = arith.constant 0 : index
    %c0_161 = arith.constant 0 : index
    %206 = vector.load %arg10[%c0_160, %c0_161] : memref<32x32xf32, #tpu.memory_space<vmem>>, vector<32x32xf32>
    %cst_162 = arith.constant dense<0.000000e+00> : vector<6x32xf32>
    %207 = tpu.matmul %205, %206, %cst_162 {dimension_numbers = #tpu.dot_dimension_numbers<[1], [0], [0], [1], [0, 0, 1, 1], [], []>} : vector<6x32xf32>, vector<32x32xf32>, vector<6x32xf32> -> vector<6x32xf32>
    %208 = vector.broadcast %204 : vector<6x1xf32> to vector<6x32xf32>
    %209 = arith.mulf %208, %207 : vector<6x32xf32>
    %cst_163 = arith.constant dense<0.000000e+00> : vector<6x32xf32>
    %210 = tpu.matmul %197, %209, %cst_163 {dimension_numbers = #tpu.dot_dimension_numbers<[1], [0], [0], [1], [0, 0, 1, 1], [], []>} : vector<6x6xf32>, vector<6x32xf32>, vector<6x32xf32> -> vector<6x32xf32>
    %211 = vector.broadcast %204 : vector<6x1xf32> to vector<6x32xf32>
    %212 = arith.mulf %211, %210 : vector<6x32xf32>
    %c0_164 = arith.constant 0 : index
    %c0_165 = arith.constant 0 : index
    %213 = vector.load %arg11[%c0_164, %c0_165] : memref<1x32xf32, #tpu.memory_space<vmem>>, vector<1x32xf32>
    %214 = vector.broadcast %213 : vector<1x32xf32> to vector<6x32xf32>
    %215 = arith.addf %212, %214 : vector<6x32xf32>
    %c0_166 = arith.constant 0 : index
    %c0_167 = arith.constant 0 : index
    %216 = vector.load %arg5[%c0_166, %c0_167] : memref<4x6xf32, #tpu.memory_space<vmem>>, vector<4x6xf32>
    %cst_168 = arith.constant 5.000000e-01 : f32
    %217 = vector.broadcast %cst_168 : f32 to vector<4x6xf32>
    %218 = arith.cmpf ogt, %216, %217 : vector<4x6xf32>
    %cst_169 = arith.constant 0.000000e+00 : f32
    %cst_170 = arith.constant 0xFF800000 : f32
    %219 = vector.broadcast %cst_169 : f32 to vector<4x6xf32>
    %220 = vector.broadcast %cst_170 : f32 to vector<4x6xf32>
    %221 = arith.select %218, %219, %220 : vector<4x6xi1>, vector<4x6xf32>
    %222 = vector.extract_strided_slice %215 {offsets = [0, 0], sizes = [4, 32], strides = [1, 1]} : vector<6x32xf32> to vector<4x32xf32>
    %cst_171 = arith.constant 0.000000e+00 : f32
    %223 = vector.broadcast %cst_171 : f32 to vector<4x32xf32>
    %c0_172 = arith.constant 0 : index
    %c0_173 = arith.constant 0 : index
    %c0_174 = arith.constant 0 : index
    %c0_175 = arith.constant 0 : index
    %224 = vector.load %arg12[%c0_172, %c0_173, %c0_174, %c0_175] : memref<3x4x32x8xf32, #tpu.memory_space<vmem>>, vector<1x1x32x8xf32>
    %225 = vector.shape_cast %224 : vector<1x1x32x8xf32> to vector<32x8xf32>
    %cst_176 = arith.constant dense<0.000000e+00> : vector<4x8xf32>
    %226 = tpu.matmul %222, %225, %cst_176 {dimension_numbers = #tpu.dot_dimension_numbers<[1], [0], [0], [1], [0, 0, 1, 1], [], []>} : vector<4x32xf32>, vector<32x8xf32>, vector<4x8xf32> -> vector<4x8xf32>
    %c0_177 = arith.constant 0 : index
    %c0_178 = arith.constant 0 : index
    %c0_179 = arith.constant 0 : index
    %c0_180 = arith.constant 0 : index
    %227 = vector.load %arg13[%c0_177, %c0_178, %c0_179, %c0_180] : memref<3x4x1x8xf32, #tpu.memory_space<vmem>>, vector<1x1x1x8xf32>
    %228 = vector.shape_cast %227 : vector<1x1x1x8xf32> to vector<1x8xf32>
    %229 = vector.broadcast %228 : vector<1x8xf32> to vector<4x8xf32>
    %230 = arith.addf %226, %229 : vector<4x8xf32>
    %c1_181 = arith.constant 1 : index
    %c0_182 = arith.constant 0 : index
    %c0_183 = arith.constant 0 : index
    %c0_184 = arith.constant 0 : index
    %231 = vector.load %arg12[%c1_181, %c0_182, %c0_183, %c0_184] : memref<3x4x32x8xf32, #tpu.memory_space<vmem>>, vector<1x1x32x8xf32>
    %232 = vector.shape_cast %231 : vector<1x1x32x8xf32> to vector<32x8xf32>
    %cst_185 = arith.constant dense<0.000000e+00> : vector<6x8xf32>
    %233 = tpu.matmul %215, %232, %cst_185 {dimension_numbers = #tpu.dot_dimension_numbers<[1], [0], [0], [1], [0, 0, 1, 1], [], []>} : vector<6x32xf32>, vector<32x8xf32>, vector<6x8xf32> -> vector<6x8xf32>
    %c1_186 = arith.constant 1 : index
    %c0_187 = arith.constant 0 : index
    %c0_188 = arith.constant 0 : index
    %c0_189 = arith.constant 0 : index
    %234 = vector.load %arg13[%c1_186, %c0_187, %c0_188, %c0_189] : memref<3x4x1x8xf32, #tpu.memory_space<vmem>>, vector<1x1x1x8xf32>
    %235 = vector.shape_cast %234 : vector<1x1x1x8xf32> to vector<1x8xf32>
    %236 = vector.broadcast %235 : vector<1x8xf32> to vector<6x8xf32>
    %237 = arith.addf %233, %236 : vector<6x8xf32>
    %c2_190 = arith.constant 2 : index
    %c0_191 = arith.constant 0 : index
    %c0_192 = arith.constant 0 : index
    %c0_193 = arith.constant 0 : index
    %238 = vector.load %arg12[%c2_190, %c0_191, %c0_192, %c0_193] : memref<3x4x32x8xf32, #tpu.memory_space<vmem>>, vector<1x1x32x8xf32>
    %239 = vector.shape_cast %238 : vector<1x1x32x8xf32> to vector<32x8xf32>
    %cst_194 = arith.constant dense<0.000000e+00> : vector<6x8xf32>
    %240 = tpu.matmul %215, %239, %cst_194 {dimension_numbers = #tpu.dot_dimension_numbers<[1], [0], [0], [1], [0, 0, 1, 1], [], []>} : vector<6x32xf32>, vector<32x8xf32>, vector<6x8xf32> -> vector<6x8xf32>
    %c2_195 = arith.constant 2 : index
    %c0_196 = arith.constant 0 : index
    %c0_197 = arith.constant 0 : index
    %c0_198 = arith.constant 0 : index
    %241 = vector.load %arg13[%c2_195, %c0_196, %c0_197, %c0_198] : memref<3x4x1x8xf32, #tpu.memory_space<vmem>>, vector<1x1x1x8xf32>
    %242 = vector.shape_cast %241 : vector<1x1x1x8xf32> to vector<1x8xf32>
    %243 = vector.broadcast %242 : vector<1x8xf32> to vector<6x8xf32>
    %244 = arith.addf %240, %243 : vector<6x8xf32>
    "tpu.trace_start"() <{level = 10 : i32, message = "qd,kd->qk"}> : () -> ()
    %cst_199 = arith.constant dense<0.000000e+00> : vector<4x6xf32>
    %245 = tpu.matmul %230, %237, %cst_199 {dimension_numbers = #tpu.dot_dimension_numbers<[1], [1], [0], [0], [0, 0, 1, 0], [], []>} : vector<4x8xf32>, vector<6x8xf32>, vector<4x6xf32> -> vector<4x6xf32>
    "tpu.trace_stop"() : () -> ()
    %246 = arith.addf %245, %221 : vector<4x6xf32>
    %cst_200 = arith.constant dense<0xFF800000> : vector<4xf32>
    %247 = vector.multi_reduction <maximumf>, %246, %cst_200 [1] : vector<4x6xf32> to vector<4xf32>
    %248 = vector.shape_cast %247 : vector<4xf32> to vector<4x1xf32>
    %249 = vector.broadcast %248 : vector<4x1xf32> to vector<4x6xf32>
    %250 = arith.subf %246, %249 : vector<4x6xf32>
    %251 = math.exp %250 : vector<4x6xf32>
    %cst_201 = arith.constant dense<0.000000e+00> : vector<4xf32>
    %252 = vector.multi_reduction <add>, %251, %cst_201 [1] : vector<4x6xf32> to vector<4xf32>
    %253 = vector.shape_cast %252 : vector<4xf32> to vector<4x1xf32>
    %254 = vector.broadcast %253 : vector<4x1xf32> to vector<4x6xf32>
    %255 = arith.divf %251, %254 : vector<4x6xf32>
    %cst_202 = arith.constant dense<0.000000e+00> : vector<4x8xf32>
    %256 = tpu.matmul %255, %244, %cst_202 {dimension_numbers = #tpu.dot_dimension_numbers<[1], [0], [0], [1], [0, 0, 1, 1], [], []>} : vector<4x6xf32>, vector<6x8xf32>, vector<4x8xf32> -> vector<4x8xf32>
    %c0_203 = arith.constant 0 : index
    %c0_204 = arith.constant 0 : index
    %c0_205 = arith.constant 0 : index
    %257 = vector.load %arg14[%c0_203, %c0_204, %c0_205] : memref<4x8x32xf32, #tpu.memory_space<vmem>>, vector<1x8x32xf32>
    %258 = vector.shape_cast %257 : vector<1x8x32xf32> to vector<8x32xf32>
    %cst_206 = arith.constant dense<0.000000e+00> : vector<4x32xf32>
    %259 = tpu.matmul %256, %258, %cst_206 {dimension_numbers = #tpu.dot_dimension_numbers<[1], [0], [0], [1], [0, 0, 1, 1], [], []>} : vector<4x8xf32>, vector<8x32xf32>, vector<4x32xf32> -> vector<4x32xf32>
    %260 = arith.addf %223, %259 : vector<4x32xf32>
    %c0_207 = arith.constant 0 : index
    %c1_208 = arith.constant 1 : index
    %c0_209 = arith.constant 0 : index
    %c0_210 = arith.constant 0 : index
    %261 = vector.load %arg12[%c0_207, %c1_208, %c0_209, %c0_210] : memref<3x4x32x8xf32, #tpu.memory_space<vmem>>, vector<1x1x32x8xf32>
    %262 = vector.shape_cast %261 : vector<1x1x32x8xf32> to vector<32x8xf32>
    %cst_211 = arith.constant dense<0.000000e+00> : vector<4x8xf32>
    %263 = tpu.matmul %222, %262, %cst_211 {dimension_numbers = #tpu.dot_dimension_numbers<[1], [0], [0], [1], [0, 0, 1, 1], [], []>} : vector<4x32xf32>, vector<32x8xf32>, vector<4x8xf32> -> vector<4x8xf32>
    %c0_212 = arith.constant 0 : index
    %c1_213 = arith.constant 1 : index
    %c0_214 = arith.constant 0 : index
    %c0_215 = arith.constant 0 : index
    %264 = vector.load %arg13[%c0_212, %c1_213, %c0_214, %c0_215] : memref<3x4x1x8xf32, #tpu.memory_space<vmem>>, vector<1x1x1x8xf32>
    %265 = vector.shape_cast %264 : vector<1x1x1x8xf32> to vector<1x8xf32>
    %266 = vector.broadcast %265 : vector<1x8xf32> to vector<4x8xf32>
    %267 = arith.addf %263, %266 : vector<4x8xf32>
    %c1_216 = arith.constant 1 : index
    %c1_217 = arith.constant 1 : index
    %c0_218 = arith.constant 0 : index
    %c0_219 = arith.constant 0 : index
    %268 = vector.load %arg12[%c1_216, %c1_217, %c0_218, %c0_219] : memref<3x4x32x8xf32, #tpu.memory_space<vmem>>, vector<1x1x32x8xf32>
    %269 = vector.shape_cast %268 : vector<1x1x32x8xf32> to vector<32x8xf32>
    %cst_220 = arith.constant dense<0.000000e+00> : vector<6x8xf32>
    %270 = tpu.matmul %215, %269, %cst_220 {dimension_numbers = #tpu.dot_dimension_numbers<[1], [0], [0], [1], [0, 0, 1, 1], [], []>} : vector<6x32xf32>, vector<32x8xf32>, vector<6x8xf32> -> vector<6x8xf32>
    %c1_221 = arith.constant 1 : index
    %c1_222 = arith.constant 1 : index
    %c0_223 = arith.constant 0 : index
    %c0_224 = arith.constant 0 : index
    %271 = vector.load %arg13[%c1_221, %c1_222, %c0_223, %c0_224] : memref<3x4x1x8xf32, #tpu.memory_space<vmem>>, vector<1x1x1x8xf32>
    %272 = vector.shape_cast %271 : vector<1x1x1x8xf32> to vector<1x8xf32>
    %273 = vector.broadcast %272 : vector<1x8xf32> to vector<6x8xf32>
    %274 = arith.addf %270, %273 : vector<6x8xf32>
    %c2_225 = arith.constant 2 : index
    %c1_226 = arith.constant 1 : index
    %c0_227 = arith.constant 0 : index
    %c0_228 = arith.constant 0 : index
    %275 = vector.load %arg12[%c2_225, %c1_226, %c0_227, %c0_228] : memref<3x4x32x8xf32, #tpu.memory_space<vmem>>, vector<1x1x32x8xf32>
    %276 = vector.shape_cast %275 : vector<1x1x32x8xf32> to vector<32x8xf32>
    %cst_229 = arith.constant dense<0.000000e+00> : vector<6x8xf32>
    %277 = tpu.matmul %215, %276, %cst_229 {dimension_numbers = #tpu.dot_dimension_numbers<[1], [0], [0], [1], [0, 0, 1, 1], [], []>} : vector<6x32xf32>, vector<32x8xf32>, vector<6x8xf32> -> vector<6x8xf32>
    %c2_230 = arith.constant 2 : index
    %c1_231 = arith.constant 1 : index
    %c0_232 = arith.constant 0 : index
    %c0_233 = arith.constant 0 : index
    %278 = vector.load %arg13[%c2_230, %c1_231, %c0_232, %c0_233] : memref<3x4x1x8xf32, #tpu.memory_space<vmem>>, vector<1x1x1x8xf32>
    %279 = vector.shape_cast %278 : vector<1x1x1x8xf32> to vector<1x8xf32>
    %280 = vector.broadcast %279 : vector<1x8xf32> to vector<6x8xf32>
    %281 = arith.addf %277, %280 : vector<6x8xf32>
    "tpu.trace_start"() <{level = 10 : i32, message = "qd,kd->qk"}> : () -> ()
    %cst_234 = arith.constant dense<0.000000e+00> : vector<4x6xf32>
    %282 = tpu.matmul %267, %274, %cst_234 {dimension_numbers = #tpu.dot_dimension_numbers<[1], [1], [0], [0], [0, 0, 1, 0], [], []>} : vector<4x8xf32>, vector<6x8xf32>, vector<4x6xf32> -> vector<4x6xf32>
    "tpu.trace_stop"() : () -> ()
    %283 = arith.addf %282, %221 : vector<4x6xf32>
    %cst_235 = arith.constant dense<0xFF800000> : vector<4xf32>
    %284 = vector.multi_reduction <maximumf>, %283, %cst_235 [1] : vector<4x6xf32> to vector<4xf32>
    %285 = vector.shape_cast %284 : vector<4xf32> to vector<4x1xf32>
    %286 = vector.broadcast %285 : vector<4x1xf32> to vector<4x6xf32>
    %287 = arith.subf %283, %286 : vector<4x6xf32>
    %288 = math.exp %287 : vector<4x6xf32>
    %cst_236 = arith.constant dense<0.000000e+00> : vector<4xf32>
    %289 = vector.multi_reduction <add>, %288, %cst_236 [1] : vector<4x6xf32> to vector<4xf32>
    %290 = vector.shape_cast %289 : vector<4xf32> to vector<4x1xf32>
    %291 = vector.broadcast %290 : vector<4x1xf32> to vector<4x6xf32>
    %292 = arith.divf %288, %291 : vector<4x6xf32>
    %cst_237 = arith.constant dense<0.000000e+00> : vector<4x8xf32>
    %293 = tpu.matmul %292, %281, %cst_237 {dimension_numbers = #tpu.dot_dimension_numbers<[1], [0], [0], [1], [0, 0, 1, 1], [], []>} : vector<4x6xf32>, vector<6x8xf32>, vector<4x8xf32> -> vector<4x8xf32>
    %c1_238 = arith.constant 1 : index
    %c0_239 = arith.constant 0 : index
    %c0_240 = arith.constant 0 : index
    %294 = vector.load %arg14[%c1_238, %c0_239, %c0_240] : memref<4x8x32xf32, #tpu.memory_space<vmem>>, vector<1x8x32xf32>
    %295 = vector.shape_cast %294 : vector<1x8x32xf32> to vector<8x32xf32>
    %cst_241 = arith.constant dense<0.000000e+00> : vector<4x32xf32>
    %296 = tpu.matmul %293, %295, %cst_241 {dimension_numbers = #tpu.dot_dimension_numbers<[1], [0], [0], [1], [0, 0, 1, 1], [], []>} : vector<4x8xf32>, vector<8x32xf32>, vector<4x32xf32> -> vector<4x32xf32>
    %297 = arith.addf %260, %296 : vector<4x32xf32>
    %c0_242 = arith.constant 0 : index
    %c2_243 = arith.constant 2 : index
    %c0_244 = arith.constant 0 : index
    %c0_245 = arith.constant 0 : index
    %298 = vector.load %arg12[%c0_242, %c2_243, %c0_244, %c0_245] : memref<3x4x32x8xf32, #tpu.memory_space<vmem>>, vector<1x1x32x8xf32>
    %299 = vector.shape_cast %298 : vector<1x1x32x8xf32> to vector<32x8xf32>
    %cst_246 = arith.constant dense<0.000000e+00> : vector<4x8xf32>
    %300 = tpu.matmul %222, %299, %cst_246 {dimension_numbers = #tpu.dot_dimension_numbers<[1], [0], [0], [1], [0, 0, 1, 1], [], []>} : vector<4x32xf32>, vector<32x8xf32>, vector<4x8xf32> -> vector<4x8xf32>
    %c0_247 = arith.constant 0 : index
    %c2_248 = arith.constant 2 : index
    %c0_249 = arith.constant 0 : index
    %c0_250 = arith.constant 0 : index
    %301 = vector.load %arg13[%c0_247, %c2_248, %c0_249, %c0_250] : memref<3x4x1x8xf32, #tpu.memory_space<vmem>>, vector<1x1x1x8xf32>
    %302 = vector.shape_cast %301 : vector<1x1x1x8xf32> to vector<1x8xf32>
    %303 = vector.broadcast %302 : vector<1x8xf32> to vector<4x8xf32>
    %304 = arith.addf %300, %303 : vector<4x8xf32>
    %c1_251 = arith.constant 1 : index
    %c2_252 = arith.constant 2 : index
    %c0_253 = arith.constant 0 : index
    %c0_254 = arith.constant 0 : index
    %305 = vector.load %arg12[%c1_251, %c2_252, %c0_253, %c0_254] : memref<3x4x32x8xf32, #tpu.memory_space<vmem>>, vector<1x1x32x8xf32>
    %306 = vector.shape_cast %305 : vector<1x1x32x8xf32> to vector<32x8xf32>
    %cst_255 = arith.constant dense<0.000000e+00> : vector<6x8xf32>
    %307 = tpu.matmul %215, %306, %cst_255 {dimension_numbers = #tpu.dot_dimension_numbers<[1], [0], [0], [1], [0, 0, 1, 1], [], []>} : vector<6x32xf32>, vector<32x8xf32>, vector<6x8xf32> -> vector<6x8xf32>
    %c1_256 = arith.constant 1 : index
    %c2_257 = arith.constant 2 : index
    %c0_258 = arith.constant 0 : index
    %c0_259 = arith.constant 0 : index
    %308 = vector.load %arg13[%c1_256, %c2_257, %c0_258, %c0_259] : memref<3x4x1x8xf32, #tpu.memory_space<vmem>>, vector<1x1x1x8xf32>
    %309 = vector.shape_cast %308 : vector<1x1x1x8xf32> to vector<1x8xf32>
    %310 = vector.broadcast %309 : vector<1x8xf32> to vector<6x8xf32>
    %311 = arith.addf %307, %310 : vector<6x8xf32>
    %c2_260 = arith.constant 2 : index
    %c2_261 = arith.constant 2 : index
    %c0_262 = arith.constant 0 : index
    %c0_263 = arith.constant 0 : index
    %312 = vector.load %arg12[%c2_260, %c2_261, %c0_262, %c0_263] : memref<3x4x32x8xf32, #tpu.memory_space<vmem>>, vector<1x1x32x8xf32>
    %313 = vector.shape_cast %312 : vector<1x1x32x8xf32> to vector<32x8xf32>
    %cst_264 = arith.constant dense<0.000000e+00> : vector<6x8xf32>
    %314 = tpu.matmul %215, %313, %cst_264 {dimension_numbers = #tpu.dot_dimension_numbers<[1], [0], [0], [1], [0, 0, 1, 1], [], []>} : vector<6x32xf32>, vector<32x8xf32>, vector<6x8xf32> -> vector<6x8xf32>
    %c2_265 = arith.constant 2 : index
    %c2_266 = arith.constant 2 : index
    %c0_267 = arith.constant 0 : index
    %c0_268 = arith.constant 0 : index
    %315 = vector.load %arg13[%c2_265, %c2_266, %c0_267, %c0_268] : memref<3x4x1x8xf32, #tpu.memory_space<vmem>>, vector<1x1x1x8xf32>
    %316 = vector.shape_cast %315 : vector<1x1x1x8xf32> to vector<1x8xf32>
    %317 = vector.broadcast %316 : vector<1x8xf32> to vector<6x8xf32>
    %318 = arith.addf %314, %317 : vector<6x8xf32>
    "tpu.trace_start"() <{level = 10 : i32, message = "qd,kd->qk"}> : () -> ()
    %cst_269 = arith.constant dense<0.000000e+00> : vector<4x6xf32>
    %319 = tpu.matmul %304, %311, %cst_269 {dimension_numbers = #tpu.dot_dimension_numbers<[1], [1], [0], [0], [0, 0, 1, 0], [], []>} : vector<4x8xf32>, vector<6x8xf32>, vector<4x6xf32> -> vector<4x6xf32>
    "tpu.trace_stop"() : () -> ()
    %320 = arith.addf %319, %221 : vector<4x6xf32>
    %cst_270 = arith.constant dense<0xFF800000> : vector<4xf32>
    %321 = vector.multi_reduction <maximumf>, %320, %cst_270 [1] : vector<4x6xf32> to vector<4xf32>
    %322 = vector.shape_cast %321 : vector<4xf32> to vector<4x1xf32>
    %323 = vector.broadcast %322 : vector<4x1xf32> to vector<4x6xf32>
    %324 = arith.subf %320, %323 : vector<4x6xf32>
    %325 = math.exp %324 : vector<4x6xf32>
    %cst_271 = arith.constant dense<0.000000e+00> : vector<4xf32>
    %326 = vector.multi_reduction <add>, %325, %cst_271 [1] : vector<4x6xf32> to vector<4xf32>
    %327 = vector.shape_cast %326 : vector<4xf32> to vector<4x1xf32>
    %328 = vector.broadcast %327 : vector<4x1xf32> to vector<4x6xf32>
    %329 = arith.divf %325, %328 : vector<4x6xf32>
    %cst_272 = arith.constant dense<0.000000e+00> : vector<4x8xf32>
    %330 = tpu.matmul %329, %318, %cst_272 {dimension_numbers = #tpu.dot_dimension_numbers<[1], [0], [0], [1], [0, 0, 1, 1], [], []>} : vector<4x6xf32>, vector<6x8xf32>, vector<4x8xf32> -> vector<4x8xf32>
    %c2_273 = arith.constant 2 : index
    %c0_274 = arith.constant 0 : index
    %c0_275 = arith.constant 0 : index
    %331 = vector.load %arg14[%c2_273, %c0_274, %c0_275] : memref<4x8x32xf32, #tpu.memory_space<vmem>>, vector<1x8x32xf32>
    %332 = vector.shape_cast %331 : vector<1x8x32xf32> to vector<8x32xf32>
    %cst_276 = arith.constant dense<0.000000e+00> : vector<4x32xf32>
    %333 = tpu.matmul %330, %332, %cst_276 {dimension_numbers = #tpu.dot_dimension_numbers<[1], [0], [0], [1], [0, 0, 1, 1], [], []>} : vector<4x8xf32>, vector<8x32xf32>, vector<4x32xf32> -> vector<4x32xf32>
    %334 = arith.addf %297, %333 : vector<4x32xf32>
    %c0_277 = arith.constant 0 : index
    %c3_278 = arith.constant 3 : index
    %c0_279 = arith.constant 0 : index
    %c0_280 = arith.constant 0 : index
    %335 = vector.load %arg12[%c0_277, %c3_278, %c0_279, %c0_280] : memref<3x4x32x8xf32, #tpu.memory_space<vmem>>, vector<1x1x32x8xf32>
    %336 = vector.shape_cast %335 : vector<1x1x32x8xf32> to vector<32x8xf32>
    %cst_281 = arith.constant dense<0.000000e+00> : vector<4x8xf32>
    %337 = tpu.matmul %222, %336, %cst_281 {dimension_numbers = #tpu.dot_dimension_numbers<[1], [0], [0], [1], [0, 0, 1, 1], [], []>} : vector<4x32xf32>, vector<32x8xf32>, vector<4x8xf32> -> vector<4x8xf32>
    %c0_282 = arith.constant 0 : index
    %c3_283 = arith.constant 3 : index
    %c0_284 = arith.constant 0 : index
    %c0_285 = arith.constant 0 : index
    %338 = vector.load %arg13[%c0_282, %c3_283, %c0_284, %c0_285] : memref<3x4x1x8xf32, #tpu.memory_space<vmem>>, vector<1x1x1x8xf32>
    %339 = vector.shape_cast %338 : vector<1x1x1x8xf32> to vector<1x8xf32>
    %340 = vector.broadcast %339 : vector<1x8xf32> to vector<4x8xf32>
    %341 = arith.addf %337, %340 : vector<4x8xf32>
    %c1_286 = arith.constant 1 : index
    %c3_287 = arith.constant 3 : index
    %c0_288 = arith.constant 0 : index
    %c0_289 = arith.constant 0 : index
    %342 = vector.load %arg12[%c1_286, %c3_287, %c0_288, %c0_289] : memref<3x4x32x8xf32, #tpu.memory_space<vmem>>, vector<1x1x32x8xf32>
    %343 = vector.shape_cast %342 : vector<1x1x32x8xf32> to vector<32x8xf32>
    %cst_290 = arith.constant dense<0.000000e+00> : vector<6x8xf32>
    %344 = tpu.matmul %215, %343, %cst_290 {dimension_numbers = #tpu.dot_dimension_numbers<[1], [0], [0], [1], [0, 0, 1, 1], [], []>} : vector<6x32xf32>, vector<32x8xf32>, vector<6x8xf32> -> vector<6x8xf32>
    %c1_291 = arith.constant 1 : index
    %c3_292 = arith.constant 3 : index
    %c0_293 = arith.constant 0 : index
    %c0_294 = arith.constant 0 : index
    %345 = vector.load %arg13[%c1_291, %c3_292, %c0_293, %c0_294] : memref<3x4x1x8xf32, #tpu.memory_space<vmem>>, vector<1x1x1x8xf32>
    %346 = vector.shape_cast %345 : vector<1x1x1x8xf32> to vector<1x8xf32>
    %347 = vector.broadcast %346 : vector<1x8xf32> to vector<6x8xf32>
    %348 = arith.addf %344, %347 : vector<6x8xf32>
    %c2_295 = arith.constant 2 : index
    %c3_296 = arith.constant 3 : index
    %c0_297 = arith.constant 0 : index
    %c0_298 = arith.constant 0 : index
    %349 = vector.load %arg12[%c2_295, %c3_296, %c0_297, %c0_298] : memref<3x4x32x8xf32, #tpu.memory_space<vmem>>, vector<1x1x32x8xf32>
    %350 = vector.shape_cast %349 : vector<1x1x32x8xf32> to vector<32x8xf32>
    %cst_299 = arith.constant dense<0.000000e+00> : vector<6x8xf32>
    %351 = tpu.matmul %215, %350, %cst_299 {dimension_numbers = #tpu.dot_dimension_numbers<[1], [0], [0], [1], [0, 0, 1, 1], [], []>} : vector<6x32xf32>, vector<32x8xf32>, vector<6x8xf32> -> vector<6x8xf32>
    %c2_300 = arith.constant 2 : index
    %c3_301 = arith.constant 3 : index
    %c0_302 = arith.constant 0 : index
    %c0_303 = arith.constant 0 : index
    %352 = vector.load %arg13[%c2_300, %c3_301, %c0_302, %c0_303] : memref<3x4x1x8xf32, #tpu.memory_space<vmem>>, vector<1x1x1x8xf32>
    %353 = vector.shape_cast %352 : vector<1x1x1x8xf32> to vector<1x8xf32>
    %354 = vector.broadcast %353 : vector<1x8xf32> to vector<6x8xf32>
    %355 = arith.addf %351, %354 : vector<6x8xf32>
    "tpu.trace_start"() <{level = 10 : i32, message = "qd,kd->qk"}> : () -> ()
    %cst_304 = arith.constant dense<0.000000e+00> : vector<4x6xf32>
    %356 = tpu.matmul %341, %348, %cst_304 {dimension_numbers = #tpu.dot_dimension_numbers<[1], [1], [0], [0], [0, 0, 1, 0], [], []>} : vector<4x8xf32>, vector<6x8xf32>, vector<4x6xf32> -> vector<4x6xf32>
    "tpu.trace_stop"() : () -> ()
    %357 = arith.addf %356, %221 : vector<4x6xf32>
    %cst_305 = arith.constant dense<0xFF800000> : vector<4xf32>
    %358 = vector.multi_reduction <maximumf>, %357, %cst_305 [1] : vector<4x6xf32> to vector<4xf32>
    %359 = vector.shape_cast %358 : vector<4xf32> to vector<4x1xf32>
    %360 = vector.broadcast %359 : vector<4x1xf32> to vector<4x6xf32>
    %361 = arith.subf %357, %360 : vector<4x6xf32>
    %362 = math.exp %361 : vector<4x6xf32>
    %cst_306 = arith.constant dense<0.000000e+00> : vector<4xf32>
    %363 = vector.multi_reduction <add>, %362, %cst_306 [1] : vector<4x6xf32> to vector<4xf32>
    %364 = vector.shape_cast %363 : vector<4xf32> to vector<4x1xf32>
    %365 = vector.broadcast %364 : vector<4x1xf32> to vector<4x6xf32>
    %366 = arith.divf %362, %365 : vector<4x6xf32>
    %cst_307 = arith.constant dense<0.000000e+00> : vector<4x8xf32>
    %367 = tpu.matmul %366, %355, %cst_307 {dimension_numbers = #tpu.dot_dimension_numbers<[1], [0], [0], [1], [0, 0, 1, 1], [], []>} : vector<4x6xf32>, vector<6x8xf32>, vector<4x8xf32> -> vector<4x8xf32>
    %c3_308 = arith.constant 3 : index
    %c0_309 = arith.constant 0 : index
    %c0_310 = arith.constant 0 : index
    %368 = vector.load %arg14[%c3_308, %c0_309, %c0_310] : memref<4x8x32xf32, #tpu.memory_space<vmem>>, vector<1x8x32xf32>
    %369 = vector.shape_cast %368 : vector<1x8x32xf32> to vector<8x32xf32>
    %cst_311 = arith.constant dense<0.000000e+00> : vector<4x32xf32>
    %370 = tpu.matmul %367, %369, %cst_311 {dimension_numbers = #tpu.dot_dimension_numbers<[1], [0], [0], [1], [0, 0, 1, 1], [], []>} : vector<4x8xf32>, vector<8x32xf32>, vector<4x32xf32> -> vector<4x32xf32>
    %371 = arith.addf %334, %370 : vector<4x32xf32>
    %c0_312 = arith.constant 0 : index
    %c0_313 = arith.constant 0 : index
    %372 = vector.load %arg15[%c0_312, %c0_313] : memref<1x32xf32, #tpu.memory_space<vmem>>, vector<1x32xf32>
    %373 = vector.broadcast %372 : vector<1x32xf32> to vector<4x32xf32>
    %374 = arith.addf %371, %373 : vector<4x32xf32>
    %c0_314 = arith.constant 0 : index
    %c0_315 = arith.constant 0 : index
    %375 = vector.load %arg19[%c0_314, %c0_315] : memref<6x32xf32, #tpu.memory_space<vmem>>, vector<6x32xf32>
    tpu.vector_store %arg19[%c0_314, %c0_315], %215 {strides = array<i32>} : memref<6x32xf32, #tpu.memory_space<vmem>>, vector<6x32xf32>,
    %376 = vector.extract_strided_slice %189 {offsets = [0, 0, 0], sizes = [4, 1, 32], strides = [1, 1, 1]} : vector<4x8x32xf32> to vector<4x1x32xf32>
    %377 = vector.shape_cast %376 : vector<4x1x32xf32> to vector<4x32xf32>
    %c0_316 = arith.constant 0 : index
    %c0_317 = arith.constant 0 : index
    %378 = vector.load %arg16[%c0_316, %c0_317] : memref<32x32xf32, #tpu.memory_space<vmem>>, vector<32x32xf32>
    %cst_318 = arith.constant dense<0.000000e+00> : vector<4x32xf32>
    %379 = tpu.matmul %377, %378, %cst_318 {dimension_numbers = #tpu.dot_dimension_numbers<[1], [0], [0], [1], [0, 0, 1, 1], [], []>} : vector<4x32xf32>, vector<32x32xf32>, vector<4x32xf32> -> vector<4x32xf32>
    %c0_319 = arith.constant 0 : index
    %c0_320 = arith.constant 0 : index
    %380 = vector.load %arg17[%c0_319, %c0_320] : memref<32x32xf32, #tpu.memory_space<vmem>>, vector<32x32xf32>
    %cst_321 = arith.constant dense<0.000000e+00> : vector<4x32xf32>
    %381 = tpu.matmul %374, %380, %cst_321 {dimension_numbers = #tpu.dot_dimension_numbers<[1], [0], [0], [1], [0, 0, 1, 1], [], []>} : vector<4x32xf32>, vector<32x32xf32>, vector<4x32xf32> -> vector<4x32xf32>
    %382 = arith.mulf %377, %379 : vector<4x32xf32>
    %cst_322 = arith.constant dense<0.000000e+00> : vector<4xf32>
    %383 = vector.multi_reduction <add>, %382, %cst_322 [1] : vector<4x32xf32> to vector<4xf32>
    %384 = vector.shape_cast %383 : vector<4xf32> to vector<4x1xf32>
    %385 = arith.mulf %377, %381 : vector<4x32xf32>
    %cst_323 = arith.constant dense<0.000000e+00> : vector<4xf32>
    %386 = vector.multi_reduction <add>, %385, %cst_323 [1] : vector<4x32xf32> to vector<4xf32>
    %387 = vector.shape_cast %386 : vector<4xf32> to vector<4x1xf32>
    %388 = arith.mulf %374, %379 : vector<4x32xf32>
    %cst_324 = arith.constant dense<0.000000e+00> : vector<4xf32>
    %389 = vector.multi_reduction <add>, %388, %cst_324 [1] : vector<4x32xf32> to vector<4xf32>
    %390 = vector.shape_cast %389 : vector<4xf32> to vector<4x1xf32>
    %391 = arith.mulf %374, %381 : vector<4x32xf32>
    %cst_325 = arith.constant dense<0.000000e+00> : vector<4xf32>
    %392 = vector.multi_reduction <add>, %391, %cst_325 [1] : vector<4x32xf32> to vector<4xf32>
    %393 = vector.shape_cast %392 : vector<4xf32> to vector<4x1xf32>
    %394 = arith.maximumf %384, %387 : vector<4x1xf32>
    %395 = arith.subf %384, %394 : vector<4x1xf32>
    %396 = math.exp %395 : vector<4x1xf32>
    %397 = arith.subf %387, %394 : vector<4x1xf32>
    %398 = math.exp %397 : vector<4x1xf32>
    %399 = arith.maximumf %390, %393 : vector<4x1xf32>
    %400 = arith.subf %390, %399 : vector<4x1xf32>
    %401 = math.exp %400 : vector<4x1xf32>
    %402 = arith.subf %393, %399 : vector<4x1xf32>
    %403 = math.exp %402 : vector<4x1xf32>
    %404 = vector.broadcast %396 : vector<4x1xf32> to vector<4x32xf32>
    %405 = arith.mulf %404, %377 : vector<4x32xf32>
    %406 = vector.broadcast %398 : vector<4x1xf32> to vector<4x32xf32>
    %407 = arith.mulf %406, %374 : vector<4x32xf32>
    %408 = arith.addf %405, %407 : vector<4x32xf32>
    %409 = arith.addf %396, %398 : vector<4x1xf32>
    %410 = vector.broadcast %409 : vector<4x1xf32> to vector<4x32xf32>
    %411 = arith.divf %408, %410 : vector<4x32xf32>
    %412 = vector.broadcast %401 : vector<4x1xf32> to vector<4x32xf32>
    %413 = arith.mulf %412, %411 : vector<4x32xf32>
    %414 = vector.broadcast %403 : vector<4x1xf32> to vector<4x32xf32>
    %415 = arith.mulf %414, %374 : vector<4x32xf32>
    %416 = arith.addf %413, %415 : vector<4x32xf32>
    %417 = arith.addf %401, %403 : vector<4x1xf32>
    %418 = vector.broadcast %417 : vector<4x1xf32> to vector<4x32xf32>
    %419 = arith.divf %416, %418 : vector<4x32xf32>
    %420 = tpu.iota {dimensions = array<i32: 1>} : vector<4x8x32xi32>
    %c0_i32 = arith.constant 0 : i32
    %421 = vector.broadcast %c0_i32 : i32 to vector<4x8x32xi32>
    %422 = arith.cmpi eq, %420, %421 : vector<4x8x32xi32>
    %423 = vector.shape_cast %411 : vector<4x32xf32> to vector<4x1x32xf32>
    %424 = vector.shape_cast %423 : vector<4x1x32xf32> to vector<4x1x32xf32>
    %425 = vector.broadcast %424 : vector<4x1x32xf32> to vector<4x8x32xf32>
    %426 = arith.select %422, %425, %189 : vector<4x8x32xi1>, vector<4x8x32xf32>
    %c0_326 = arith.constant 0 : index
    %c0_327 = arith.constant 0 : index
    %c0_328 = arith.constant 0 : index
    %427 = vector.load %arg18[%c0_326, %c0_327, %c0_328] : memref<4x8x32xf32, #tpu.memory_space<vmem>>, vector<4x8x32xf32>
    tpu.vector_store %arg18[%c0_326, %c0_327, %c0_328], %426 {strides = array<i32>} : memref<4x8x32xf32, #tpu.memory_space<vmem>>, vector<4x8x32xf32>,
    %c0_329 = arith.constant 0 : index
    %c0_330 = arith.constant 0 : index
    %428 = vector.load %arg19[%c0_329, %c0_330] : memref<6x32xf32, #tpu.memory_space<vmem>>, vector<4x32xf32>
    tpu.vector_store %arg19[%c0_329, %c0_330], %419 {strides = array<i32>} : memref<6x32xf32, #tpu.memory_space<vmem>>, vector<4x32xf32>,
    return
  }
  func.func @transform_0(%arg0: i32) -> (i32, i32, i32) {
    %c0_i32 = arith.constant 0 : i32
    %c0_i32_0 = arith.constant 0 : i32
    %c0_i32_1 = arith.constant 0 : i32
    %c0_i32_2 = arith.constant 0 : i32
    return %c0_i32, %c0_i32_0, %c0_i32_1 : i32, i32, i32
  }
  func.func @transform_1(%arg0: i32) -> (i32, i32) {
    %c0_i32 = arith.constant 0 : i32
    %c0_i32_0 = arith.constant 0 : i32
    %c0_i32_1 = arith.constant 0 : i32
    return %c0_i32, %c0_i32_0 : i32, i32
  }
  func.func @transform_2(%arg0: i32) -> (i32, i32) {
    %c0_i32 = arith.constant 0 : i32
    %c0_i32_0 = arith.constant 0 : i32
    %c0_i32_1 = arith.constant 0 : i32
    return %c0_i32, %c0_i32_0 : i32, i32
  }
  func.func @transform_3(%arg0: i32) -> (i32, i32) {
    %c0_i32 = arith.constant 0 : i32
    %c0_i32_0 = arith.constant 0 : i32
    %c0_i32_1 = arith.constant 0 : i32
    return %c0_i32, %c0_i32_0 : i32, i32
  }
  func.func @transform_4(%arg0: i32) -> (i32, i32) {
    %c0_i32 = arith.constant 0 : i32
    %c0_i32_0 = arith.constant 0 : i32
    %c0_i32_1 = arith.constant 0 : i32
    return %c0_i32, %c0_i32_0 : i32, i32
  }
  func.func @transform_5(%arg0: i32) -> (i32, i32, i32, i32) {
    %c0_i32 = arith.constant 0 : i32
    %c0_i32_0 = arith.constant 0 : i32
    %c0_i32_1 = arith.constant 0 : i32
    %c0_i32_2 = arith.constant 0 : i32
    %c0_i32_3 = arith.constant 0 : i32
    return %c0_i32, %c0_i32_0, %c0_i32_1, %c0_i32_2 : i32, i32, i32, i32
  }
  func.func @transform_6(%arg0: i32) -> (i32, i32, i32, i32) {
    %c0_i32 = arith.constant 0 : i32
    %c0_i32_0 = arith.constant 0 : i32
    %c0_i32_1 = arith.constant 0 : i32
    %c0_i32_2 = arith.constant 0 : i32
    %c0_i32_3 = arith.constant 0 : i32
    return %c0_i32, %c0_i32_0, %c0_i32_1, %c0_i32_2 : i32, i32, i32, i32
  }
  func.func @transform_7(%arg0: i32) -> (i32, i32, i32) {
    %c0_i32 = arith.constant 0 : i32
    %c0_i32_0 = arith.constant 0 : i32
    %c0_i32_1 = arith.constant 0 : i32
    %c0_i32_2 = arith.constant 0 : i32
    return %c0_i32, %c0_i32_0, %c0_i32_1 : i32, i32, i32
  }
  func.func @transform_8(%arg0: i32) -> (i32, i32) {
    %c0_i32 = arith.constant 0 : i32
    %c0_i32_0 = arith.constant 0 : i32
    %c0_i32_1 = arith.constant 0 : i32
    return %c0_i32, %c0_i32_0 : i32, i32
  }
  func.func @transform_9(%arg0: i32) -> (i32, i32) {
    %c0_i32 = arith.constant 0 : i32
    %c0_i32_0 = arith.constant 0 : i32
    %c0_i32_1 = arith.constant 0 : i32
    return %c0_i32, %c0_i32_0 : i32, i32
  }
  func.func @transform_10(%arg0: i32) -> (i32, i32) {
    %c0_i32 = arith.constant 0 : i32
    %c0_i32_0 = arith.constant 0 : i32
    %c0_i32_1 = arith.constant 0 : i32
    return %c0_i32, %c0_i32_0 : i32, i32
  }
  func.func @transform_11(%arg0: i32) -> (i32, i32, i32, i32) {
    %c0_i32 = arith.constant 0 : i32
    %c0_i32_0 = arith.constant 0 : i32
    %c0_i32_1 = arith.constant 0 : i32
    %c0_i32_2 = arith.constant 0 : i32
    %c0_i32_3 = arith.constant 0 : i32
    return %c0_i32, %c0_i32_0, %c0_i32_1, %c0_i32_2 : i32, i32, i32, i32
  }
  func.func @transform_12(%arg0: i32) -> (i32, i32, i32, i32) {
    %c0_i32 = arith.constant 0 : i32
    %c0_i32_0 = arith.constant 0 : i32
    %c0_i32_1 = arith.constant 0 : i32
    %c0_i32_2 = arith.constant 0 : i32
    %c0_i32_3 = arith.constant 0 : i32
    return %c0_i32, %c0_i32_0, %c0_i32_1, %c0_i32_2 : i32, i32, i32, i32
  }
  func.func @transform_13(%arg0: i32) -> (i32, i32, i32) {
    %c0_i32 = arith.constant 0 : i32
    %c0_i32_0 = arith.constant 0 : i32
    %c0_i32_1 = arith.constant 0 : i32
    %c0_i32_2 = arith.constant 0 : i32
    return %c0_i32, %c0_i32_0, %c0_i32_1 : i32, i32, i32
  }
  func.func @transform_14(%arg0: i32) -> (i32, i32) {
    %c0_i32 = arith.constant 0 : i32
    %c0_i32_0 = arith.constant 0 : i32
    %c0_i32_1 = arith.constant 0 : i32
    return %c0_i32, %c0_i32_0 : i32, i32
  }
  func.func @transform_15(%arg0: i32) -> (i32, i32) {
    %c0_i32 = arith.constant 0 : i32
    %c0_i32_0 = arith.constant 0 : i32
    %c0_i32_1 = arith.constant 0 : i32
    return %c0_i32, %c0_i32_0 : i32, i32
  }
  func.func @transform_16(%arg0: i32) -> (i32, i32) {
    %c0_i32 = arith.constant 0 : i32
    %c0_i32_0 = arith.constant 0 : i32
    %c0_i32_1 = arith.constant 0 : i32
    return %c0_i32, %c0_i32_0 : i32, i32
  }
  func.func @transform_17(%arg0: i32) -> (i32, i32, i32) {
    %c0_i32 = arith.constant 0 : i32
    %c0_i32_0 = arith.constant 0 : i32
    %c0_i32_1 = arith.constant 0 : i32
    %c0_i32_2 = arith.constant 0 : i32
    return %c0_i32, %c0_i32_0, %c0_i32_1 : i32, i32, i32
  }
  func.func @transform_18(%arg0: i32) -> (i32, i32) {
    %c0_i32 = arith.constant 0 : i32
    %c0_i32_0 = arith.constant 0 : i32
    %c0_i32_1 = arith.constant 0 : i32
    return %c0_i32, %c0_i32_0 : i32, i32
  }
  func.func @transform_19(%arg0: i32) -> (i32, i32, i32) {
    %c0_i32 = arith.constant 0 : i32
    %c0_i32_0 = arith.constant 0 : i32
    %c0_i32_1 = arith.constant 0 : i32
    %c0_i32_2 = arith.constant 0 : i32
    return %c0_i32, %c0_i32_0, %c0_i32_1 : i32, i32, i32
  }
}

</mosaic_0001>

<bundles_post_ra>
// kernel: inter_layer_forward.1
= control target key start
LH: loop header
LB: loop body
LE: loop exit
PB: predicated region body
PF: predicated region fallthrough
CT: control target
= control target key end

     0   :  { %s9470_s0 = inlined_call_operand.vmem [shape: f32[4,8,32], index: 0, kind: input, shape index: {}]   ;;  %s9471_s1 = inlined_call_operand.vmem [shape: f32[4,8], index: 1, kind: input, shape index: {}]   ;;  %s9472_s2 = inlined_call_operand.vmem [shape: f32[6,32], index: 2, kind: input, shape index: {}]   ;;  %s9473_s3 = inlined_call_operand.vmem [shape: f32[6,6], index: 3, kind: input, shape index: {}]   ;;  %s9474_s4 = inlined_call_operand.vmem [shape: f32[4,6], index: 4, kind: input, shape index: {}]   ;;  %s9475_s5 = inlined_call_operand.vmem [shape: f32[3,4,32,8], index: 5, kind: input, shape index: {}]   ;;  %s9476_s6 = inlined_call_operand.vmem [shape: f32[3,4,1,8], index: 6, kind: input, shape index: {}]   ;;  %s9477_s7 = inlined_call_operand.vmem [shape: f32[4,8,32], index: 7, kind: input, shape index: {}]   ;;  %s9478_s8 = inlined_call_operand.vmem [shape: f32[1,32], index: 8, kind: input, shape index: {}]   ;;  %s9479_s9 = inlined_call_operand.vmem [shape: f32[32,32], index: 9, kind: input, shape index: {}]   ;;  %s9480_s10 = inlined_call_operand.vmem [shape: f32[1,32], index: 10, kind: input, shape index: {}]   ;;  %s9481_s11 = inlined_call_operand.vmem [shape: f32[3,4,32,8], index: 11, kind: input, shape index: {}]   ;;  %s9482_s12 = inlined_call_operand.vmem [shape: f32[3,4,1,8], index: 12, kind: input, shape index: {}]   ;;  %s9483_s13 = inlined_call_operand.vmem [shape: f32[4,8,32], index: 13, kind: input, shape index: {}]   ;;  %s9484_s14 = inlined_call_operand.vmem [shape: f32[1,32], index: 14, kind: input, shape index: {}]   ;;  %s9485_s15 = inlined_call_operand.vmem [shape: f32[32,32], index: 15, kind: input, shape index: {}]   ;;  %s9486_s16 = inlined_call_operand.vmem [shape: f32[32,32], index: 16, kind: input, shape index: {}]   ;;  %s9487_s17 = inlined_call_operand.hbm [shape: f32[4,8,32], index: 17, kind: output, shape index: {0}]   ;;  %s9488_s18 = inlined_call_operand.hbm [shape: f32[6,32], index: 18, kind: output, shape index: {1}]   ;;  %s9489_s19 = inlined_call_operand.hbm [shape: f32[4,8,8], index: 19, kind: output, shape index: {2}]  }
   0x1   :  { %9491 = sst [smem:[#allocation9_spill]] %s9470_s0 }
   0x2   :  { %9492 = sst [smem:[#allocation10_spill]] %s9471_s1 }
   0x3   :  { %9493 = sst [smem:[#allocation11_spill]] %s9472_s2 }
   0x4   :  { %9494 = sst [smem:[#allocation12_spill]] %s9473_s3 }
   0x5   :  { %25 = vsyncpa [#allocation3], 0  ;;  %v6806_v0 = vld [vmem:[%s9475_s5 + $0x98] sm:$0xff]  ;;  %v6805_v2 = vld [vmem:[%s9475_s5 + $0x90] sm:$0xff] }
   0x6   :  { %v96_v1 = vld [vmem:[%s9475_s5 + $0x18] sm:$0xff]  ;;  %7385 = vmatprep.subr.mxu1 %v6806_v0  ;;  %v95_v3 = vld [vmem:[%s9475_s5 + $0x10] sm:$0xff]  ;;  %v6804_v4 = vld [vmem:[%s9475_s5 + $0x88] sm:$0xff] }
   0x7   :  { %7371 = vmatprep.subr.mxu0 %v96_v1  ;;  %7386 = vmatpush3.msra.mxu1 %v6806_v0  ;;  %v94_v5 = vld [vmem:[%s9475_s5 + $0x8] sm:$0xff]  ;;  %v6803_v6 = vld [vmem:[%s9475_s5 + $0x80] sm:$0xff] }
   0x8   :  { %7372 = vmatpush3.msra.mxu0 %v96_v1  ;;  %7387 = vmatprep.subr.mxu1 %v6805_v2  ;;  %v93_v7 = vld [vmem:[%s9475_s5] sm:$0xff] }
   0x9   :  { %7373 = vmatprep.subr.mxu0 %v95_v3  ;;  %7388 = vmatpush3.msra.mxu1 %v6805_v2 }
   0xa   :  { %7374 = vmatpush3.msra.mxu0 %v95_v3 }
   0xb   :  { %26 = vsyncpa [#allocation5], 0  ;;  %7389 = vmatprep.subr.mxu1 %v6804_v4  ;;  %7375 = vmatprep.subr.mxu0 %v94_v5  ;;  %s9495_s21 = sld [smem:[#allocation9_spill]]  ;;  %vm104_vm0 = vcmask 261120   ;;  %v6816_v11 = vld [vmem:[%s9475_s5 + $0x118] sm:$0xff]  ;;  %v6815_v13 = vld [vmem:[%s9475_s5 + $0x110] sm:$0xff]  ;;  %v72_v44 = vlaneseq }
   0xc   :  { %7390 = vmatpush3.msra.mxu1 %v6804_v4  ;;  %7376 = vmatpush3.msra.mxu0 %v94_v5  ;;  %v6814_v14 = vld [vmem:[%s9475_s5 + $0x108] sm:$0xff]  ;;  %v6813_v15 = vld [vmem:[%s9475_s5 + $0x100] sm:$0xff]  ;;  %v8132_v16 = vmov 0.0   ;;  %vm8133_vm1 = vmmov 0   ;;  %vm418_vm2 = vcmask 64512   ;;  %s9496_s27 = sld [smem:[#allocation10_spill]] }
   0xd   :  { %7391 = vmatprep.subr.mxu1 %v6803_v6  ;;  %7377 = vmatprep.subr.mxu0 %v93_v7  ;;  %v6808_v19 = vld [vmem:[%s9476_s6 + $0x4] ss:$0 sm:$0xff]  ;;  %v6798_v22 = vld [vmem:[%s9476_s6] ss:$0 sm:$0xff]  ;;  %v8356_v35 = vld [vmem:[%s9476_s6 + $0x8] ss:$0 sm:$0xff] }
   0xe   :  { %7392 = vmatpush3.msra.mxu1 %v6803_v6  ;;  %7378 = vmatpush3.msra.mxu0 %v93_v7  ;;  %v8134_v42 = vmov 1966171168   ;;  %v8369_v47 = vshrl.u32 %v72_v44, 7  ;;  %s9497_s20 = sld [smem:[#allocation12_spill]]  ;;  %vm4307_vm5 = vcmask 46080   ;;  %vm4397_vm7 = vcmask 1045504  }
   0xf   :  { %7399 = vmatprep.subr.mxu0 %v6816_v11  ;;  %7413 = vmatprep.subr.mxu1 %v8132_v16  ;;  %v70_v43 = vunpack.c.l.s4 %v8134_v42  ;;  %s9498_s28 = sld [smem:[#allocation11_spill]]  ;;  %vm4393_vm8 = vcmask 48128   ;;  %vm6442_vm9 = vcmask 259072   ;;  %vm4809_vm11 = vcmask 44032   ;;  %s8137_s0 = smov [#allocation6]  }
  0x10   :  { %v8379_v54 = vsub.s32 0, %v8369_v47  ;;  %vm6453_vm12 = vcmask 1041409   ;;  %vm6456_vm13 = vcmask 1042434   ;;  %vm6459_vm14 = vcmask 1043459  }
  0x11   :  { %v8268_v8 = vld [vmem:[%s9495_s21] sm:$0xff]  ;;  %v8273_v9 = vld [vmem:[%s9495_s21 + $0x8] sm:$0xff]  ;;  %v8280_v10 = vld [vmem:[%s9495_s21 + $0x10] sm:$0xff]  ;;  %v71_v46 = vunpack.c.0.s8 %v70_v43  ;;  %vm6633_vm15 = vcmask 257024  }
  0x12   :  { %7393 = vmatprep.mubr.msk.f32.mxu1 %vm104_vm0, %v8268_v8  ;;  %7379 = vmatprep.mubr.msk.f32.mxu0 %vm104_vm0, %v8268_v8  ;;  %v8296_v12 = vld [vmem:[%s9495_s21 + $0x18] sm:$0xff]  ;;  %v65_v45 = vld [vmem:[%s9496_s27] sm:$0xf] }
  0x13   :  { %7394 = vmatmul.mubr.msk.f32.vlgmr.msra.gmra.mxu1 %vm104_vm0, %v8273_v9  ;;  %7380 = vmatmul.mubr.msk.f32.vlgmr.msra.gmra.mxu0 %vm104_vm0, %v8273_v9  ;;  %vm66_vm3 = vcmp.gt.f32.partialorder %v65_v45, 0.5  ;;  %v8372_v48 = vsub.s32 %v71_v46, %v8369_v47 }
  0x14   :  { %7396 = vmatprep.mubr.msk.f32.mxu1 %vm104_vm0, %v8280_v10  ;;  %7382 = vmatprep.mubr.msk.f32.mxu0 %vm104_vm0, %v8280_v10  ;;  %v67_v49 = vsel %vm66_vm3, -inf, %v8132_v16 }
  0x15   :  { %7400 = vmatpush3.msra.mxu0 %v6816_v11  ;;  %v75_v50 = vrot.slane %v67_v49, %v8372_v48 }
  0x16   :  { %7401 = vmatprep.subr.mxu0 %v6815_v13 }
  0x17   :  { %7397 = vmatmul.mubr.msk.f32.gmra.mxu1 %vm104_vm0, %v8296_v12  ;;  %7383 = vmatmul.mubr.msk.f32.gmra.mxu0 %vm104_vm0, %v8296_v12  ;;  %v76_v51 = vcombine.high %v75_v50, %v75_v50  ;;  %v83_v53 = vrot.slane %v75_v50, %v8372_v48  ;;  %v6848_v50 = vld [vmem:[%s9475_s5 + $0xb8] sm:$0xff] }
  0x18   :  { %7407 = vmatprep.mubr.msk.f32.mxu0 %vm104_vm0, %v8268_v8  ;;  %7402 = vmatpush3.msra.mxu0 %v6815_v13 }
  0x19   :  { %7403 = vmatprep.subr.mxu0 %v6814_v14  ;;  %7415 = vmatprep.mubr.msk.f32.mxu1 %vm8133_vm1, %v8132_v16  ;;  %v90_v52 = vrot.slane %v76_v51, %v8372_v48  ;;  %v8387_v60 = vrot.slane %v83_v53, %v8379_v54  ;;  %v91_v61 = vcombine.high %v83_v53, %v83_v53 }
  0x1a   :  { %7404 = vmatpush3.msra.mxu0 %v6814_v14 }
  0x1b   :  { %7405 = vmatprep.subr.mxu0 %v6813_v15  ;;  %v8384_v57 = vrot.slane %v90_v52, %v8379_v54  ;;  %v92_v58 = vcombine.high %v90_v52, %v90_v52  ;;  %v8395_v4 = vrot.slane %v91_v61, %v8379_v54 }
  0x1c   :  { %7406 = vmatpush3.msra.mxu0 %v6813_v15 }
  0x1d   :  { %7408 = vmatmul.mubr.msk.f32.vlgmr.msra.gmra.mxu0 %vm104_vm0, %v8273_v9  ;;  %7423 = vmatprep.subr.mxu0 %v8132_v16  ;;  %v8391_v1 = vrot.slane %v92_v58, %v8379_v54 }
  0x1e   :  { %7410 = vmatprep.mubr.msk.f32.mxu0 %vm104_vm0, %v8280_v10 }
  0x21   :  { %7411 = vmatmul.mubr.msk.f32.gmra.mxu0 %vm104_vm0, %v8296_v12 }
  0x22   :  { %7425 = vmatprep.mubr.msk.f32.mxu0 %vm8133_vm1, %v8132_v16 }
  0xd3   :  { %v7395_v17 = vpop.f32.mrf.mxu1  ;;  %v7381_v18 = vpop.f32.mrf.mxu0 }
  0xd4   :  { %v287_v29 = vadd.f32 %v7395_v17, %v6808_v19  ;;  %v189_v33 = vadd.f32 %v7381_v18, %v6798_v22 }
  0xd5   :  { %v281_v20 = vpop.f32.mrf.mxu1  ;;  %v183_v21 = vpop.f32.mrf.mxu0 }
  0xd6   :  { %v282_v23 = vadd.f32 %v6808_v19, %v281_v20  ;;  %v184_v26 = vadd.f32 %v6798_v22, %v183_v21 }
  0xd7   :  { %v7398_v24 = vpop.f32.mrf.mxu1  ;;  %v7384_v25 = vpop.f32.mrf.mxu0 }
  0xd8   :  { %7414 = vmatpush3.xpose.msk.msra.mxu1 %vm418_vm2, %v282_v23  ;;  %v297_v31 = vadd.f32 %v7398_v24, %v6808_v19  ;;  %v199_v34 = vadd.f32 %v7384_v25, %v6798_v22 }
  0xd9   :  { %v291_v27 = vpop.f32.mrf.mxu1  ;;  %7418 = vmatprep.subr.mxu1 %v8132_v16  ;;  %v193_v28 = vpop.f32.mrf.mxu0 }
  0xda   :  { %v292_v30 = vadd.f32 %v6808_v19, %v291_v27  ;;  %v194_v32 = vadd.f32 %v6798_v22, %v193_v28 }
  0xdb   :  { %7416 = vmatmul.mubr.msk.f32.vlgmr.msra.gmra.mxu1 %vm418_vm2, %v184_v26 }
  0xdc   :  { %7419 = vmatpush3.xpose.msk.msra.mxu1 %vm418_vm2, %v287_v29  ;;  %7420 = vmatprep.mubr.msk.f32.mxu1 %vm8133_vm1, %v8132_v16 }
  0xdd   :  { %7424 = vmatpush3.xpose.msk.msra.mxu0 %vm418_vm2, %v292_v30  ;;  %7428 = vmatprep.subr.mxu1 %v8132_v16  ;;  %v7409_v36 = vpop.f32.mrf.mxu0 }
  0xde   :  { %7433 = vmatprep.subr.mxu0 %v8132_v16  ;;  %v385_v37 = vadd.f32 %v7409_v36, %v8356_v35 }
  0xdf   :  { %7421 = vmatmul.mubr.msk.f32.vlgmr.msra.gmra.mxu1 %vm418_vm2, %v189_v33  ;;  %v379_v38 = vpop.f32.mrf.mxu0 }
  0xe0   :  { %7429 = vmatpush3.xpose.msk.msra.mxu1 %vm418_vm2, %v297_v31  ;;  %7426 = vmatmul.mubr.msk.f32.vlgmr.msra.gmra.mxu0 %vm418_vm2, %v194_v32  ;;  %v380_v39 = vadd.f32 %v8356_v35, %v379_v38 }
  0xe1   :  { %7430 = vmatprep.mubr.msk.f32.mxu1 %vm8133_vm1, %v8132_v16  ;;  %7438 = vmatprep.subr.mxu1 %v8132_v16  ;;  %v7412_v40 = vpop.f32.mrf.mxu0 }
  0xe2   :  { %7435 = vmatprep.mubr.msk.f32.mxu0 %vm8133_vm1, %v8132_v16  ;;  %v8362_v41 = vadd.f32 %v7412_v40, %v8356_v35  ;;  %7434 = vmatpush3.msra.mxu0 %v380_v39 }
  0xe3   :  { %7431 = vmatmul.mubr.msk.f32.vlgmr.msra.gmra.mxu1 %vm418_vm2, %v199_v34  ;;  %7443 = vmatprep.subr.mxu0 %v8132_v16  ;;  %v8381_v56 = vpop.f32.mrf.mxu0 }
  0xe4   :  { %7440 = vmatprep.mubr.msk.f32.mxu1 %vm8133_vm1, %v8132_v16  ;;  %7439 = vmatpush3.msra.mxu1 %v385_v37 }
  0xe5   :  { %7448 = vmatprep.subr.mxu1 %v8132_v16 }
 0x19b   :  { %v491_v55 = vpop.f32.mrf.mxu1 }
 0x19c   :  { %v492_v3 = vadd.f32 %v491_v55, %v8387_v60  ;;  %v390_v55 = vadd.f32 %v8356_v35, %v8381_v56  ;;  %v6846_v35 = vld [vmem:[%s9475_s5 + $0xa8] sm:$0xff] }
 0x19d   :  { %v7417_v59 = vpop.f32.mrf.mxu1 }
 0x19e   :  { %v723_v15 = vsel %vm418_vm2, %v492_v3, -inf  ;;  %v6847_v59 = vld [vmem:[%s9475_s5 + $0xb0] sm:$0xff] }
 0x19f   :  { %v567_v62 = vpop.f32.mrf.mxu1 }
 0x1a0   :  { %v568_v63 = vadd.f32 %v567_v62, %v8384_v57  ;;  %v643_v0 = vpop.f32.mrf.mxu0  ;;  %v6837_v62 = vld [vmem:[%s9475_s5 + $0x30] sm:$0xff] }
 0x1a1   :  { %v7422_v2 = vpop.f32.mrf.mxu1  ;;  %v644_v14 = vadd.f32 %v643_v0, %v8395_v4  ;;  %v6836_v0 = vld [vmem:[%s9475_s5 + $0x28] sm:$0xff] }
 0x1a2   :  { %v7427_v5 = vpop.f32.mrf.mxu0  ;;  %v726_v6 = vsel %vm418_vm2, %v568_v63, -inf  ;;  %v6835_v2 = vld [vmem:[%s9475_s5 + $0x20] sm:$0xff] }
 0x1a3   :  { %727 = vmax.xlane.f32.xlu0 %v726_v6  ;;  %v719_v7 = vpop.f32.mrf.mxu1  ;;  %v729_v18 = vsel %vm418_vm2, %v644_v14, -inf  ;;  %v6857_v5 = vld [vmem:[%s9475_s5 + $0x130] sm:$0xff]  ;;  %v6856_v6 = vld [vmem:[%s9475_s5 + $0x128] sm:$0xff] }
 0x1a4   :  { %v720_v11 = vadd.f32 %v719_v7, %v8391_v1  ;;  %v6855_v7 = vld [vmem:[%s9475_s5 + $0x120] sm:$0xff] }
 0x1a5   :  { %v7432_v13 = vpop.f32.mrf.mxu1 }
 0x1a6   :  { %v732_v17 = vsel %vm418_vm2, %v720_v11, -inf }
 0x1a7   :  { %724 = vmax.xlane.f32.xlu0 %v723_v15  ;;  %733 = vmax.xlane.f32.xlu1 %v732_v17 }
 0x1ab   :  { %730 = vmax.xlane.f32.xlu1 %v729_v18 }
 0x22c   :  { %v728_v19 = vpop.xlane.xlu0 %727 }
 0x22d   :  { %v736_v20 = vsub.f32 %v568_v63, %v728_v19  ;;  %v6845_v63 = vld [vmem:[%s9475_s5 + $0xa0] sm:$0xff] }
 0x22f   :  { %v741_v21 = vmul.f32 1.442695, %v736_v20 }
 0x230   :  { %v725_v22 = vpop.xlane.xlu0 %724  ;;  %v734_v23 = vpop.xlane.xlu1 %733 }
 0x231   :  { %7970 = vpow2.f32 %v741_v21  ;;  %v735_v24 = vsub.f32 %v492_v3, %v725_v22  ;;  %v738_v25 = vsub.f32 %v720_v11, %v734_v23  ;;  %v6858_v3 = vld [vmem:[%s9475_s5 + $0x138] sm:$0xff]  ;;  %v6850_v22 = vld [vmem:[%s9476_s6 + $0x5] ss:$0 sm:$0xff] }
 0x233   :  { %v739_v26 = vmul.f32 1.442695, %v735_v24  ;;  %v745_v27 = vmul.f32 1.442695, %v738_v25 }
 0x234   :  { %v731_v28 = vpop.xlane.xlu1 %730 }
 0x235   :  { %7972 = vpow2.f32 %v739_v26  ;;  %v737_v29 = vsub.f32 %v644_v14, %v731_v28 }
 0x236   :  { %7974 = vpow2.f32 %v745_v27  ;;  %v6840_v27 = vld [vmem:[%s9476_s6 + $0x1] ss:$0 sm:$0xff] }
 0x237   :  { %v743_v30 = vmul.f32 1.442695, %v737_v29 }
 0x239   :  { %7976 = vpow2.f32 %v743_v30 }
 0x23e   :  { %v7971_v31 = vpop.eup %7970 }
 0x23f   :  { %v750_v32 = vsel %vm418_vm2, %v7971_v31, 0.0 }
 0x240   :  { %751 = vadd.xlane.f32.xlu0 %v750_v32 }
 0x242   :  { %v7973_v33 = vpop.eup %7972 }
 0x243   :  { %v7975_v34 = vpop.eup %7974  ;;  %v747_v36 = vsel %vm418_vm2, %v7973_v33, 0.0 }
 0x244   :  { %748 = vadd.xlane.f32.xlu1 %v747_v36  ;;  %v756_v37 = vsel %vm418_vm2, %v7975_v34, 0.0 }
 0x245   :  { %757 = vadd.xlane.f32.xlu0 %v756_v37 }
 0x246   :  { %v7977_v38 = vpop.eup %7976 }
 0x247   :  { %v753_v39 = vsel %vm418_vm2, %v7977_v38, 0.0 }
 0x248   :  { %754 = vadd.xlane.f32.xlu1 %v753_v39 }
 0x2c9   :  { %v752_v40 = vpop.xlane.xlu0 %751 }
 0x2ca   :  { %7978 = vrcp.f32 %v752_v40  ;;  %v8533_v40 = vld [vmem:[%s9476_s6 + $0x9] ss:$0 sm:$0xff] }
 0x2cd   :  { %v749_v42 = vpop.xlane.xlu1 %748 }
 0x2ce   :  { %v758_v43 = vpop.xlane.xlu0 %757  ;;  %7980 = vrcp.f32 %v749_v42 }
 0x2cf   :  { %7982 = vrcp.f32 %v758_v43 }
 0x2d1   :  { %v755_v45 = vpop.xlane.xlu1 %754 }
 0x2d2   :  { %7984 = vrcp.f32 %v755_v45 }
 0x2d7   :  { %v7979_v46 = vpop.eup %7978 }
 0x2d8   :  { %v8407_v49 = vmul.f32 %v7979_v46, %v7971_v31 }
 0x2da   :  { %7441 = vmatmul.mubr.msk.f32.vlgmr.msra.gmra.mxu1 %vm418_vm2, %v8407_v49 }
 0x2db   :  { %v7981_v51 = vpop.eup %7980  ;;  %7449 = vmatpush3.msra.mxu1 %v8362_v41  ;;  %7450 = vmatprep.mubr.msk.f32.mxu1 %vm8133_vm1, %v8132_v16  ;;  %v6838_v41 = vld [vmem:[%s9475_s5 + $0x38] sm:$0xff] }
 0x2dc   :  { %v7983_v52 = vpop.eup %7982  ;;  %7467 = vmatprep.subr.mxu1 %v6848_v50  ;;  %v8417_v53 = vmul.f32 %v7981_v51, %v7973_v33 }
 0x2dd   :  { %v8421_v58 = vmul.f32 %v7983_v52, %v7975_v34 }
 0x2de   :  { %7436 = vmatmul.mubr.msk.f32.vlgmr.msra.gmra.mxu0 %vm418_vm2, %v8417_v53 }
 0x2df   :  { %v7985_v61 = vpop.eup %7984  ;;  %7444 = vmatpush3.msra.mxu0 %v390_v55  ;;  %7451 = vmatmul.mubr.msk.f32.vlgmr.msra.gmra.mxu1 %vm418_vm2, %v8421_v58 }
 0x2e0   :  { %7468 = vmatpush3.msra.mxu1 %v6848_v50  ;;  %7445 = vmatprep.mubr.msk.f32.mxu0 %vm8133_vm1, %v8132_v16  ;;  %v8438_v56 = vmul.f32 %v7985_v61, %v7977_v38 }
 0x2e1   :  { %7469 = vmatprep.subr.mxu1 %v6847_v59  ;;  %7453 = vmatprep.subr.mxu0 %v6838_v41 }
 0x2e2   :  { %7470 = vmatpush3.msra.mxu1 %v6847_v59  ;;  %7446 = vmatmul.mubr.msk.f32.vlgmr.msra.gmra.mxu0 %vm418_vm2, %v8438_v56 }
 0x2e3   :  { %7471 = vmatprep.subr.mxu1 %v6846_v35  ;;  %7454 = vmatpush3.msra.mxu0 %v6838_v41 }
 0x2e4   :  { %7472 = vmatpush3.msra.mxu1 %v6846_v35  ;;  %7455 = vmatprep.subr.mxu0 %v6837_v62 }
 0x2e5   :  { %7473 = vmatprep.subr.mxu1 %v6845_v63  ;;  %7456 = vmatpush3.msra.mxu0 %v6837_v62 }
 0x2e6   :  { %7474 = vmatpush3.msra.mxu1 %v6845_v63  ;;  %7475 = vmatprep.mubr.msk.f32.mxu1 %vm104_vm0, %v8268_v8 }
 0x2e7   :  { %7457 = vmatprep.subr.mxu0 %v6836_v0  ;;  %7476 = vmatmul.mubr.msk.f32.vlgmr.msra.gmra.mxu1 %vm104_vm0, %v8273_v9 }
 0x2e8   :  { %7458 = vmatpush3.msra.mxu0 %v6836_v0  ;;  %7461 = vmatprep.mubr.msk.f32.mxu0 %vm104_vm0, %v8268_v8 }
 0x2e9   :  { %7459 = vmatprep.subr.mxu0 %v6835_v2  ;;  %7478 = vmatprep.mubr.msk.f32.mxu1 %vm104_vm0, %v8280_v10 }
 0x2ea   :  { %7460 = vmatpush3.msra.mxu0 %v6835_v2  ;;  %7495 = vmatprep.subr.mxu1 %v8132_v16 }
 0x2eb   :  { %7462 = vmatmul.mubr.msk.f32.vlgmr.msra.gmra.mxu0 %vm104_vm0, %v8273_v9  ;;  %7479 = vmatmul.mubr.msk.f32.gmra.mxu1 %vm104_vm0, %v8296_v12 }
 0x2ec   :  { %7464 = vmatprep.mubr.msk.f32.mxu0 %vm104_vm0, %v8280_v10  ;;  %7497 = vmatprep.mubr.msk.f32.mxu1 %vm8133_vm1, %v8132_v16 }
 0x2ed   :  { %7481 = vmatprep.subr.mxu0 %v6858_v3 }
 0x2ee   :  { %7482 = vmatpush3.msra.mxu0 %v6858_v3 }
 0x2ef   :  { %7465 = vmatmul.mubr.msk.f32.gmra.mxu0 %vm104_vm0, %v8296_v12  ;;  %7483 = vmatprep.subr.mxu0 %v6857_v5 }
 0x2f0   :  { %7489 = vmatprep.mubr.msk.f32.mxu0 %vm104_vm0, %v8268_v8  ;;  %7484 = vmatpush3.msra.mxu0 %v6857_v5 }
 0x2f1   :  { %7485 = vmatprep.subr.mxu0 %v6856_v6 }
 0x2f2   :  { %7486 = vmatpush3.msra.mxu0 %v6856_v6 }
 0x2f3   :  { %7487 = vmatprep.subr.mxu0 %v6855_v7 }
 0x2f4   :  { %7488 = vmatpush3.msra.mxu0 %v6855_v7 }
 0x2f5   :  { %7490 = vmatmul.mubr.msk.f32.vlgmr.msra.gmra.mxu0 %vm104_vm0, %v8273_v9  ;;  %7505 = vmatprep.subr.mxu0 %v8132_v16 }
 0x2f6   :  { %7492 = vmatprep.mubr.msk.f32.mxu0 %vm104_vm0, %v8280_v10 }
 0x2f9   :  { %7493 = vmatmul.mubr.msk.f32.gmra.mxu0 %vm104_vm0, %v8296_v12 }
 0x2fa   :  { %7507 = vmatprep.mubr.msk.f32.mxu0 %vm8133_vm1, %v8132_v16 }
 0x39a   :  { %v8496_v11 = vpop.f32.mrf.mxu1 }
 0x39c   :  { %v7442_v13 = vpop.f32.mrf.mxu1 }
 0x39e   :  { %v8498_v14 = vpop.f32.mrf.mxu0 }
 0x39f   :  { %v8500_v15 = vpop.f32.mrf.mxu1 }
 0x3a0   :  { %v7437_v17 = vpop.f32.mrf.mxu0 }
 0x3a1   :  { %v7452_v18 = vpop.f32.mrf.mxu1 }
 0x3a2   :  { %v8502_v19 = vpop.f32.mrf.mxu0 }
 0x3a4   :  { %v7447_v20 = vpop.f32.mrf.mxu0 }
 0x3a7   :  { %v7477_v21 = vpop.f32.mrf.mxu1 }
 0x3a8   :  { %v1247_v32 = vadd.f32 %v7477_v21, %v6850_v22 }
 0x3a9   :  { %v1241_v23 = vpop.f32.mrf.mxu1 }
 0x3aa   :  { %v1242_v24 = vadd.f32 %v6850_v22, %v1241_v23 }
 0x3ab   :  { %v7463_v25 = vpop.f32.mrf.mxu0  ;;  %v7480_v26 = vpop.f32.mrf.mxu1 }
 0x3ac   :  { %7496 = vmatpush3.xpose.msk.msra.mxu1 %vm418_vm2, %v1242_v24  ;;  %v1149_v36 = vadd.f32 %v7463_v25, %v6840_v27  ;;  %v1257_v38 = vadd.f32 %v7480_v26, %v6850_v22 }
 0x3ad   :  { %v1143_v28 = vpop.f32.mrf.mxu0  ;;  %v1251_v29 = vpop.f32.mrf.mxu1  ;;  %7500 = vmatprep.subr.mxu1 %v8132_v16 }
 0x3ae   :  { %v1144_v30 = vadd.f32 %v6840_v27, %v1143_v28  ;;  %v1252_v31 = vadd.f32 %v6850_v22, %v1251_v29 }
 0x3af   :  { %v7466_v33 = vpop.f32.mrf.mxu0 }
 0x3b0   :  { %7498 = vmatmul.mubr.msk.f32.vlgmr.msra.gmra.mxu1 %vm418_vm2, %v1144_v30  ;;  %7506 = vmatpush3.xpose.msk.msra.mxu0 %vm418_vm2, %v1252_v31  ;;  %v1159_v39 = vadd.f32 %v7466_v33, %v6840_v27 }
 0x3b1   :  { %7501 = vmatpush3.xpose.msk.msra.mxu1 %vm418_vm2, %v1247_v32  ;;  %v1153_v34 = vpop.f32.mrf.mxu0  ;;  %7502 = vmatprep.mubr.msk.f32.mxu1 %vm8133_vm1, %v8132_v16 }
 0x3b2   :  { %v1154_v37 = vadd.f32 %v6840_v27, %v1153_v34  ;;  %7510 = vmatprep.subr.mxu1 %v8132_v16  ;;  %7515 = vmatprep.subr.mxu0 %v8132_v16 }
 0x3b4   :  { %7503 = vmatmul.mubr.msk.f32.vlgmr.msra.gmra.mxu1 %vm418_vm2, %v1149_v36  ;;  %7508 = vmatmul.mubr.msk.f32.vlgmr.msra.gmra.mxu0 %vm418_vm2, %v1154_v37 }
 0x3b5   :  { %7511 = vmatpush3.xpose.msk.msra.mxu1 %vm418_vm2, %v1257_v38  ;;  %7512 = vmatprep.mubr.msk.f32.mxu1 %vm8133_vm1, %v8132_v16  ;;  %v7491_v42 = vpop.f32.mrf.mxu0 }
 0x3b6   :  { %7520 = vmatprep.subr.mxu1 %v8132_v16  ;;  %7517 = vmatprep.mubr.msk.f32.mxu0 %vm8133_vm1, %v8132_v16  ;;  %v1345_v43 = vadd.f32 %v7491_v42, %v8533_v40 }
 0x3b7   :  { %v1339_v45 = vpop.f32.mrf.mxu0 }
 0x3b8   :  { %7513 = vmatmul.mubr.msk.f32.vlgmr.msra.gmra.mxu1 %vm418_vm2, %v1159_v39  ;;  %v1340_v46 = vadd.f32 %v8533_v40, %v1339_v45 }
 0x3b9   :  { %7522 = vmatprep.mubr.msk.f32.mxu1 %vm8133_vm1, %v8132_v16  ;;  %7521 = vmatpush3.msra.mxu1 %v1345_v43  ;;  %v7494_v50 = vpop.f32.mrf.mxu0 }
 0x3ba   :  { %7530 = vmatprep.subr.mxu1 %v8132_v16  ;;  %v8539_v51 = vadd.f32 %v7494_v50, %v8533_v40  ;;  %7516 = vmatpush3.msra.mxu0 %v1340_v46 }
 0x3bb   :  { %7525 = vmatprep.subr.mxu0 %v8132_v16  ;;  %v1349_v55 = vpop.f32.mrf.mxu0 }
 0x470   :  { %v1430_v52 = vpop.f32.mrf.mxu1 }
 0x471   :  { %v1431_v59 = vadd.f32 %v1430_v52, %v8387_v60 }
 0x472   :  { %v7499_v41 = vpop.f32.mrf.mxu1 }
 0x473   :  { %v1662_v61 = vsel %vm418_vm2, %v1431_v59, -inf  ;;  %v1350_v41 = vadd.f32 %v8533_v40, %v1349_v55  ;;  %v1063_v40 = vld [vmem:[%s9477_s7] sm:$0xff] }
 0x474   :  { %v1582_v35 = vpop.f32.mrf.mxu0  ;;  %1663 = vmax.xlane.f32.xlu0 %v1662_v61  ;;  %v1506_v62 = vpop.f32.mrf.mxu1 }
 0x475   :  { %v1583_v63 = vadd.f32 %v1582_v35, %v8395_v4  ;;  %v1507_v0 = vadd.f32 %v1506_v62, %v8384_v57 }
 0x476   :  { %v7504_v2 = vpop.f32.mrf.mxu1  ;;  %v7509_v3 = vpop.f32.mrf.mxu0 }
 0x477   :  { %v1668_v5 = vsel %vm418_vm2, %v1583_v63, -inf  ;;  %v1665_v6 = vsel %vm418_vm2, %v1507_v0, -inf  ;;  %v6896_v2 = vld [vmem:[%s9475_s5 + $0xc0] sm:$0xff] }
 0x478   :  { %1669 = vmax.xlane.f32.xlu0 %v1668_v5  ;;  %1666 = vmax.xlane.f32.xlu1 %v1665_v6  ;;  %v1658_v7 = vpop.f32.mrf.mxu1 }
 0x479   :  { %v1659_v13 = vadd.f32 %v1658_v7, %v8391_v1 }
 0x47a   :  { %v7514_v17 = vpop.f32.mrf.mxu1 }
 0x47b   :  { %v1671_v18 = vsel %vm418_vm2, %v1659_v13, -inf }
 0x47c   :  { %1672 = vmax.xlane.f32.xlu1 %v1671_v18 }
 0x4fd   :  { %v1664_v20 = vpop.xlane.xlu0 %1663 }
 0x4fe   :  { %v1674_v21 = vsub.f32 %v1431_v59, %v1664_v20  ;;  %v6887_v20 = vld [vmem:[%s9475_s5 + $0x48] sm:$0xff] }
 0x500   :  { %v1678_v22 = vmul.f32 1.442695, %v1674_v21 }
 0x501   :  { %v1670_v23 = vpop.xlane.xlu0 %1669  ;;  %v1667_v24 = vpop.xlane.xlu1 %1666 }
 0x502   :  { %7986 = vpow2.f32 %v1678_v22  ;;  %v1676_v25 = vsub.f32 %v1583_v63, %v1670_v23  ;;  %v1675_v26 = vsub.f32 %v1507_v0, %v1667_v24  ;;  %v6886_v22 = vld [vmem:[%s9475_s5 + $0x40] sm:$0xff] }
 0x504   :  { %v1682_v27 = vmul.f32 1.442695, %v1676_v25  ;;  %v1680_v28 = vmul.f32 1.442695, %v1675_v26 }
 0x505   :  { %v1673_v29 = vpop.xlane.xlu1 %1672 }
 0x506   :  { %7988 = vpow2.f32 %v1682_v27  ;;  %v1677_v30 = vsub.f32 %v1659_v13, %v1673_v29  ;;  %v6888_v13 = vld [vmem:[%s9475_s5 + $0x50] sm:$0xff]  ;;  %v6909_v27 = vld [vmem:[%s9475_s5 + $0x158] sm:$0xff]  ;;  %v6901_v29 = vld [vmem:[%s9476_s6 + $0x6] ss:$0 sm:$0xff] }
 0x507   :  { %7990 = vpow2.f32 %v1680_v28 }
 0x508   :  { %v1684_v31 = vmul.f32 1.442695, %v1677_v30 }
 0x50a   :  { %7992 = vpow2.f32 %v1684_v31 }
 0x50f   :  { %v7987_v32 = vpop.eup %7986 }
 0x510   :  { %v1686_v33 = vsel %vm418_vm2, %v7987_v32, 0.0 }
 0x511   :  { %1687 = vadd.xlane.f32.xlu0 %v1686_v33 }
 0x513   :  { %v7989_v34 = vpop.eup %7988 }
 0x514   :  { %v7991_v36 = vpop.eup %7990  ;;  %v1692_v37 = vsel %vm418_vm2, %v7989_v34, 0.0 }
 0x515   :  { %1693 = vadd.xlane.f32.xlu0 %v1692_v37  ;;  %v1689_v38 = vsel %vm418_vm2, %v7991_v36, 0.0 }
 0x516   :  { %1690 = vadd.xlane.f32.xlu1 %v1689_v38 }
 0x517   :  { %v7993_v39 = vpop.eup %7992 }
 0x518   :  { %v1695_v42 = vsel %vm418_vm2, %v7993_v39, 0.0 }
 0x51a   :  { %1696 = vadd.xlane.f32.xlu1 %v1695_v42 }
 0x59a   :  { %v1688_v43 = vpop.xlane.xlu0 %1687 }
 0x59b   :  { %7994 = vrcp.f32 %v1688_v43 }
 0x59e   :  { %v1694_v45 = vpop.xlane.xlu0 %1693 }
 0x59f   :  { %7996 = vrcp.f32 %v1694_v45  ;;  %v1691_v46 = vpop.xlane.xlu1 %1690 }
 0x5a0   :  { %7998 = vrcp.f32 %v1691_v46 }
 0x5a3   :  { %v1697_v50 = vpop.xlane.xlu1 %1696 }
 0x5a4   :  { %8000 = vrcp.f32 %v1697_v50 }
 0x5a8   :  { %v7995_v52 = vpop.eup %7994 }
 0x5a9   :  { %v8554_v59 = vmul.f32 %v7995_v52, %v7987_v32  ;;  %v6907_v32 = vld [vmem:[%s9475_s5 + $0x148] sm:$0xff] }
 0x5ab   :  { %7518 = vmatmul.mubr.msk.f32.vlgmr.msra.gmra.mxu0 %vm418_vm2, %v8554_v59 }
 0x5ac   :  { %v7997_v61 = vpop.eup %7996  ;;  %7526 = vmatpush3.msra.mxu0 %v1350_v41  ;;  %7527 = vmatprep.mubr.msk.f32.mxu0 %vm8133_vm1, %v8132_v16 }
 0x5ad   :  { %v7999_v35 = vpop.eup %7998  ;;  %v8561_v62 = vmul.f32 %v7997_v61, %v7989_v34 }
 0x5ae   :  { %v8563_v63 = vmul.f32 %v7999_v35, %v7991_v36  ;;  %v6906_v36 = vld [vmem:[%s9475_s5 + $0x140] sm:$0xff] }
 0x5af   :  { %7528 = vmatmul.mubr.msk.f32.vlgmr.msra.gmra.mxu0 %vm418_vm2, %v8561_v62 }
 0x5b0   :  { %7523 = vmatmul.mubr.msk.f32.vlgmr.msra.gmra.mxu1 %vm418_vm2, %v8563_v63 }
 0x5b1   :  { %v8001_v55 = vpop.eup %8000  ;;  %7531 = vmatpush3.msra.mxu1 %v8539_v51  ;;  %7532 = vmatprep.mubr.msk.f32.mxu1 %vm8133_vm1, %v8132_v16  ;;  %v6899_v51 = vld [vmem:[%s9475_s5 + $0xd8] sm:$0xff] }
 0x5b2   :  { %v8575_v0 = vmul.f32 %v8001_v55, %v7993_v39  ;;  %7543 = vmatprep.subr.mxu1 %v1063_v40 }
 0x5b4   :  { %7533 = vmatmul.mubr.msk.f32.vlgmr.msra.gmra.mxu1 %vm418_vm2, %v8575_v0 }
 0x5b5   :  { %7545 = vmatprep.mubr.msk.f32.mxu1 %vm418_vm2, %v8498_v14  ;;  %7544 = vmatpush3.msra.mxu1 %v1063_v40  ;;  %v6898_v14 = vld [vmem:[%s9475_s5 + $0xd0] sm:$0xff] }
 0x5b6   :  { %7565 = vmatprep.subr.mxu1 %v6899_v51 }
 0x5b8   :  { %7546 = vmatmul.mubr.msk.f32.vlgmr.msra.gmra.mxu1 %vm418_vm2, %v8496_v11  ;;  %v6877_v11 = vld [vmem:[%s9477_s7 + $0x8] sm:$0xff] }
 0x5b9   :  { %7548 = vmatprep.mubr.msk.f32.mxu1 %vm418_vm2, %v8502_v19  ;;  %7566 = vmatpush3.msra.mxu1 %v6899_v51  ;;  %v6889_v19 = vld [vmem:[%s9475_s5 + $0x58] sm:$0xff]  ;;  %v8705_v51 = vld [vmem:[%s9476_s6 + $0xa] ss:$0 sm:$0xff] }
 0x5ba   :  { %7567 = vmatprep.subr.mxu1 %v6898_v14  ;;  %7535 = vmatprep.subr.mxu0 %v6877_v11 }
 0x5bb   :  { %7568 = vmatpush3.msra.mxu1 %v6898_v14  ;;  %7536 = vmatpush3.msra.mxu0 %v6877_v11 }
 0x5bc   :  { %7549 = vmatmul.mubr.msk.f32.gmra.mxu1 %vm418_vm2, %v8500_v15  ;;  %v6897_v15 = vld [vmem:[%s9475_s5 + $0xc8] sm:$0xff]  ;;  %7551 = vmatprep.subr.mxu0 %v6889_v19 }
 0x5bd   :  { %7573 = vmatprep.mubr.msk.f32.mxu1 %vm104_vm0, %v8268_v8  ;;  %7569 = vmatprep.subr.mxu1 %v6897_v15 }
 0x5be   :  { %7570 = vmatpush3.msra.mxu1 %v6897_v15 }
 0x5bf   :  { %7571 = vmatprep.subr.mxu1 %v6896_v2 }
 0x5c0   :  { %7572 = vmatpush3.msra.mxu1 %v6896_v2 }
 0x5c1   :  { %7574 = vmatmul.mubr.msk.f32.vlgmr.msra.gmra.mxu1 %vm104_vm0, %v8273_v9  ;;  %7593 = vmatprep.subr.mxu1 %v8132_v16 }
 0x5c2   :  { %7576 = vmatprep.mubr.msk.f32.mxu1 %vm104_vm0, %v8280_v10 }
 0x5c5   :  { %7577 = vmatmul.mubr.msk.f32.gmra.mxu1 %vm104_vm0, %v8296_v12 }
 0x5c6   :  { %7595 = vmatprep.mubr.msk.f32.mxu1 %vm8133_vm1, %v8132_v16 }
 0x66b   :  { %v1779_v3 = vpop.f32.mrf.mxu0 }
 0x66c   :  { %7537 = vmatprep.mubr.msk.f32.mxu0 %vm418_vm2, %v1779_v3 }
 0x66d   :  { %v7519_v5 = vpop.f32.mrf.mxu0 }
 0x66f   :  { %v1925_v6 = vpop.f32.mrf.mxu0 }
 0x670   :  { %v1852_v7 = vpop.f32.mrf.mxu1 }
 0x671   :  { %7538 = vmatmul.mubr.msk.f32.vlgmr.msra.gmra.mxu0 %vm418_vm2, %v1852_v7  ;;  %v7529_v17 = vpop.f32.mrf.mxu0 }
 0x672   :  { %v7524_v18 = vpop.f32.mrf.mxu1  ;;  %7540 = vmatprep.mubr.msk.f32.mxu0 %vm418_vm2, %v1925_v6  ;;  %7552 = vmatpush3.msra.mxu0 %v6889_v19 }
 0x673   :  { %7553 = vmatprep.subr.mxu0 %v6888_v13 }
 0x674   :  { %v1998_v21 = vpop.f32.mrf.mxu1  ;;  %7554 = vmatpush3.msra.mxu0 %v6888_v13 }
 0x675   :  { %7541 = vmatmul.mubr.msk.f32.gmra.mxu0 %vm418_vm2, %v1998_v21  ;;  %7555 = vmatprep.subr.mxu0 %v6887_v20 }
 0x676   :  { %v7534_v23 = vpop.f32.mrf.mxu1  ;;  %7556 = vmatpush3.msra.mxu0 %v6887_v20  ;;  %7559 = vmatprep.mubr.msk.f32.mxu0 %vm104_vm0, %v8268_v8 }
 0x677   :  { %7557 = vmatprep.subr.mxu0 %v6886_v22 }
 0x678   :  { %7558 = vmatpush3.msra.mxu0 %v6886_v22  ;;  %v8639_v24 = vpop.f32.mrf.mxu1 }
 0x679   :  { %7560 = vmatmul.mubr.msk.f32.vlgmr.msra.gmra.mxu0 %vm104_vm0, %v8273_v9  ;;  %7579 = vmatprep.subr.mxu0 %v6909_v27 }
 0x67a   :  { %7562 = vmatprep.mubr.msk.f32.mxu0 %vm104_vm0, %v8280_v10  ;;  %v8641_v25 = vpop.f32.mrf.mxu1  ;;  %7580 = vmatpush3.msra.mxu0 %v6909_v27 }
 0x67c   :  { %v8643_v26 = vpop.f32.mrf.mxu1 }
 0x67d   :  { %7563 = vmatmul.mubr.msk.f32.gmra.mxu0 %vm104_vm0, %v8296_v12 }
 0x67e   :  { %7587 = vmatprep.mubr.msk.f32.mxu0 %vm104_vm0, %v8268_v8  ;;  %v8648_v28 = vpop.f32.mrf.mxu1  ;;  %v6908_v8 = vld [vmem:[%s9475_s5 + $0x150] sm:$0xff] }
 0x67f   :  { %7581 = vmatprep.subr.mxu0 %v6908_v8 }
 0x680   :  { %7582 = vmatpush3.msra.mxu0 %v6908_v8 }
 0x681   :  { %v7575_v30 = vpop.f32.mrf.mxu1  ;;  %7583 = vmatprep.subr.mxu0 %v6907_v32 }
 0x682   :  { %v2381_v31 = vadd.f32 %v7575_v30, %v6901_v29  ;;  %7584 = vmatpush3.msra.mxu0 %v6907_v32 }
 0x683   :  { %v2375_v33 = vpop.f32.mrf.mxu1  ;;  %7585 = vmatprep.subr.mxu0 %v6906_v36 }
 0x684   :  { %v2376_v34 = vadd.f32 %v6901_v29, %v2375_v33  ;;  %7586 = vmatpush3.msra.mxu0 %v6906_v36 }
 0x685   :  { %v7578_v37 = vpop.f32.mrf.mxu1  ;;  %7588 = vmatmul.mubr.msk.f32.vlgmr.msra.gmra.mxu0 %vm104_vm0, %v8273_v9  ;;  %7603 = vmatprep.subr.mxu0 %v8132_v16 }
 0x686   :  { %7594 = vmatpush3.xpose.msk.msra.mxu1 %vm418_vm2, %v2376_v34  ;;  %v2391_v38 = vadd.f32 %v7578_v37, %v6901_v29  ;;  %7590 = vmatprep.mubr.msk.f32.mxu0 %vm104_vm0, %v8280_v10 }
 0x687   :  { %7598 = vmatprep.subr.mxu1 %v8132_v16  ;;  %v2385_v39 = vpop.f32.mrf.mxu1 }
 0x688   :  { %v2386_v42 = vadd.f32 %v6901_v29, %v2385_v39 }
 0x689   :  { %7591 = vmatmul.mubr.msk.f32.gmra.mxu0 %vm104_vm0, %v8296_v12  ;;  %v6891_v12 = vld [vmem:[%s9476_s6 + $0x2] ss:$0 sm:$0xff] }
 0x68a   :  { %7604 = vmatpush3.xpose.msk.msra.mxu0 %vm418_vm2, %v2386_v42  ;;  %7605 = vmatprep.mubr.msk.f32.mxu0 %vm8133_vm1, %v8132_v16 }
 0x68b   :  { %7613 = vmatprep.subr.mxu0 %v8132_v16 }
 0x731   :  { %v8675_v9 = vpop.f32.mrf.mxu0 }
 0x733   :  { %v8677_v43 = vpop.f32.mrf.mxu0 }
 0x735   :  { %v8679_v45 = vpop.f32.mrf.mxu0 }
 0x737   :  { %v8681_v10 = vpop.f32.mrf.mxu0 }
 0x739   :  { %v7561_v46 = vpop.f32.mrf.mxu0 }
 0x73a   :  { %v2283_v35 = vadd.f32 %v7561_v46, %v6891_v12 }
 0x73b   :  { %v2277_v50 = vpop.f32.mrf.mxu0 }
 0x73c   :  { %v2278_v52 = vadd.f32 %v6891_v12, %v2277_v50 }
 0x73d   :  { %v7564_v41 = vpop.f32.mrf.mxu0 }
 0x73e   :  { %7596 = vmatmul.mubr.msk.f32.vlgmr.msra.gmra.mxu1 %vm418_vm2, %v2278_v52  ;;  %v2293_v55 = vadd.f32 %v7564_v41, %v6891_v12 }
 0x73f   :  { %7599 = vmatpush3.xpose.msk.msra.mxu1 %vm418_vm2, %v2381_v31  ;;  %v2287_v61 = vpop.f32.mrf.mxu0  ;;  %7600 = vmatprep.mubr.msk.f32.mxu1 %vm8133_vm1, %v8132_v16 }
 0x740   :  { %v2288_v40 = vadd.f32 %v6891_v12, %v2287_v61  ;;  %7608 = vmatprep.subr.mxu1 %v8132_v16 }
 0x742   :  { %7601 = vmatmul.mubr.msk.f32.vlgmr.msra.gmra.mxu1 %vm418_vm2, %v2283_v35  ;;  %7606 = vmatmul.mubr.msk.f32.vlgmr.msra.gmra.mxu0 %vm418_vm2, %v2288_v40 }
 0x743   :  { %7609 = vmatpush3.xpose.msk.msra.mxu1 %vm418_vm2, %v2391_v38  ;;  %7610 = vmatprep.mubr.msk.f32.mxu1 %vm8133_vm1, %v8132_v16 }
 0x744   :  { %7618 = vmatprep.subr.mxu1 %v8132_v16  ;;  %7615 = vmatprep.mubr.msk.f32.mxu0 %vm8133_vm1, %v8132_v16 }
 0x745   :  { %v7589_v14 = vpop.f32.mrf.mxu0 }
 0x746   :  { %7611 = vmatmul.mubr.msk.f32.vlgmr.msra.gmra.mxu1 %vm418_vm2, %v2293_v55  ;;  %v2479_v11 = vadd.f32 %v7589_v14, %v8705_v51 }
 0x747   :  { %7620 = vmatprep.mubr.msk.f32.mxu1 %vm8133_vm1, %v8132_v16  ;;  %v2473_v15 = vpop.f32.mrf.mxu0 }
 0x748   :  { %v2474_v19 = vadd.f32 %v8705_v51, %v2473_v15  ;;  %7619 = vmatpush3.msra.mxu1 %v2479_v11 }
 0x749   :  { %v7592_v2 = vpop.f32.mrf.mxu0  ;;  %7628 = vmatprep.subr.mxu1 %v8132_v16 }
 0x74a   :  { %v8711_v3 = vadd.f32 %v7592_v2, %v8705_v51  ;;  %7614 = vmatpush3.msra.mxu0 %v2474_v19 }
 0x74b   :  { %7623 = vmatprep.subr.mxu0 %v8132_v16  ;;  %v2483_v6 = vpop.f32.mrf.mxu0 }
 0x7fe   :  { %v2564_v5 = vpop.f32.mrf.mxu1 }
 0x7ff   :  { %v2565_v7 = vadd.f32 %v2564_v5, %v8387_v60 }
 0x800   :  { %v7597_v13 = vpop.f32.mrf.mxu1 }
 0x801   :  { %v2796_v17 = vsel %vm418_vm2, %v2565_v7, -inf }
 0x802   :  { %v2716_v18 = vpop.f32.mrf.mxu0  ;;  %2797 = vmax.xlane.f32.xlu0 %v2796_v17  ;;  %v2640_v20 = vpop.f32.mrf.mxu1 }
 0x803   :  { %v2717_v21 = vadd.f32 %v2716_v18, %v8395_v4  ;;  %v2641_v22 = vadd.f32 %v2640_v20, %v8384_v57  ;;  %v1706_v20 = vadd.f32 %v8554_v59, %v8417_v53  ;;  %v1707_v53 = vadd.f32 %v8563_v63, %v8407_v49  ;;  %v8064_v63 = vld [vmem:[%s9495_s21] sm:$0xff] }
 0x804   :  { %v7602_v23 = vpop.f32.mrf.mxu1  ;;  %v7607_v27 = vpop.f32.mrf.mxu0 }
 0x805   :  { %v2802_v29 = vsel %vm418_vm2, %v2717_v21, -inf  ;;  %v2799_v8 = vsel %vm418_vm2, %v2641_v22, -inf }
 0x806   :  { %2803 = vmax.xlane.f32.xlu0 %v2802_v29  ;;  %2800 = vmax.xlane.f32.xlu1 %v2799_v8  ;;  %v2792_v30 = vpop.f32.mrf.mxu1  ;;  %v1708_v8 = vadd.f32 %v8561_v62, %v8438_v56  ;;  %v1709_v56 = vadd.f32 %v8575_v0, %v8421_v58  ;;  %v6946_v58 = vld [vmem:[%s9475_s5 + $0xf8] sm:$0xff] }
 0x807   :  { %v2793_v31 = vadd.f32 %v2792_v30, %v8391_v1  ;;  %v6936_v0 = vld [vmem:[%s9475_s5 + $0x78] sm:$0xff] }
 0x808   :  { %v7612_v32 = vpop.f32.mrf.mxu1 }
 0x809   :  { %v2805_v33 = vsel %vm418_vm2, %v2793_v31, -inf  ;;  %v6935_v32 = vld [vmem:[%s9475_s5 + $0x70] sm:$0xff] }
 0x80a   :  { %2806 = vmax.xlane.f32.xlu1 %v2805_v33  ;;  %v6934_v33 = vld [vmem:[%s9475_s5 + $0x68] sm:$0xff] }
 0x88b   :  { %v2798_v34 = vpop.xlane.xlu0 %2797 }
 0x88c   :  { %v2808_v36 = vsub.f32 %v2565_v7, %v2798_v34  ;;  %v6933_v34 = vld [vmem:[%s9475_s5 + $0x60] sm:$0xff] }
 0x88e   :  { %v2812_v37 = vmul.f32 1.442695, %v2808_v36  ;;  %v8065_v36 = vld [vmem:[%s9495_s21 + $0x8] sm:$0xff] }
 0x88f   :  { %v2804_v38 = vpop.xlane.xlu0 %2803  ;;  %v2801_v39 = vpop.xlane.xlu1 %2800 }
 0x890   :  { %8002 = vpow2.f32 %v2812_v37  ;;  %v2810_v42 = vsub.f32 %v2717_v21, %v2804_v38  ;;  %v2809_v46 = vsub.f32 %v2641_v22, %v2801_v39  ;;  %v2484_v22 = vadd.f32 %v8705_v51, %v2483_v6  ;;  %v8066_v37 = vld [vmem:[%s9495_s21 + $0x10] sm:$0xff]  ;;  %v8067_v38 = vld [vmem:[%s9495_s21 + $0x18] sm:$0xff] }
 0x892   :  { %v2816_v12 = vmul.f32 1.442695, %v2810_v42  ;;  %v2814_v50 = vmul.f32 1.442695, %v2809_v46 }
 0x893   :  { %v2807_v52 = vpop.xlane.xlu1 %2806 }
 0x894   :  { %8004 = vpow2.f32 %v2816_v12  ;;  %v2811_v41 = vsub.f32 %v2793_v31, %v2807_v52 }
 0x895   :  { %8006 = vpow2.f32 %v2814_v50  ;;  %v6945_v50 = vld [vmem:[%s9475_s5 + $0xf0] sm:$0xff] }
 0x896   :  { %v2818_v61 = vmul.f32 1.442695, %v2811_v41 }
 0x898   :  { %8008 = vpow2.f32 %v2818_v61  ;;  %v6944_v61 = vld [vmem:[%s9475_s5 + $0xe8] sm:$0xff] }
 0x89d   :  { %v8003_v35 = vpop.eup %8002 }
 0x89e   :  { %v2820_v40 = vsel %vm418_vm2, %v8003_v35, 0.0 }
 0x89f   :  { %2821 = vadd.xlane.f32.xlu0 %v2820_v40  ;;  %v6943_v40 = vld [vmem:[%s9475_s5 + $0xe0] sm:$0xff] }
 0x8a1   :  { %v8005_v55 = vpop.eup %8004 }
 0x8a2   :  { %v8007_v14 = vpop.eup %8006  ;;  %v2826_v11 = vsel %vm418_vm2, %v8005_v55, 0.0 }
 0x8a3   :  { %2827 = vadd.xlane.f32.xlu0 %v2826_v11  ;;  %v2823_v15 = vsel %vm418_vm2, %v8007_v14, 0.0  ;;  %v6955_v11 = vld [vmem:[%s9475_s5 + $0x170] sm:$0xff] }
 0x8a4   :  { %2824 = vadd.xlane.f32.xlu1 %v2823_v15  ;;  %v6954_v15 = vld [vmem:[%s9475_s5 + $0x168] sm:$0xff] }
 0x8a5   :  { %v8009_v19 = vpop.eup %8008 }
 0x8a6   :  { %v2829_v2 = vsel %vm418_vm2, %v8009_v19, 0.0 }
 0x8a8   :  { %2830 = vadd.xlane.f32.xlu1 %v2829_v2  ;;  %v2185_v2 = vadd.f32 %v8639_v24, %v8675_v9 }
 0x928   :  { %v2822_v5 = vpop.xlane.xlu0 %2821 }
 0x929   :  { %8010 = vrcp.f32 %v2822_v5 }
 0x92c   :  { %v2828_v7 = vpop.xlane.xlu0 %2827 }
 0x92d   :  { %8012 = vrcp.f32 %v2828_v7  ;;  %v2825_v13 = vpop.xlane.xlu1 %2824  ;;  %v2180_v7 = vadd.f32 %v8641_v25, %v8677_v43  ;;  %v6948_v43 = vld [vmem:[%s9476_s6 + $0x7] ss:$0 sm:$0xff] }
 0x92e   :  { %8014 = vrcp.f32 %v2825_v13 }
 0x931   :  { %v2831_v17 = vpop.xlane.xlu1 %2830 }
 0x932   :  { %8016 = vrcp.f32 %v2831_v17 }
 0x936   :  { %v8011_v18 = vpop.eup %8010 }
 0x937   :  { %v2833_v21 = vmul.f32 %v8011_v18, %v8003_v35  ;;  %v2195_v18 = vadd.f32 %v8643_v26, %v8679_v45  ;;  %v6938_v45 = vld [vmem:[%s9476_s6 + $0x3] ss:$0 sm:$0xff] }
 0x939   :  { %v8729_v23 = vadd.f32 %v2833_v21, %v1706_v20  ;;  %7616 = vmatmul.mubr.msk.f32.vlgmr.msra.gmra.mxu0 %vm418_vm2, %v2833_v21 }
 0x93a   :  { %v8013_v27 = vpop.eup %8012  ;;  %7624 = vmatpush3.msra.mxu0 %v2484_v22  ;;  %7625 = vmatprep.mubr.msk.f32.mxu0 %vm8133_vm1, %v8132_v16 }
 0x93b   :  { %v8015_v29 = vpop.eup %8014  ;;  %v2837_v30 = vmul.f32 %v8013_v27, %v8005_v55  ;;  %v2190_v27 = vadd.f32 %v8648_v28, %v8681_v10 }
 0x93c   :  { %v2835_v59 = vmul.f32 %v8015_v29, %v8007_v14  ;;  %v6956_v14 = vld [vmem:[%s9475_s5 + $0x178] sm:$0xff] }
 0x93d   :  { %v8738_v31 = vadd.f32 %v2837_v30, %v1708_v8  ;;  %7626 = vmatmul.mubr.msk.f32.vlgmr.msra.gmra.mxu0 %vm418_vm2, %v2837_v30 }
 0x93e   :  { %v8741_v51 = vadd.f32 %v2835_v59, %v1707_v53  ;;  %7621 = vmatmul.mubr.msk.f32.vlgmr.msra.gmra.mxu1 %vm418_vm2, %v2835_v59 }
 0x93f   :  { %v8017_v6 = vpop.eup %8016  ;;  %7629 = vmatpush3.msra.mxu1 %v8711_v3  ;;  %7630 = vmatprep.mubr.msk.f32.mxu1 %vm8133_vm1, %v8132_v16  ;;  %v6928_v3 = vld [vmem:[%s9477_s7 + $0x10] sm:$0xff] }
 0x940   :  { %v2839_v62 = vmul.f32 %v8017_v6, %v8009_v19  ;;  %7633 = vmatprep.subr.mxu0 %v6928_v3  ;;  %7641 = vmatprep.subr.mxu1 %v6936_v0  ;;  %v6953_v19 = vld [vmem:[%s9475_s5 + $0x160] sm:$0xff] }
 0x941   :  { %7634 = vmatpush3.msra.mxu0 %v6928_v3 }
 0x942   :  { %v8749_v49 = vadd.f32 %v2839_v62, %v1709_v56  ;;  %7631 = vmatmul.mubr.msk.f32.vlgmr.msra.gmra.mxu1 %vm418_vm2, %v2839_v62  ;;  %7655 = vmatprep.subr.mxu0 %v6946_v58 }
 0x943   :  { %7649 = vmatprep.mubr.msk.f32.mxu1 %vm104_vm0, %v8064_v63  ;;  %7642 = vmatpush3.msra.mxu1 %v6936_v0 }
 0x944   :  { %7643 = vmatprep.subr.mxu1 %v6935_v32 }
 0x945   :  { %7644 = vmatpush3.msra.mxu1 %v6935_v32  ;;  %v8870_v32 = vld [vmem:[%s9476_s6 + $0xb] ss:$0 sm:$0xff]  ;;  %s8138_s6 = smov [#allocation2]  }
 0x946   :  { %7645 = vmatprep.subr.mxu1 %v6934_v33  ;;  %s6758_s30 = sshll.u32 %s8138_s6, 4  ;;  %s6759_s30 = int_to_ptr.vmem [resolvable:$true] %s6758_s30 }
 0x947   :  { %7646 = vmatpush3.msra.mxu1 %v6934_v33 }
 0x948   :  { %7647 = vmatprep.subr.mxu1 %v6933_v34 }
 0x949   :  { %7648 = vmatpush3.msra.mxu1 %v6933_v34 }
 0x94a   :  { %7650 = vmatmul.mubr.msk.f32.vlgmr.msra.gmra.mxu1 %vm104_vm0, %v8065_v36  ;;  %7669 = vmatprep.subr.mxu1 %v6956_v14 }
 0x94b   :  { %7652 = vmatprep.mubr.msk.f32.mxu1 %vm104_vm0, %v8066_v37  ;;  %7670 = vmatpush3.msra.mxu1 %v6956_v14 }
 0x94c   :  { %7671 = vmatprep.subr.mxu1 %v6955_v11 }
 0x94d   :  { %7672 = vmatpush3.msra.mxu1 %v6955_v11 }
 0x94e   :  { %7653 = vmatmul.mubr.msk.f32.gmra.mxu1 %vm104_vm0, %v8067_v38  ;;  %7673 = vmatprep.subr.mxu1 %v6954_v15 }
 0x94f   :  { %7677 = vmatprep.mubr.msk.f32.mxu1 %vm104_vm0, %v8064_v63  ;;  %7674 = vmatpush3.msra.mxu1 %v6954_v15 }
 0x950   :  { %7675 = vmatprep.subr.mxu1 %v6953_v19 }
 0x951   :  { %7676 = vmatpush3.msra.mxu1 %v6953_v19 }
 0x952   :  { %7678 = vmatmul.mubr.msk.f32.vlgmr.msra.gmra.mxu1 %vm104_vm0, %v8065_v36  ;;  %7693 = vmatprep.subr.mxu1 %v8132_v16 }
 0x953   :  { %7680 = vmatprep.mubr.msk.f32.mxu1 %vm104_vm0, %v8066_v37 }
 0x956   :  { %7681 = vmatmul.mubr.msk.f32.gmra.mxu1 %vm104_vm0, %v8067_v38 }
 0x957   :  { %7695 = vmatprep.mubr.msk.f32.mxu1 %vm8133_vm1, %v8132_v16 }
 0x9f9   :  { %v2913_v39 = vpop.f32.mrf.mxu0 }
 0x9fa   :  { %7635 = vmatprep.mubr.msk.f32.mxu0 %vm418_vm2, %v2913_v39 }
 0x9fb   :  { %v7617_v42 = vpop.f32.mrf.mxu0 }
 0x9fd   :  { %v3059_v46 = vpop.f32.mrf.mxu0 }
 0x9fe   :  { %v2986_v12 = vpop.f32.mrf.mxu1 }
 0x9ff   :  { %7636 = vmatmul.mubr.msk.f32.vlgmr.msra.gmra.mxu0 %vm418_vm2, %v2986_v12  ;;  %v7627_v52 = vpop.f32.mrf.mxu0 }
 0xa00   :  { %v7622_v41 = vpop.f32.mrf.mxu1  ;;  %7638 = vmatprep.mubr.msk.f32.mxu0 %vm418_vm2, %v3059_v46  ;;  %7656 = vmatpush3.msra.mxu0 %v6946_v58 }
 0xa01   :  { %7657 = vmatprep.subr.mxu0 %v6945_v50 }
 0xa02   :  { %v3132_v35 = vpop.f32.mrf.mxu1  ;;  %7658 = vmatpush3.msra.mxu0 %v6945_v50 }
 0xa03   :  { %7639 = vmatmul.mubr.msk.f32.gmra.mxu0 %vm418_vm2, %v3132_v35  ;;  %7659 = vmatprep.subr.mxu0 %v6944_v61 }
 0xa04   :  { %v7632_v55 = vpop.f32.mrf.mxu1  ;;  %7660 = vmatpush3.msra.mxu0 %v6944_v61  ;;  %7663 = vmatprep.mubr.msk.f32.mxu0 %vm104_vm0, %v8064_v63 }
 0xa05   :  { %7661 = vmatprep.subr.mxu0 %v6943_v40 }
 0xa06   :  { %7662 = vmatpush3.msra.mxu0 %v6943_v40 }
 0xa07   :  { %7664 = vmatmul.mubr.msk.f32.vlgmr.msra.gmra.mxu0 %vm104_vm0, %v8065_v36  ;;  %7683 = vmatprep.subr.mxu0 %v8132_v16 }
 0xa08   :  { %7666 = vmatprep.mubr.msk.f32.mxu0 %vm104_vm0, %v8066_v37 }
 0xa0a   :  { %v7651_v22 = vpop.f32.mrf.mxu1 }
 0xa0b   :  { %7667 = vmatmul.mubr.msk.f32.gmra.mxu0 %vm104_vm0, %v8067_v38  ;;  %v3324_v58 = vadd.f32 %v7651_v22, %v6938_v45 }
 0xa0c   :  { %7685 = vmatprep.mubr.msk.f32.mxu0 %vm8133_vm1, %v8132_v16  ;;  %v3318_v25 = vpop.f32.mrf.mxu1 }
 0xa0d   :  { %v3319_v28 = vadd.f32 %v6938_v45, %v3318_v25 }
 0xa0e   :  { %v7654_v26 = vpop.f32.mrf.mxu1 }
 0xa0f   :  { %v3334_v0 = vadd.f32 %v7654_v26, %v6938_v45 }
 0xa10   :  { %v3328_v6 = vpop.f32.mrf.mxu1 }
 0xa11   :  { %v3329_v3 = vadd.f32 %v6938_v45, %v3328_v6  ;;  %v4303_v6 = vand.u32 127, %v72_v44 }
 0xa12   :  { %v7679_v33 = vpop.f32.mrf.mxu1 }
 0xa13   :  { %v3520_v34 = vadd.f32 %v7679_v33, %v8870_v32  ;;  %vm4304_vm4 = vcmp.eq.s32.totalorder %v8369_v47, %v4303_v6 }
 0xa14   :  { %v3514_v36 = vpop.f32.mrf.mxu1 }
 0xa15   :  { %v3515_v37 = vadd.f32 %v8870_v32, %v3514_v36 }
 0xa16   :  { %v7682_v38 = vpop.f32.mrf.mxu1 }
 0xa17   :  { %v8876_v39 = vadd.f32 %v7682_v38, %v8870_v32 }
 0xa18   :  { %v8879_v46 = vpop.f32.mrf.mxu1 }
 0xabf   :  { %v7637_v5 = vpop.f32.mrf.mxu0 }
 0xac0   :  { %v8829_v13 = vadd.f32 %v7637_v5, %v2185_v2 }
 0xac1   :  { %v3216_v17 = vpop.f32.mrf.mxu0 }
 0xac2   :  { %v8833_v20 = vadd.f32 %v3216_v17, %v2180_v7 }
 0xac3   :  { %v7640_v21 = vpop.f32.mrf.mxu0 }
 0xac4   :  { %v8837_v29 = vadd.f32 %v7640_v21, %v2195_v18 }
 0xac5   :  { %v3226_v24 = vpop.f32.mrf.mxu0 }
 0xac6   :  { %v8839_v9 = vadd.f32 %v3226_v24, %v2190_v27 }
 0xac7   :  { %v7665_v8 = vpop.f32.mrf.mxu0 }
 0xac8   :  { %v3422_v56 = vadd.f32 %v7665_v8, %v6948_v43 }
 0xac9   :  { %v3416_v30 = vpop.f32.mrf.mxu0 }
 0xaca   :  { %v3417_v53 = vadd.f32 %v6948_v43, %v3416_v30 }
 0xacb   :  { %v7668_v59 = vpop.f32.mrf.mxu0 }
 0xacc   :  { %7684 = vmatpush3.xpose.msk.msra.mxu0 %vm418_vm2, %v3417_v53  ;;  %v3432_v63 = vadd.f32 %v7668_v59, %v6948_v43 }
 0xacd   :  { %v3426_v10 = vpop.f32.mrf.mxu0  ;;  %7688 = vmatprep.subr.mxu0 %v8132_v16 }
 0xace   :  { %v3427_v62 = vadd.f32 %v6948_v43, %v3426_v10 }
 0xacf   :  { %7686 = vmatmul.mubr.msk.f32.vlgmr.msra.gmra.mxu0 %vm418_vm2, %v3319_v28 }
 0xad0   :  { %7689 = vmatpush3.xpose.msk.msra.mxu0 %vm418_vm2, %v3422_v56  ;;  %7690 = vmatprep.mubr.msk.f32.mxu0 %vm8133_vm1, %v8132_v16  ;;  %v4299_v56 = vld [vmem:[%s9497_s20] sm:$0x3f] }
 0xad1   :  { %7694 = vmatpush3.xpose.msk.msra.mxu1 %vm418_vm2, %v3427_v62  ;;  %7698 = vmatprep.subr.mxu0 %v8132_v16  ;;  %v4305_v62 = vsel %vm4304_vm4, 1.0, %v8132_v16 }
 0xad2   :  { %7703 = vmatprep.subr.mxu1 %v8132_v16 }
 0xad3   :  { %7691 = vmatmul.mubr.msk.f32.vlgmr.msra.gmra.mxu0 %vm418_vm2, %v3324_v58 }
 0xad4   :  { %7699 = vmatpush3.xpose.msk.msra.mxu0 %vm418_vm2, %v3432_v63  ;;  %7696 = vmatmul.mubr.msk.f32.vlgmr.msra.gmra.mxu1 %vm418_vm2, %v3329_v3  ;;  %v8899_v63 = vadd.f32 %v4305_v62, %v4299_v56 }
 0xad5   :  { %7700 = vmatprep.mubr.msk.f32.mxu0 %vm8133_vm1, %v8132_v16  ;;  %7708 = vmatprep.subr.mxu0 %v8132_v16 }
 0xad6   :  { %7705 = vmatprep.mubr.msk.f32.mxu1 %vm8133_vm1, %v8132_v16  ;;  %7704 = vmatpush3.msra.mxu1 %v3515_v37  ;;  %v4308_v3 = vsel %vm4307_vm5, %v8899_v63, 0.0 }
 0xad7   :  { %7701 = vmatmul.mubr.msk.f32.vlgmr.msra.gmra.mxu0 %vm418_vm2, %v3334_v0  ;;  %7713 = vmatprep.subr.mxu1 %v8132_v16 }
 0xad8   :  { %7710 = vmatprep.mubr.msk.f32.mxu0 %vm8133_vm1, %v8132_v16  ;;  %7709 = vmatpush3.msra.mxu0 %v3520_v34 }
 0xad9   :  { %7718 = vmatprep.subr.mxu0 %v8132_v16 }
 0xb8f   :  { %v3605_v42 = vpop.f32.mrf.mxu0 }
 0xb90   :  { %v3606_v35 = vadd.f32 %v3605_v42, %v8387_v60 }
 0xb91   :  { %v7687_v12 = vpop.f32.mrf.mxu0 }
 0xb92   :  { %v3837_v2 = vsel %vm418_vm2, %v3606_v35, -inf }
 0xb93   :  { %v3681_v50 = vpop.f32.mrf.mxu0 }
 0xb94   :  { %v3682_v52 = vadd.f32 %v3681_v50, %v8384_v57  ;;  %v3757_v41 = vpop.f32.mrf.mxu1 }
 0xb95   :  { %v7692_v61 = vpop.f32.mrf.mxu0  ;;  %v3758_v19 = vadd.f32 %v3757_v41, %v8395_v4 }
 0xb96   :  { %v7697_v40 = vpop.f32.mrf.mxu1  ;;  %v3840_v55 = vsel %vm418_vm2, %v3682_v52, -inf }
 0xb97   :  { %3841 = vmax.xlane.f32.xlu0 %v3840_v55  ;;  %v3833_v14 = vpop.f32.mrf.mxu0  ;;  %v3843_v57 = vsel %vm418_vm2, %v3758_v19, -inf }
 0xb98   :  { %v3834_v11 = vadd.f32 %v3833_v14, %v8391_v1  ;;  %v4315_v14 = vld [vmem:[%s9479_s9] sm:$0xff] }
 0xb99   :  { %v7702_v15 = vpop.f32.mrf.mxu0 }
 0xb9a   :  { %v3846_v5 = vsel %vm418_vm2, %v3834_v11, -inf }
 0xb9b   :  { %3838 = vmax.xlane.f32.xlu0 %v3837_v2  ;;  %3847 = vmax.xlane.f32.xlu1 %v3846_v5 }
 0xb9f   :  { %3844 = vmax.xlane.f32.xlu1 %v3843_v57 }
 0xc20   :  { %v3842_v60 = vpop.xlane.xlu0 %3841 }
 0xc21   :  { %v3850_v7 = vsub.f32 %v3682_v52, %v3842_v60  ;;  %v3525_v52 = vadd.f32 %v8870_v32, %v8879_v46  ;;  %v4317_v32 = vld [vmem:[%s9479_s9 + $0x10] sm:$0xff] }
 0xc23   :  { %v3855_v17 = vmul.f32 1.442695, %v3850_v7 }
 0xc24   :  { %v3839_v18 = vpop.xlane.xlu0 %3838  ;;  %v3848_v21 = vpop.xlane.xlu1 %3847 }
 0xc25   :  { %8018 = vpow2.f32 %v3855_v17  ;;  %v3849_v22 = vsub.f32 %v3606_v35, %v3839_v18  ;;  %v3852_v1 = vsub.f32 %v3834_v11, %v3848_v21  ;;  %v4314_v11 = vld [vmem:[%s9498_s28] sm:$0x3f] }
 0xc27   :  { %v3853_v27 = vmul.f32 1.442695, %v3849_v22  ;;  %v3859_v24 = vmul.f32 1.442695, %v3852_v1 }
 0xc28   :  { %v3845_v4 = vpop.xlane.xlu1 %3844 }
 0xc29   :  { %8020 = vpow2.f32 %v3853_v27  ;;  %v3851_v8 = vsub.f32 %v3758_v19, %v3845_v4 }
 0xc2a   :  { %8022 = vpow2.f32 %v3859_v24 }
 0xc2b   :  { %v3857_v25 = vmul.f32 1.442695, %v3851_v8  ;;  %v4486_v8 = vld [vmem:[%s9481_s11 + $0x18] sm:$0xff] }
 0xc2d   :  { %8024 = vpow2.f32 %v3857_v25  ;;  %v6990_v25 = vld [vmem:[%s9481_s11 + $0x98] sm:$0xff] }
 0xc32   :  { %v8019_v43 = vpop.eup %8018 }
 0xc33   :  { %v3864_v30 = vsel %vm418_vm2, %v8019_v43, 0.0 }
 0xc34   :  { %3865 = vadd.xlane.f32.xlu0 %v3864_v30  ;;  %v6989_v30 = vld [vmem:[%s9481_s11 + $0x90] sm:$0xff] }
 0xc36   :  { %v8021_v26 = vpop.eup %8020 }
 0xc37   :  { %v8023_v45 = vpop.eup %8022  ;;  %v3861_v53 = vsel %vm418_vm2, %v8021_v26, 0.0 }
 0xc38   :  { %3862 = vadd.xlane.f32.xlu0 %v3861_v53  ;;  %v3870_v59 = vsel %vm418_vm2, %v8023_v45, 0.0  ;;  %v4483_v53 = vld [vmem:[%s9481_s11] sm:$0xff] }
 0xc39   :  { %3871 = vadd.xlane.f32.xlu1 %v3870_v59  ;;  %v6987_v59 = vld [vmem:[%s9481_s11 + $0x80] sm:$0xff] }
 0xc3a   :  { %v8025_v28 = vpop.eup %8024 }
 0xc3b   :  { %v3867_v10 = vsel %vm418_vm2, %v8025_v28, 0.0 }
 0xc3c   :  { %4309 = vadd.xlane.f32.xlu0 %v4308_v3 }
 0xc3d   :  { %3868 = vadd.xlane.f32.xlu1 %v3867_v10 }
 0xcbd   :  { %v3866_v58 = vpop.xlane.xlu0 %3865 }
 0xcbe   :  { %8026 = vrcp.f32 %v3866_v58 }
 0xcc1   :  { %v3863_v0 = vpop.xlane.xlu0 %3862 }
 0xcc2   :  { %8028 = vrcp.f32 %v3863_v0  ;;  %v3872_v33 = vpop.xlane.xlu1 %3871 }
 0xcc3   :  { %8030 = vrcp.f32 %v3872_v33  ;;  %v6984_v33 = vld [vmem:[%s9480_s10] ss:$0 sm:$0xff]  ;;  %s6780_s10 = sshll.u32 %s8137_s0, 4  ;;  %s9434_s10 = int_to_ptr.vmem [resolvable:$true] %s6780_s10 }
 0xcc5   :  { %v4310_v19 = vpop.xlane.xlu0 %4309 }
 0xcc6   :  { %v3869_v44 = vpop.xlane.xlu1 %3868  ;;  %vm4311_vm6 = vcmp.gt.f32.partialorder %v4310_v19, 0.0 }
 0xcc7   :  { %8032 = vrcp.f32 %v3869_v44 }
 0xcc8   :  { %8034 = vrsqrt.f32 %v4310_v19 }
 0xccb   :  { %v8027_v34 = vpop.eup %8026 }
 0xccc   :  { %v3876_v36 = vmul.f32 %v8027_v34, %v8019_v43  ;;  %v4485_v43 = vld [vmem:[%s9481_s11 + $0x10] sm:$0xff] }
 0xcce   :  { %v3882_v37 = vadd.f32 %v3876_v36, %v8741_v51  ;;  %7711 = vmatmul.mubr.msk.f32.vlgmr.msra.gmra.mxu0 %vm418_vm2, %v3876_v36  ;;  %v4318_v51 = vld [vmem:[%s9479_s9 + $0x18] sm:$0xff]  ;;  %v6994_v36 = vld [vmem:[%s9481_s11 + $0x100] sm:$0xff] }
 0xccf   :  { %v8029_v38 = vpop.eup %8028  ;;  %7719 = vmatpush3.msra.mxu0 %v8876_v39  ;;  %7720 = vmatprep.mubr.msk.f32.mxu0 %vm8133_vm1, %v8132_v16 }
 0xcd0   :  { %v8031_v42 = vpop.eup %8030  ;;  %v4281_v12 = vmul.f32 0.25, %v3882_v37  ;;  %7731 = vmatprep.subr.mxu0 %v8132_v16  ;;  %v3874_v50 = vmul.f32 %v8029_v38, %v8021_v26  ;;  %v4484_v26 = vld [vmem:[%s9481_s11 + $0x8] sm:$0xff]  ;;  %v7008_v37 = vld [vmem:[%s9481_s11 + $0x38] sm:$0xff]  ;;  %v7007_v38 = vld [vmem:[%s9481_s11 + $0x30] sm:$0xff] }
 0xcd1   :  { %v3880_v41 = vmul.f32 %v8031_v42, %v8023_v45  ;;  %v6988_v45 = vld [vmem:[%s9481_s11 + $0x88] sm:$0xff] }
 0xcd2   :  { %4285 = vst.msk [vmem:[#allocation6 + $0x8] sm:$0xff] %vm418_vm2, %v4281_v12  ;;  %v3881_v39 = vadd.f32 %v3874_v50, %v8729_v23  ;;  %7706 = vmatmul.mubr.msk.f32.vlgmr.msra.gmra.mxu1 %vm418_vm2, %v3874_v50  ;;  %v7006_v42 = vld [vmem:[%s9481_s11 + $0x28] sm:$0xff]  ;;  %v7005_v12 = vld [vmem:[%s9481_s11 + $0x20] sm:$0xff]  ;;  %v7022_v50 = vld [vmem:[%s9481_s11 + $0x138] sm:$0xff] }
 0xcd3   :  { %7714 = vmatpush3.msra.mxu1 %v3525_v52  ;;  %v3884_v61 = vadd.f32 %v3880_v41, %v8749_v49  ;;  %7721 = vmatmul.mubr.msk.f32.vlgmr.msra.gmra.mxu0 %vm418_vm2, %v3880_v41  ;;  %v4316_v49 = vld [vmem:[%s9479_s9 + $0x8] sm:$0xff]  ;;  %v7021_v52 = vld [vmem:[%s9481_s11 + $0x130] sm:$0xff] }
 0xcd4   :  { %v8033_v46 = vpop.eup %8032  ;;  %v4280_v35 = vmul.f32 0.25, %v3881_v39  ;;  %7732 = vmatpush3.msra.mxu0 %v4318_v51  ;;  %7715 = vmatprep.mubr.msk.f32.mxu1 %vm8133_vm1, %v8132_v16  ;;  %v7020_v41 = vld [vmem:[%s9481_s11 + $0x128] sm:$0xff]  ;;  %v7019_v51 = vld [vmem:[%s9481_s11 + $0x120] sm:$0xff] }
 0xcd5   :  { %v4283_v40 = vmul.f32 0.25, %v3884_v61  ;;  %7733 = vmatprep.subr.mxu0 %v8132_v16  ;;  %v3878_v23 = vmul.f32 %v8033_v46, %v8025_v28  ;;  %7739 = vmatprep.mubr.msk.f32.mxu0 %vm8133_vm1, %v8132_v16  ;;  %v8035_v21 = vpop.eup %8034  ;;  %v6992_v39 = vld [vmem:[%s9482_s12 + $0x4] ss:$0 sm:$0xff]  ;;  %v6985_v46 = vld [vmem:[%s9482_s12] ss:$0 sm:$0xff] }
 0xcd6   :  { %4284 = vst.msk [vmem:[#allocation6] sm:$0xff] %vm418_vm2, %v4280_v35  ;;  %7734 = vmatpush3.msra.mxu0 %v4317_v32  ;;  %v4313_v1 = vsel %vm4311_vm6, %v8035_v21, 0.0 }
 0xcd7   :  { %4287 = vst.msk [vmem:[#allocation6 + $0x18] sm:$0xff] %vm418_vm2, %v4283_v40  ;;  %7735 = vmatprep.subr.mxu0 %v8132_v16  ;;  %v3883_v55 = vadd.f32 %v3878_v23, %v8738_v31  ;;  %7716 = vmatmul.mubr.msk.f32.vlgmr.msra.gmra.mxu1 %vm418_vm2, %v3878_v23  ;;  %v6975_v31 = vld [vmem:[%s9477_s7 + $0x18] sm:$0xff] }
 0xcd8   :  { %7736 = vmatpush3.msra.mxu0 %v4316_v49  ;;  %7723 = vmatprep.subr.mxu1 %v6975_v31 }
 0xcd9   :  { %v4282_v15 = vmul.f32 0.25, %v3883_v55  ;;  %7737 = vmatprep.subr.mxu0 %v8132_v16  ;;  %7724 = vmatpush3.msra.mxu1 %v6975_v31  ;;  %v6999_v55 = vld [vmem:[%s9482_s12 + $0x8] ss:$0 sm:$0xff] }
 0xcda   :  { %7738 = vmatpush3.msra.mxu0 %v4315_v14  ;;  %7742 = vmatprep.subr.mxu1 %v8132_v16 }
 0xcdb   :  { %4286 = vst.msk [vmem:[#allocation6 + $0x10] sm:$0xff] %vm418_vm2, %v4282_v15  ;;  %7740 = vmatmul.mubr.msk.f32.vlgmr.msra.gmra.mxu0 %vm104_vm0, %v4314_v11  ;;  %7747 = vmatprep.subr.mxu0 %v8132_v16 }
 0xcdc   :  { %7755 = vmatprep.mubr.msk.f32.mxu0 %vm8133_vm1, %v8132_v16  ;;  %7748 = vmatpush3.msra.mxu0 %v4486_v8 }
 0xcdd   :  { %7749 = vmatprep.subr.mxu0 %v8132_v16 }
 0xcde   :  { %7750 = vmatpush3.msra.mxu0 %v4485_v43 }
 0xcdf   :  { %7751 = vmatprep.subr.mxu0 %v8132_v16 }
 0xce0   :  { %7752 = vmatpush3.msra.mxu0 %v4484_v26  ;;  %v7015_v26 = vld [vmem:[%s9481_s11 + $0xb8] sm:$0xff] }
 0xce1   :  { %7753 = vmatprep.subr.mxu0 %v8132_v16 }
 0xce2   :  { %7754 = vmatpush3.msra.mxu0 %v4483_v53  ;;  %v7013_v53 = vld [vmem:[%s9481_s11 + $0xa8] sm:$0xff] }
 0xce3   :  { %7769 = vmatprep.subr.mxu0 %v8132_v16 }
 0xd8e   :  { %v4027_v2 = vpop.f32.mrf.mxu0 }
 0xd90   :  { %v7712_v5 = vpop.f32.mrf.mxu0 }
 0xd92   :  { %v3954_v57 = vpop.f32.mrf.mxu1 }
 0xd93   :  { %v4173_v60 = vpop.f32.mrf.mxu0  ;;  %7725 = vmatprep.mubr.msk.f32.mxu1 %vm418_vm2, %v3954_v57  ;;  %v4480_v57 = vld [vmem:[%s9474_s4] sm:$0xf] }
 0xd94   :  { %v7707_v7 = vpop.f32.mrf.mxu1  ;;  %7726 = vmatmul.mubr.msk.f32.vlgmr.msra.gmra.mxu1 %vm418_vm2, %v4027_v2  ;;  %vm4481_vm10 = vcmp.gt.f32.partialorder %v4480_v57, 0.5  ;;  %v7050_v57 = vld [vmem:[%s9481_s11 + $0x158] sm:$0xff] }
 0xd95   :  { %v7722_v17 = vpop.f32.mrf.mxu0 }
 0xd97   :  { %v4100_v18 = vpop.f32.mrf.mxu1 }
 0xd98   :  { %7728 = vmatprep.mubr.msk.f32.mxu1 %vm418_vm2, %v4100_v18 }
 0xd99   :  { %v7717_v22 = vpop.f32.mrf.mxu1  ;;  %7729 = vmatmul.mubr.msk.f32.gmra.mxu1 %vm418_vm2, %v4173_v60  ;;  %v8135_v60 = vmov -inf  }
 0xd9a   :  { %7744 = vmatprep.mubr.msk.f32.mxu1 %vm8133_vm1, %v8132_v16  ;;  %v9099_v7 = vsel %vm4481_vm10, 0.0, %v8135_v60  ;;  %v7049_v60 = vld [vmem:[%s9481_s11 + $0x150] sm:$0xff] }
 0xd9b   :  { %v4388_v27 = vpop.f32.mrf.mxu0 }
 0xd9c   :  { %v4392_v24 = vmul.f32 %v4388_v27, %v4313_v1 }
 0xd9d   :  { %v7741_v4 = vpop.f32.mrf.mxu0 }
 0xd9e   :  { %7743 = vmatpush3.msk.msra.mxu1 %vm4397_vm7, %v4392_v24 }
 0xd9f   :  { %7745 = vmatmul.mubr.msk.f32.vlgmr.msra.gmra.mxu1 %vm4393_vm8, %v8899_v63  ;;  %7758 = vmatprep.subr.mxu1 %v8132_v16 }
 0xda0   :  { %7766 = vmatprep.mubr.msk.f32.mxu1 %vm8133_vm1, %v8132_v16  ;;  %7759 = vmatpush3.msra.mxu1 %v6990_v25 }
 0xda1   :  { %7760 = vmatprep.subr.mxu1 %v8132_v16 }
 0xda2   :  { %7761 = vmatpush3.msra.mxu1 %v6989_v30 }
 0xda3   :  { %7762 = vmatprep.subr.mxu1 %v8132_v16 }
 0xda4   :  { %7763 = vmatpush3.msra.mxu1 %v6988_v45  ;;  %v7014_v45 = vld [vmem:[%s9481_s11 + $0xb0] sm:$0xff] }
 0xda5   :  { %7764 = vmatprep.subr.mxu1 %v8132_v16 }
 0xda6   :  { %7765 = vmatpush3.msra.mxu1 %v6987_v59  ;;  %v7012_v59 = vld [vmem:[%s9481_s11 + $0xa0] sm:$0xff] }
 0xda7   :  { %7780 = vmatprep.subr.mxu1 %v8132_v16 }
 0xe54   :  { %v7727_v28 = vpop.f32.mrf.mxu1 }
 0xe55   :  { %v8995_v10 = vadd.f32 %v7727_v28, %v8829_v13 }
 0xe56   :  { %v4257_v6 = vpop.f32.mrf.mxu1 }
 0xe57   :  { %v8998_v56 = vadd.f32 %v4257_v6, %v8833_v20  ;;  %v6997_v20 = vld [vmem:[%s9481_s11 + $0x118] sm:$0xff] }
 0xe59   :  { %v7730_v62 = vpop.f32.mrf.mxu1 }
 0xe5a   :  { %v9001_v63 = vadd.f32 %v7730_v62, %v8837_v29  ;;  %v6996_v29 = vld [vmem:[%s9481_s11 + $0x110] sm:$0xff]  ;;  %v7017_v62 = vld [vmem:[%s9482_s12 + $0x5] ss:$0 sm:$0xff] }
 0xe5b   :  { %v4267_v3 = vpop.f32.mrf.mxu1 }
 0xe5c   :  { %v9004_v58 = vadd.f32 %v4267_v3, %v8839_v9  ;;  %v6995_v9 = vld [vmem:[%s9481_s11 + $0x108] sm:$0xff] }
 0xe5f   :  { %v4467_v0 = vpop.f32.mrf.mxu1 }
 0xe60   :  { %v4471_v44 = vmul.f32 %v4467_v0, %v4313_v1  ;;  %v7010_v0 = vld [vmem:[%s9482_s12 + $0x1] ss:$0 sm:$0xff] }
 0xe61   :  { %v7746_v13 = vpop.f32.mrf.mxu1 }
 0xe62   :  { %v9009_v34 = vadd.f32 %v6984_v33, %v4471_v44  ;;  %v7024_v44 = vld [vmem:[%s9482_s12 + $0x9] ss:$0 sm:$0xff] }
 0xe64   :  { %7756 = vmatmul.mubr.msk.f32.vlgmr.msra.gmra.mxu0 %vm104_vm0, %v9009_v34  ;;  %7767 = vmatmul.mubr.msk.f32.vlgmr.msra.gmra.mxu1 %vm104_vm0, %v9009_v34  ;;  %6443 = vst.msk [vmem:[#allocation4] sm:$0x3f] %vm6442_vm9, %v9009_v34 }
 0xe65   :  { %7770 = vmatpush3.msra.mxu0 %v6997_v20  ;;  %7777 = vmatprep.mubr.msk.f32.mxu0 %vm8133_vm1, %v8132_v16 }
 0xe66   :  { %7771 = vmatprep.subr.mxu0 %v8132_v16  ;;  %7782 = vmatprep.mubr.msk.f32.mxu1 %vm8133_vm1, %v8132_v16 }
 0xe67   :  { %7772 = vmatpush3.msra.mxu0 %v6996_v29 }
 0xe68   :  { %7773 = vmatprep.subr.mxu0 %v8132_v16 }
 0xe69   :  { %7774 = vmatpush3.msra.mxu0 %v6995_v9 }
 0xe6a   :  { %7775 = vmatprep.subr.mxu0 %v8132_v16 }
 0xe6b   :  { %7776 = vmatpush3.msra.mxu0 %v6994_v36 }
 0xe6c   :  { %7778 = vmatmul.mubr.msk.f32.vlgmr.msra.gmra.mxu0 %vm104_vm0, %v9009_v34  ;;  %7790 = vmatprep.subr.mxu0 %v8132_v16 }
 0xe6d   :  { %7791 = vmatpush3.msra.mxu0 %v7008_v37  ;;  %7798 = vmatprep.mubr.msk.f32.mxu0 %vm8133_vm1, %v8132_v16 }
 0xe6e   :  { %7792 = vmatprep.subr.mxu0 %v8132_v16 }
 0xe6f   :  { %7793 = vmatpush3.msra.mxu0 %v7007_v38 }
 0xe70   :  { %7794 = vmatprep.subr.mxu0 %v8132_v16 }
 0xe71   :  { %7795 = vmatpush3.msra.mxu0 %v7006_v42 }
 0xe72   :  { %7796 = vmatprep.subr.mxu0 %v8132_v16 }
 0xe73   :  { %7797 = vmatpush3.msra.mxu0 %v7005_v12 }
 0xe74   :  { %7799 = vmatmul.mubr.msk.f32.vlgmr.msra.gmra.mxu0 %vm104_vm0, %v9009_v34  ;;  %7812 = vmatprep.subr.mxu0 %v8132_v16 }
 0xe75   :  { %7813 = vmatpush3.msra.mxu0 %v7022_v50  ;;  %7820 = vmatprep.mubr.msk.f32.mxu0 %vm8133_vm1, %v8132_v16 }
 0xe76   :  { %7814 = vmatprep.subr.mxu0 %v8132_v16 }
 0xe77   :  { %7815 = vmatpush3.msra.mxu0 %v7021_v52 }
 0xe78   :  { %7816 = vmatprep.subr.mxu0 %v8132_v16 }
 0xe79   :  { %7817 = vmatpush3.msra.mxu0 %v7020_v41 }
 0xe7a   :  { %7818 = vmatprep.subr.mxu0 %v8132_v16 }
 0xe7b   :  { %7819 = vmatpush3.msra.mxu0 %v7019_v51  ;;  %v7030_v51 = vld [vmem:[%s9483_s13 + $0x8] sm:$0xff] }
 0xe7c   :  { %7821 = vmatmul.mubr.msk.f32.vlgmr.msra.gmra.mxu0 %vm104_vm0, %v9009_v34  ;;  %7833 = vmatprep.subr.mxu0 %v8132_v16 }
 0xe7d   :  { %7835 = vmatprep.mubr.msk.f32.mxu0 %vm8133_vm1, %v8132_v16  ;;  %7834 = vmatpush3.msra.mxu0 %v7030_v51  ;;  %v7075_v51 = vld [vmem:[%s9481_s11 + $0x168] sm:$0xff] }
 0xe7e   :  { %7843 = vmatprep.subr.mxu0 %v8132_v16 }
 0xf24   :  { %v4563_v61 = vpop.f32.mrf.mxu0  ;;  %v4646_v32 = vpop.f32.mrf.mxu1 }
 0xf25   :  { %v4647_v35 = vadd.f32 %v6992_v39, %v4646_v32  ;;  %v4564_v49 = vadd.f32 %v6985_v46, %v4563_v61  ;;  %v4897_v46 = vld [vmem:[%s9483_s13] sm:$0xff] }
 0xf26   :  { %v7757_v40 = vpop.f32.mrf.mxu0  ;;  %v7768_v23 = vpop.f32.mrf.mxu1 }
 0xf27   :  { %7781 = vmatpush3.xpose.msk.msra.mxu1 %vm418_vm2, %v4647_v35  ;;  %v7043_v35 = vld [vmem:[%s9481_s11 + $0xd8] sm:$0xff]  ;;  %v7042_v40 = vld [vmem:[%s9481_s11 + $0xd0] sm:$0xff]  ;;  %v7041_v23 = vld [vmem:[%s9481_s11 + $0xc8] sm:$0xff] }
 0xf28   :  { %7785 = vmatprep.subr.mxu1 %v8132_v16 }
 0xf2a   :  { %7783 = vmatmul.mubr.msk.f32.vlgmr.msra.gmra.mxu1 %vm418_vm2, %v4564_v49  ;;  %v7040_v49 = vld [vmem:[%s9481_s11 + $0xc0] sm:$0xff] }
 0xf2b   :  { %7787 = vmatprep.mubr.msk.f32.mxu1 %vm8133_vm1, %v8132_v16 }
 0xf2c   :  { %v4729_v14 = vpop.f32.mrf.mxu0 }
 0xf2d   :  { %v4730_v11 = vadd.f32 %v6999_v55, %v4729_v14  ;;  %v7036_v55 = vld [vmem:[%s9481_s11 + $0x58] sm:$0xff] }
 0xf2e   :  { %v7779_v15 = vpop.f32.mrf.mxu0 }
 0xf2f   :  { %7786 = vmatpush3.msk.msra.mxu1 %vm4397_vm7, %v4730_v11  ;;  %v7035_v11 = vld [vmem:[%s9481_s11 + $0x50] sm:$0xff] }
 0xf30   :  { %7801 = vmatprep.subr.mxu1 %v8132_v16 }
 0xf34   :  { %v4977_v31 = vpop.f32.mrf.mxu0 }
 0xf35   :  { %v4978_v20 = vadd.f32 %v7010_v0, %v4977_v31  ;;  %v7034_v31 = vld [vmem:[%s9481_s11 + $0x48] sm:$0xff] }
 0xf36   :  { %v7800_v19 = vpop.f32.mrf.mxu0 }
 0xf3c   :  { %v5143_v2 = vpop.f32.mrf.mxu0 }
 0xf3d   :  { %v5144_v29 = vadd.f32 %v7024_v44, %v5143_v2  ;;  %v7033_v2 = vld [vmem:[%s9481_s11 + $0x40] sm:$0xff] }
 0xf3e   :  { %v7822_v5 = vpop.f32.mrf.mxu0 }
 0xfea   :  { %v4805_v17 = vpop.f32.mrf.mxu1 }
 0xfeb   :  { %v4806_v18 = vadd.f32 %v4805_v17, %v9099_v7  ;;  %v7045_v17 = vld [vmem:[%s9482_s12 + $0x6] ss:$0 sm:$0xff] }
 0xfec   :  { %v7784_v21 = vpop.f32.mrf.mxu1 }
 0xfed   :  { %v4810_v22 = vsel %vm4809_vm11, %v4806_v18, -inf }
 0xfee   :  { %4811 = vmax.xlane.f32.xlu1 %v4810_v22 }
0x1077   :  { %v4812_v1 = vpop.xlane.xlu1 %4811 }
0x1078   :  { %v4813_v27 = vsub.f32 %v4806_v18, %v4812_v1  ;;  %v7048_v18 = vld [vmem:[%s9481_s11 + $0x148] sm:$0xff]  ;;  %v7047_v1 = vld [vmem:[%s9481_s11 + $0x140] sm:$0xff] }
0x107a   :  { %v4814_v24 = vmul.f32 1.442695, %v4813_v27 }
0x107c   :  { %8036 = vpow2.f32 %v4814_v24 }
0x1089   :  { %v8037_v4 = vpop.eup %8036 }
0x108a   :  { %v4816_v8 = vsel %vm4809_vm11, %v8037_v4, 0.0 }
0x108b   :  { %4817 = vadd.xlane.f32.xlu0 %v4816_v8  ;;  %v7038_v8 = vld [vmem:[%s9482_s12 + $0x2] ss:$0 sm:$0xff] }
0x1114   :  { %v4818_v25 = vpop.xlane.xlu0 %4817 }
0x1115   :  { %8038 = vrcp.f32 %v4818_v25 }
0x1122   :  { %v8039_v43 = vpop.eup %8038 }
0x1123   :  { %v4820_v30 = vmul.f32 %v8039_v43, %v8037_v4 }
0x1125   :  { %7788 = vmatmul.mubr.msk.f32.vlgmr.msra.gmra.mxu1 %vm4393_vm8, %v4820_v30 }
0x1126   :  { %7802 = vmatpush3.msra.mxu1 %v7015_v26  ;;  %7809 = vmatprep.mubr.msk.f32.mxu1 %vm8133_vm1, %v8132_v16  ;;  %v7052_v26 = vld [vmem:[%s9482_s12 + $0xa] ss:$0 sm:$0xff] }
0x1127   :  { %7803 = vmatprep.subr.mxu1 %v8132_v16 }
0x1128   :  { %7804 = vmatpush3.msra.mxu1 %v7014_v45 }
0x1129   :  { %7805 = vmatprep.subr.mxu1 %v8132_v16 }
0x112a   :  { %7806 = vmatpush3.msra.mxu1 %v7013_v53 }
0x112b   :  { %7807 = vmatprep.subr.mxu1 %v8132_v16 }
0x112c   :  { %7808 = vmatpush3.msra.mxu1 %v7012_v59 }
0x112d   :  { %7810 = vmatmul.mubr.msk.f32.vlgmr.msra.gmra.mxu1 %vm104_vm0, %v9009_v34  ;;  %7823 = vmatprep.subr.mxu1 %v8132_v16 }
0x112e   :  { %7825 = vmatprep.mubr.msk.f32.mxu1 %vm8133_vm1, %v8132_v16 }
0x11e5   :  { %v4893_v28 = vpop.f32.mrf.mxu1 }
0x11e7   :  { %v7789_v6 = vpop.f32.mrf.mxu1 }
0x11ed   :  { %v5060_v3 = vpop.f32.mrf.mxu1 }
0x11ee   :  { %v5061_v33 = vadd.f32 %v7017_v62, %v5060_v3 }
0x11ef   :  { %v7811_v13 = vpop.f32.mrf.mxu1 }
0x11f0   :  { %7824 = vmatpush3.xpose.msk.msra.mxu1 %vm418_vm2, %v5061_v33 }
0x11f1   :  { %7828 = vmatprep.subr.mxu1 %v8132_v16 }
0x11f3   :  { %7826 = vmatmul.mubr.msk.f32.vlgmr.msra.gmra.mxu1 %vm418_vm2, %v4978_v20 }
0x11f4   :  { %7829 = vmatpush3.msk.msra.mxu1 %vm4397_vm7, %v5144_v29  ;;  %7830 = vmatprep.mubr.msk.f32.mxu1 %vm8133_vm1, %v8132_v16  ;;  %v7058_v29 = vld [vmem:[%s9483_s13 + $0x10] sm:$0xff] }
0x11f5   :  { %7838 = vmatprep.subr.mxu1 %v8132_v16 }
0x12b3   :  { %v5219_v9 = vpop.f32.mrf.mxu1 }
0x12b4   :  { %v5220_v36 = vadd.f32 %v5219_v9, %v9099_v7 }
0x12b5   :  { %v7827_v37 = vpop.f32.mrf.mxu1 }
0x12b6   :  { %v5223_v38 = vsel %vm4809_vm11, %v5220_v36, -inf }
0x12b7   :  { %5224 = vmax.xlane.f32.xlu1 %v5223_v38  ;;  %v7063_v38 = vld [vmem:[%s9481_s11 + $0x78] sm:$0xff] }
0x1340   :  { %v5225_v42 = vpop.xlane.xlu1 %5224 }
0x1341   :  { %v5226_v12 = vsub.f32 %v5220_v36, %v5225_v42  ;;  %v7062_v42 = vld [vmem:[%s9481_s11 + $0x70] sm:$0xff] }
0x1343   :  { %v5227_v50 = vmul.f32 1.442695, %v5226_v12  ;;  %v7061_v12 = vld [vmem:[%s9481_s11 + $0x68] sm:$0xff] }
0x1345   :  { %8040 = vpow2.f32 %v5227_v50  ;;  %v7060_v50 = vld [vmem:[%s9481_s11 + $0x60] sm:$0xff] }
0x1352   :  { %v8041_v52 = vpop.eup %8040 }
0x1353   :  { %v5229_v41 = vsel %vm4809_vm11, %v8041_v52, 0.0 }
0x1354   :  { %5230 = vadd.xlane.f32.xlu0 %v5229_v41  ;;  %v7076_v41 = vld [vmem:[%s9481_s11 + $0x170] sm:$0xff] }
0x13dd   :  { %v5231_v39 = vpop.xlane.xlu0 %5230 }
0x13de   :  { %8042 = vrcp.f32 %v5231_v39  ;;  %v7074_v39 = vld [vmem:[%s9481_s11 + $0x160] sm:$0xff] }
0x13eb   :  { %v8043_v61 = vpop.eup %8042 }
0x13ec   :  { %v5233_v32 = vmul.f32 %v8043_v61, %v8041_v52  ;;  %v7077_v52 = vld [vmem:[%s9481_s11 + $0x178] sm:$0xff] }
0x13ed   :  { %v7070_v61 = vld [vmem:[%s9481_s11 + $0xf8] sm:$0xff] }
0x13ee   :  { %7831 = vmatmul.mubr.msk.f32.vlgmr.msra.gmra.mxu1 %vm4393_vm8, %v5233_v32 }
0x13ef   :  { %7839 = vmatpush3.msra.mxu1 %v4897_v46  ;;  %7840 = vmatprep.mubr.msk.f32.mxu1 %vm8133_vm1, %v8132_v16  ;;  %v7069_v46 = vld [vmem:[%s9481_s11 + $0xf0] sm:$0xff] }
0x13f0   :  { %7854 = vmatprep.subr.mxu1 %v8132_v16 }
0x13f2   :  { %7841 = vmatmul.mubr.msk.f32.vlgmr.msra.gmra.mxu1 %vm418_vm2, %v4893_v28 }
0x13f3   :  { %7855 = vmatpush3.msra.mxu1 %v7043_v35  ;;  %7862 = vmatprep.mubr.msk.f32.mxu1 %vm8133_vm1, %v8132_v16 }
0x13f4   :  { %7856 = vmatprep.subr.mxu1 %v8132_v16 }
0x13f5   :  { %7857 = vmatpush3.msra.mxu1 %v7042_v40  ;;  %v7068_v40 = vld [vmem:[%s9481_s11 + $0xe8] sm:$0xff] }
0x13f6   :  { %7858 = vmatprep.subr.mxu1 %v8132_v16 }
0x13f7   :  { %7859 = vmatpush3.msra.mxu1 %v7041_v23  ;;  %v7067_v23 = vld [vmem:[%s9481_s11 + $0xe0] sm:$0xff] }
0x13f8   :  { %7860 = vmatprep.subr.mxu1 %v8132_v16 }
0x13f9   :  { %7861 = vmatpush3.msra.mxu1 %v7040_v49 }
0x13fa   :  { %7863 = vmatmul.mubr.msk.f32.vlgmr.msra.gmra.mxu1 %vm104_vm0, %v9009_v34  ;;  %7876 = vmatprep.subr.mxu1 %v8132_v16 }
0x13fb   :  { %7878 = vmatprep.mubr.msk.f32.mxu1 %vm8133_vm1, %v8132_v16 }
0x14ae   :  { %v5306_v14 = vpop.f32.mrf.mxu1 }
0x14af   :  { %7836 = vmatmul.mubr.msk.f32.vlgmr.msra.gmra.mxu0 %vm418_vm2, %v5306_v14 }
0x14b0   :  { %7844 = vmatpush3.msra.mxu0 %v7036_v55  ;;  %v7832_v15 = vpop.f32.mrf.mxu1  ;;  %7851 = vmatprep.mubr.msk.f32.mxu0 %vm8133_vm1, %v8132_v16 }
0x14b1   :  { %7845 = vmatprep.subr.mxu0 %v8132_v16 }
0x14b2   :  { %7846 = vmatpush3.msra.mxu0 %v7035_v11  ;;  %v9193_v19 = vpop.f32.mrf.mxu1 }
0x14b3   :  { %7847 = vmatprep.subr.mxu0 %v8132_v16 }
0x14b4   :  { %7848 = vmatpush3.msra.mxu0 %v7034_v31  ;;  %v7842_v5 = vpop.f32.mrf.mxu1 }
0x14b5   :  { %7849 = vmatprep.subr.mxu0 %v8132_v16 }
0x14b6   :  { %7850 = vmatpush3.msra.mxu0 %v7033_v2 }
0x14b7   :  { %7852 = vmatmul.mubr.msk.f32.vlgmr.msra.gmra.mxu0 %vm104_vm0, %v9009_v34  ;;  %7865 = vmatprep.subr.mxu0 %v8132_v16 }
0x14b8   :  { %7866 = vmatpush3.msra.mxu0 %v7050_v57  ;;  %7873 = vmatprep.mubr.msk.f32.mxu0 %vm8133_vm1, %v8132_v16  ;;  %v7072_v57 = vld [vmem:[%s9482_s12 + $0x7] ss:$0 sm:$0xff] }
0x14b9   :  { %7867 = vmatprep.subr.mxu0 %v8132_v16 }
0x14ba   :  { %v5620_v21 = vpop.f32.mrf.mxu1  ;;  %7868 = vmatpush3.msra.mxu0 %v7049_v60  ;;  %v7065_v60 = vld [vmem:[%s9482_s12 + $0x3] ss:$0 sm:$0xff] }
0x14bb   :  { %v5621_v22 = vadd.f32 %v7045_v17, %v5620_v21  ;;  %7869 = vmatprep.subr.mxu0 %v8132_v16 }
0x14bc   :  { %v7864_v27 = vpop.f32.mrf.mxu1  ;;  %7870 = vmatpush3.msra.mxu0 %v7048_v18  ;;  %v7079_v18 = vld [vmem:[%s9482_s12 + $0xb] ss:$0 sm:$0xff] }
0x14bd   :  { %7871 = vmatprep.subr.mxu0 %v8132_v16  ;;  %7877 = vmatpush3.xpose.msk.msra.mxu1 %vm418_vm2, %v5621_v22 }
0x14be   :  { %7872 = vmatpush3.msra.mxu0 %v7047_v1  ;;  %7881 = vmatprep.subr.mxu1 %v8132_v16 }
0x14bf   :  { %7874 = vmatmul.mubr.msk.f32.vlgmr.msra.gmra.mxu0 %vm104_vm0, %v9009_v34  ;;  %7886 = vmatprep.subr.mxu0 %v8132_v16 }
0x14c0   :  { %7888 = vmatprep.mubr.msk.f32.mxu0 %vm8133_vm1, %v8132_v16  ;;  %7887 = vmatpush3.msra.mxu0 %v7058_v29 }
0x14c1   :  { %7902 = vmatprep.subr.mxu0 %v8132_v16 }
0x156f   :  { %v9230_v24 = vpop.f32.mrf.mxu0 }
0x1570   :  { %v5455_v15 = vadd.f32 %v9193_v19, %v9230_v24 }
0x1571   :  { %v7837_v4 = vpop.f32.mrf.mxu0 }
0x1577   :  { %v5537_v25 = vpop.f32.mrf.mxu0 }
0x1578   :  { %v5538_v43 = vadd.f32 %v7038_v8, %v5537_v25 }
0x1579   :  { %v7853_v30 = vpop.f32.mrf.mxu0 }
0x157a   :  { %7879 = vmatmul.mubr.msk.f32.vlgmr.msra.gmra.mxu1 %vm418_vm2, %v5538_v43 }
0x157b   :  { %7883 = vmatprep.mubr.msk.f32.mxu1 %vm8133_vm1, %v8132_v16 }
0x157f   :  { %v5703_v45 = vpop.f32.mrf.mxu0 }
0x1580   :  { %v5704_v53 = vadd.f32 %v7052_v26, %v5703_v45 }
0x1581   :  { %v7875_v59 = vpop.f32.mrf.mxu0 }
0x1582   :  { %7882 = vmatpush3.msk.msra.mxu1 %vm4397_vm7, %v5704_v53  ;;  %v6980_v53 = vld [vmem:[%s9478_s8] ss:$0 sm:$0xff] }
0x1583   :  { %7891 = vmatprep.subr.mxu1 %v8132_v16  ;;  %v9346_v59 = vadd.f32 %v6980_v53, %v9004_v58  ;;  %v9361_v58 = vadd.f32 %v6980_v53, %v9001_v63  ;;  %v6444_v63 = vld [vmem:[%s9485_s15] sm:$0xff] }
0x163a   :  { %v5779_v28 = vpop.f32.mrf.mxu1 }
0x163b   :  { %v5780_v6 = vadd.f32 %v5779_v28, %v9099_v7 }
0x163c   :  { %v7880_v62 = vpop.f32.mrf.mxu1 }
0x163d   :  { %v5783_v3 = vsel %vm4809_vm11, %v5780_v6, -inf  ;;  %v6447_v62 = vld [vmem:[%s9485_s15 + $0x18] sm:$0xff] }
0x163e   :  { %5784 = vmax.xlane.f32.xlu1 %v5783_v3 }
0x16c7   :  { %v5785_v0 = vpop.xlane.xlu1 %5784 }
0x16c8   :  { %v5786_v33 = vsub.f32 %v5780_v6, %v5785_v0  ;;  %v9353_v0 = vadd.f32 %v6980_v53, %v8998_v56  ;;  %v6445_v56 = vld [vmem:[%s9485_s15 + $0x8] sm:$0xff] }
0x16ca   :  { %v5787_v44 = vmul.f32 1.442695, %v5786_v33  ;;  %v6455_v33 = vrot.slane %v9346_v59, 6 }
0x16cc   :  { %8044 = vpow2.f32 %v5787_v44 }
0x16d9   :  { %v8045_v13 = vpop.eup %8044 }
0x16da   :  { %v5789_v20 = vsel %vm4809_vm11, %v8045_v13, 0.0 }
0x16db   :  { %5790 = vadd.xlane.f32.xlu0 %v5789_v20  ;;  %v6458_v20 = vrot.slane %v9361_v58, 5 }
0x1764   :  { %v5791_v9 = vpop.xlane.xlu0 %5790 }
0x1765   :  { %8046 = vrcp.f32 %v5791_v9  ;;  %v7085_v9 = vld [vmem:[%s9483_s13 + $0x18] sm:$0xff] }
0x1772   :  { %v8047_v36 = vpop.eup %8046 }
0x1773   :  { %v5793_v37 = vmul.f32 %v8047_v36, %v8045_v13 }
0x1775   :  { %7884 = vmatmul.mubr.msk.f32.vlgmr.msra.gmra.mxu1 %vm4393_vm8, %v5793_v37 }
0x1776   :  { %7892 = vmatpush3.msra.mxu1 %v7063_v38  ;;  %7899 = vmatprep.mubr.msk.f32.mxu1 %vm8133_vm1, %v8132_v16 }
0x1777   :  { %7893 = vmatprep.subr.mxu1 %v8132_v16 }
0x1778   :  { %7894 = vmatpush3.msra.mxu1 %v7062_v42 }
0x1779   :  { %7895 = vmatprep.subr.mxu1 %v8132_v16 }
0x177a   :  { %7896 = vmatpush3.msra.mxu1 %v7061_v12 }
0x177b   :  { %7897 = vmatprep.subr.mxu1 %v8132_v16 }
0x177c   :  { %7898 = vmatpush3.msra.mxu1 %v7060_v50 }
0x177d   :  { %7900 = vmatmul.mubr.msk.f32.vlgmr.msra.gmra.mxu1 %vm104_vm0, %v9009_v34  ;;  %7913 = vmatprep.subr.mxu1 %v8132_v16 }
0x177e   :  { %7914 = vmatpush3.msra.mxu1 %v7077_v52  ;;  %7921 = vmatprep.mubr.msk.f32.mxu1 %vm8133_vm1, %v8132_v16 }
0x177f   :  { %7915 = vmatprep.subr.mxu1 %v8132_v16 }
0x1780   :  { %7916 = vmatpush3.msra.mxu1 %v7076_v41 }
0x1781   :  { %7917 = vmatprep.subr.mxu1 %v8132_v16 }
0x1782   :  { %7918 = vmatpush3.msra.mxu1 %v7075_v51 }
0x1783   :  { %7919 = vmatprep.subr.mxu1 %v8132_v16 }
0x1784   :  { %7920 = vmatpush3.msra.mxu1 %v7074_v39 }
0x1785   :  { %7922 = vmatmul.mubr.msk.f32.vlgmr.msra.gmra.mxu1 %vm104_vm0, %v9009_v34  ;;  %7934 = vmatprep.subr.mxu1 %v8132_v16 }
0x1786   :  { %7936 = vmatprep.mubr.msk.f32.mxu1 %vm8133_vm1, %v8132_v16  ;;  %7935 = vmatpush3.msra.mxu1 %v7085_v9 }
0x1787   :  { %7950 = vmatprep.subr.mxu1 %v8132_v16 }
0x1835   :  { %v5866_v32 = vpop.f32.mrf.mxu1 }
0x1836   :  { %7889 = vmatmul.mubr.msk.f32.vlgmr.msra.gmra.mxu0 %vm418_vm2, %v5866_v32 }
0x1837   :  { %7903 = vmatpush3.msra.mxu0 %v7070_v61  ;;  %v7885_v35 = vpop.f32.mrf.mxu1  ;;  %7910 = vmatprep.mubr.msk.f32.mxu0 %vm8133_vm1, %v8132_v16 }
0x1838   :  { %7904 = vmatprep.subr.mxu0 %v8132_v16 }
0x1839   :  { %7905 = vmatpush3.msra.mxu0 %v7069_v46 }
0x183a   :  { %7906 = vmatprep.subr.mxu0 %v8132_v16 }
0x183b   :  { %7907 = vmatpush3.msra.mxu0 %v7068_v40 }
0x183c   :  { %7908 = vmatprep.subr.mxu0 %v8132_v16 }
0x183d   :  { %v6025_v49 = vpop.f32.mrf.mxu1  ;;  %7909 = vmatpush3.msra.mxu0 %v7067_v23 }
0x183e   :  { %7911 = vmatmul.mubr.msk.f32.vlgmr.msra.gmra.mxu0 %vm104_vm0, %v9009_v34  ;;  %7924 = vmatprep.subr.mxu0 %v8132_v16  ;;  %v6026_v19 = vadd.f32 %v7065_v60, %v6025_v49 }
0x183f   :  { %v7901_v55 = vpop.f32.mrf.mxu1  ;;  %7926 = vmatprep.mubr.msk.f32.mxu0 %vm8133_vm1, %v8132_v16 }
0x1845   :  { %v6191_v14 = vpop.f32.mrf.mxu1 }
0x1846   :  { %v6192_v22 = vadd.f32 %v7079_v18, %v6191_v14  ;;  %v6536_v14 = vld [vmem:[%s9486_s16 + $0x18] sm:$0xff] }
0x1847   :  { %v7923_v11 = vpop.f32.mrf.mxu1 }
0x1848   :  { %v6535_v11 = vld [vmem:[%s9486_s16 + $0x10] sm:$0xff] }
0x18f6   :  { %v5941_v31 = vpop.f32.mrf.mxu0 }
0x18f7   :  { %v9318_v2 = vadd.f32 %v5941_v31, %v5455_v15  ;;  %v6534_v15 = vld [vmem:[%s9486_s16 + $0x8] sm:$0xff]  ;;  %v6533_v31 = vld [vmem:[%s9486_s16] sm:$0xff] }
0x18f8   :  { %v7890_v5 = vpop.f32.mrf.mxu0 }
0x18fe   :  { %v6108_v34 = vpop.f32.mrf.mxu0 }
0x18ff   :  { %v6109_v17 = vadd.f32 %v7072_v57, %v6108_v34  ;;  %v7087_v57 = vld [vmem:[%s9484_s14] ss:$0 sm:$0xff]  ;;  %s8136_s14 = smov [#allocation4]  }
0x1900   :  { %v7912_v21 = vpop.f32.mrf.mxu0  ;;  %s6771_s16 = sshll.u32 %s8136_s14, 4  ;;  %s6772_s16 = int_to_ptr.vmem [resolvable:$true] %s6771_s16 }
0x1901   :  { %7925 = vmatpush3.xpose.msk.msra.mxu0 %vm418_vm2, %v6109_v17  ;;  %s8068_s12 = scalar_lea.vmem %s6772_s16, 128  ;;  %p8073_p1 = scmp.lt.s32.totalorder %s6772_s16, %s6772_s16 }
0x1902   :  { %7929 = vmatprep.subr.mxu0 %v8132_v16  ;;  %p8069_p0 = scmp.ne.s32.totalorder %s6772_s16, %s8068_s12  ;;  %p8074_p2 = scmp.lt.s32.totalorder %s8068_s12, %s8068_s12 }
0x1904   :  { %7927 = vmatmul.mubr.msk.f32.vlgmr.msra.gmra.mxu0 %vm418_vm2, %v6026_v19  ;;  %p8075_p3 = por %p8074_p2, %p8073_p1 }
0x1905   :  { %7930 = vmatpush3.msk.msra.mxu0 %vm4397_vm7, %v6192_v22  ;;  %7931 = vmatprep.mubr.msk.f32.mxu0 %vm8133_vm1, %v8132_v16 }
0x1906   :  { %7939 = vmatprep.subr.mxu0 %v8132_v16  ;;  %p8076_p4 = pnand %p8075_p3, %p8069_p0 }
0x19c4   :  { %v6267_v1 = vpop.f32.mrf.mxu0 }
0x19c5   :  { %v6268_v27 = vadd.f32 %v6267_v1, %v9099_v7  ;;  %v9343_v7 = vadd.f32 %v6980_v53, %v8995_v10  ;;  %v6446_v10 = vld [vmem:[%s9485_s15 + $0x10] sm:$0xff] }
0x19c6   :  { %v7928_v24 = vpop.f32.mrf.mxu0 }
0x19c7   :  { %v6271_v4 = vsel %vm4809_vm11, %v6268_v27, -inf  ;;  %v6452_v3 = vrot.slane %v9343_v7, 7 }
0x19c8   :  { %6272 = vmax.xlane.f32.xlu1 %v6271_v4 }
0x19c9   :  { %v6454_v44 = vsel %vm6453_vm12, %v6452_v3, %v9353_v0 }
0x19ca   :  { %v6457_v13 = vsel %vm6456_vm13, %v6455_v33, %v6454_v44 }
0x19cb   :  { %v9379_v29 = vsel %vm6459_vm14, %v6458_v20, %v6457_v13 }
0x1a51   :  { %v6273_v8 = vpop.xlane.xlu1 %6272 }
0x1a52   :  { %v6274_v25 = vsub.f32 %v6268_v27, %v6273_v8 }
0x1a54   :  { %v6275_v43 = vmul.f32 1.442695, %v6274_v25 }
0x1a56   :  { %8048 = vpow2.f32 %v6275_v43 }
0x1a63   :  { %v8049_v30 = vpop.eup %8048 }
0x1a64   :  { %v6277_v26 = vsel %vm4809_vm11, %v8049_v30, 0.0 }
0x1a65   :  { %6278 = vadd.xlane.f32.xlu0 %v6277_v26 }
0x1aee   :  { %v6279_v45 = vpop.xlane.xlu0 %6278 }
0x1aef   :  { %8050 = vrcp.f32 %v6279_v45 }
0x1afc   :  { %v8051_v28 = vpop.eup %8050 }
0x1afd   :  { %v6281_v6 = vmul.f32 %v8051_v28, %v8049_v30 }
0x1aff   :  { %7932 = vmatmul.mubr.msk.f32.vlgmr.msra.gmra.mxu0 %vm4393_vm8, %v6281_v6 }
0x1b00   :  { %7940 = vmatpush3.msra.mxu0 %v6447_v62  ;;  %7947 = vmatprep.mubr.msk.f32.mxu0 %vm8133_vm1, %v8132_v16 }
0x1b01   :  { %7941 = vmatprep.subr.mxu0 %v8132_v16 }
0x1b02   :  { %7942 = vmatpush3.msra.mxu0 %v6446_v10 }
0x1b03   :  { %7943 = vmatprep.subr.mxu0 %v8132_v16 }
0x1b04   :  { %7944 = vmatpush3.msra.mxu0 %v6445_v56 }
0x1b05   :  { %7945 = vmatprep.subr.mxu0 %v8132_v16 }
0x1b06   :  { %7946 = vmatpush3.msra.mxu0 %v6444_v63 }
0x1b07   :  { %7948 = vmatmul.mubr.msk.f32.vlgmr.msra.gmra.mxu0 %vm104_vm0, %v9379_v29 }
0x1bbf   :  { %v6354_v36 = vpop.f32.mrf.mxu0 }
0x1bc0   :  { %7937 = vmatmul.mubr.msk.f32.vlgmr.msra.gmra.mxu1 %vm418_vm2, %v6354_v36 }
0x1bc1   :  { %v7933_v37 = vpop.f32.mrf.mxu0  ;;  %7958 = vmatprep.mubr.msk.f32.mxu1 %vm8133_vm1, %v8132_v16  ;;  %7951 = vmatpush3.msra.mxu1 %v6536_v14  ;;  %vm6698_vm1 = vcmp.eq.s32.totalorder %v8369_v47, 0 }
0x1bc2   :  { %7952 = vmatprep.subr.mxu1 %v8132_v16 }
0x1bc3   :  { %7953 = vmatpush3.msra.mxu1 %v6535_v11 }
0x1bc4   :  { %7954 = vmatprep.subr.mxu1 %v8132_v16 }
0x1bc5   :  { %7955 = vmatpush3.msra.mxu1 %v6534_v15 }
0x1bc6   :  { %7956 = vmatprep.subr.mxu1 %v8132_v16 }
0x1bc7   :  { %v6529_v38 = vpop.f32.mrf.mxu0  ;;  %7957 = vmatpush3.msra.mxu1 %v6533_v31 }
0x1bc8   :  { %v6611_v42 = vrot.slane %v6529_v38, 1  ;;  %v6612_v12 = vrot.slane %v6529_v38, 2  ;;  %v6613_v50 = vrot.slane %v6529_v38, 3  ;;  %v6618_v61 = vmul.f32 %v6529_v38, %v9353_v0 }
0x1bc9   :  { %v7949_v52 = vpop.f32.mrf.mxu0 }
0x1bca   :  { %v6619_v41 = vmul.f32 %v6611_v42, %v9343_v7  ;;  %v6620_v51 = vmul.f32 %v6612_v12, %v9346_v59  ;;  %v6621_v39 = vmul.f32 %v6613_v50, %v9361_v58 }
0x1bcc   :  { %v6626_v32 = vrot.slane %v6619_v41, 7  ;;  %v6628_v46 = vrot.slane %v6620_v51, 6  ;;  %v6630_v40 = vrot.slane %v6621_v39, 5 }
0x1bce   :  { %v6627_v35 = vsel %vm6453_vm12, %v6626_v32, %v6618_v61 }
0x1bcf   :  { %v6629_v23 = vsel %vm6456_vm13, %v6628_v46, %v6627_v35 }
0x1bd0   :  { %v6631_v49 = vsel %vm6459_vm14, %v6630_v40, %v6629_v23 }
0x1bd1   :  { %v6634_v55 = vsel %vm6633_vm15, %v6631_v49, 0.0 }
0x1bd2   :  { %6635 = vadd.xlane.f32.xlu1 %v6634_v55 }
0x1c5b   :  { %v6636_v3 = vpop.xlane.xlu1 %6635 }
0x1c80   :  { %v6429_v5 = vpop.f32.mrf.mxu1 }
0x1c81   :  { %v6433_v34 = vadd.f32 %v6429_v5, %v9318_v2 }
0x1c82   :  { %v7938_v60 = vpop.f32.mrf.mxu1 }
0x1c83   :  { %v6441_v17 = vadd.f32 %v7087_v57, %v6433_v34 }
0x1c85   :  { %7959 = vmatmul.mubr.msk.f32.vlgmr.msra.gmra.mxu1 %vm104_vm0, %v6441_v17  ;;  %v6663_v18 = vmul.f32 %v6529_v38, %v6441_v17 }
0x1c87   :  { %v6664_v21 = vsel %vm6633_vm15, %v6663_v18, 0.0 }
0x1c88   :  { %6665 = vadd.xlane.f32.xlu1 %v6664_v21 }
0x1d11   :  { %v6666_v63 = vpop.xlane.xlu1 %6665 }
0x1d45   :  { %v6606_v19 = vpop.f32.mrf.mxu1 }
0x1d46   :  { %v6638_v22 = vrot.slane %v6606_v19, 1  ;;  %v6639_v1 = vrot.slane %v6606_v19, 2  ;;  %v6640_v16 = vrot.slane %v6606_v19, 3  ;;  %v6645_v2 = vmul.f32 %v6606_v19, %v9353_v0 }
0x1d47   :  { %v7960_v27 = vpop.f32.mrf.mxu1  ;;  %v6667_v6 = vmul.f32 %v6606_v19, %v6441_v17 }
0x1d48   :  { %v6646_v24 = vmul.f32 %v6638_v22, %v9343_v7  ;;  %v6647_v4 = vmul.f32 %v6639_v1, %v9346_v59  ;;  %v6648_v8 = vmul.f32 %v6640_v16, %v9361_v58 }
0x1d49   :  { %v6668_v62 = vsel %vm6633_vm15, %v6667_v6, 0.0 }
0x1d4a   :  { %v6653_v25 = vrot.slane %v6646_v24, 7  ;;  %v6655_v43 = vrot.slane %v6647_v4, 6  ;;  %v6657_v26 = vrot.slane %v6648_v8, 5 }
0x1d4c   :  { %v6654_v30 = vsel %vm6453_vm12, %v6653_v25, %v6645_v2 }
0x1d4d   :  { %v6656_v45 = vsel %vm6456_vm13, %v6655_v43, %v6654_v30 }
0x1d4e   :  { %v6658_v53 = vsel %vm6459_vm14, %v6657_v26, %v6656_v45 }
0x1d4f   :  { %v6660_v28 = vsel %vm6633_vm15, %v6658_v53, 0.0 }
0x1d50   :  { %6661 = vadd.xlane.f32.xlu0 %v6660_v28 }
0x1d54   :  { %6669 = vadd.xlane.f32.xlu0 %v6668_v62 }
0x1dd9   :  { %v6662_v33 = vpop.xlane.xlu0 %6661 }
0x1dda   :  { %v6671_v10 = vmax.f32 %v6636_v3, %v6662_v33 }
0x1ddc   :  { %v6672_v56 = vsub.f32 %v6636_v3, %v6671_v10  ;;  %v6675_v44 = vsub.f32 %v6662_v33, %v6671_v10 }
0x1ddd   :  { %v6670_v13 = vpop.xlane.xlu0 %6669 }
0x1dde   :  { %v6673_v20 = vmul.f32 1.442695, %v6672_v56  ;;  %v6676_v9 = vmul.f32 1.442695, %v6675_v44  ;;  %v6678_v36 = vmax.f32 %v6666_v63, %v6670_v13 }
0x1de0   :  { %8052 = vpow2.f32 %v6673_v20  ;;  %v6679_v37 = vsub.f32 %v6666_v63, %v6678_v36  ;;  %v6682_v38 = vsub.f32 %v6670_v13, %v6678_v36 }
0x1de1   :  { %8054 = vpow2.f32 %v6676_v9 }
0x1de2   :  { %v6680_v42 = vmul.f32 1.442695, %v6679_v37  ;;  %v6683_v12 = vmul.f32 1.442695, %v6682_v38 }
0x1de4   :  { %8056 = vpow2.f32 %v6680_v42 }
0x1de5   :  { %8058 = vpow2.f32 %v6683_v12 }
0x1ded   :  { %v8053_v50 = vpop.eup %8052 }
0x1dee   :  { %v8055_v52 = vpop.eup %8054  ;;  %v6686_v46 = vmul.f32 %v8053_v50, %v9379_v29 }
0x1def   :  { %v6689_v41 = vadd.f32 %v8055_v52, %v8053_v50  ;;  %v6687_v32 = vmul.f32 %v8055_v52, %v6441_v17 }
0x1df1   :  { %v8057_v51 = vpop.eup %8056  ;;  %8060 = vrcp.f32 %v6689_v41  ;;  %v6688_v35 = vadd.f32 %v6687_v32, %v6686_v46 }
0x1df2   :  { %v8059_v39 = vpop.eup %8058 }
0x1df3   :  { %v6695_v61 = vadd.f32 %v8059_v39, %v8057_v51  ;;  %v6693_v55 = vmul.f32 %v8059_v39, %v6441_v17 }
0x1df5   :  { %8062 = vrcp.f32 %v6695_v61 }
0x1dfe   :  { %v8061_v40 = vpop.eup %8060 }
0x1dff   :  { %v6691_v23 = vmul.f32 %v8061_v40, %v6688_v35 }
0x1e01   :  { %v6692_v49 = vmul.f32 %v8057_v51, %v6691_v23  ;;  %v6706_v14 = vrot.slane %v6691_v23, %v8372_v48 }
0x1e02   :  { %v8063_v5 = vpop.eup %8062 }
0x1e03   :  { %v6694_v11 = vadd.f32 %v6693_v55, %v6692_v49  ;;  %v6707_v15 = vcombine.high %v6706_v14, %v6706_v14  ;;  %v6714_v31 = vrot.slane %v6706_v14, %v8372_v48 }
0x1e05   :  { %v6697_v57 = vmul.f32 %v8063_v5, %v6694_v11  ;;  %v6721_v29 = vrot.slane %v6707_v15, %v8372_v48  ;;  %v6722_v34 = vcombine.high %v6714_v31, %v6714_v31  ;;  %v6727_v60 = vrot.slane %v6714_v31, %v8379_v54 }
0x1e07   :  { %6752 = vst.msk [vmem:[#allocation4] sm:$0xf] %vm6633_vm15, %v6697_v57  ;;  %v6723_v17 = vcombine.high %v6721_v29, %v6721_v29  ;;  %v6731_v18 = vrot.slane %v6721_v29, %v8379_v54  ;;  %v6735_v21 = vrot.slane %v6722_v34, %v8379_v54  ;;  %v6744_v19 = vsel %vm6698_vm1, %v6727_v60, %v9353_v0 }
0x1e08   :  { %8079 = shalt.err (!%p8076_p4)
}
0x1e09   :  { %6774 = dma.vmem_to_hbm [thread:$0]  %s6772_s16, 128, %s9488_s18, [#allocation5]   ;;  %6748 = vst.msk [vmem:[#allocation2] sm:$0xff] %vm104_vm0, %v6744_v19  ;;  %v6739_v48 = vrot.slane %v6723_v17, %v8379_v54  ;;  %v6745_v0 = vsel %vm6698_vm1, %v6731_v18, %v9343_v7  ;;  %v6746_v22 = vsel %vm6698_vm1, %v6735_v21, %v9346_v59 }
0x1e0a   :  { %s8088_s22 = scalar_lea.vmem %s9434_s10, 512  ;;  %p8093_p6 = scmp.lt.s32.totalorder %s9434_s10, %s9434_s10 }
0x1e0b   :  { %p8089_p5 = scmp.ne.s32.totalorder %s9434_s10, %s8088_s22  ;;  %p8094_p7 = scmp.lt.s32.totalorder %s8088_s22, %s8088_s22 }
0x1e0d   :  { %p8095_p8 = por %p8094_p7, %p8093_p6 }
0x1e0f   :  { %p8096_p9 = pnand %p8095_p8, %p8089_p5 }
0x1e11   :  { %8099 = shalt.err (!%p8096_p9)
}
0x1e12   :  { %s8139_s18 = smov 128   ;;  %s8140_s8 = smov 8   ;;  %6749 = vst.msk [vmem:[#allocation2 + $0x8] sm:$0xff] %vm104_vm0, %v6745_v0  ;;  %6750 = vst.msk [vmem:[#allocation2 + $0x10] sm:$0xff] %vm104_vm0, %v6746_v22  ;;  %v6747_v54 = vsel %vm6698_vm1, %v6739_v48, %v9361_v58 }
0x1e13   :  { %6786 = dma.vmem_to_hbm [thread:$0]  %s9434_s10, 512, %s9489_s19, [#allocation5], %s8139_s18, %s8139_s18, %s8140_s8   ;;  %6751 = vst.msk [vmem:[#allocation2 + $0x18] sm:$0xff] %vm104_vm0, %v6747_v54 }
0x1e14   :  { %s8108_s4 = scalar_lea.vmem %s6759_s30, 512  ;;  %p8113_p11 = scmp.lt.s32.totalorder %s6759_s30, %s6759_s30 }
0x1e15   :  { %p8109_p10 = scmp.ne.s32.totalorder %s6759_s30, %s8108_s4  ;;  %p8114_p12 = scmp.lt.s32.totalorder %s8108_s4, %s8108_s4 }
0x1e17   :  { %p8115_p13 = por %p8114_p12, %p8113_p11 }
0x1e19   :  { %p8116_p0 = pnand %p8115_p13, %p8109_p10 }
0x1e1b   :  { %8119 = shalt.err (!%p8116_p0)
}
0x1e1c   :  { %6764 = dma.vmem_to_hbm [thread:$0]  %s6759_s30, 512, %s9487_s17, [#allocation3], %s8139_s18, %s8139_s18, %s8140_s8  }
0x1e1d   :  { %8128 = dma.done.wait [#allocation3], 512  }
0x1e1e   :  { %8129 = vsyncadd [#allocation3], 4294966784 }
0x1e1f   :  { %8130 = dma.done.wait [#allocation5], 640  }
0x1e20   :  { %8131 = vsyncadd [#allocation5], 4294966656 }
0x1e21   :  { %6796 = vsyncpa [#allocation3], 1 }
0x1e22   :  { %6797 = vsyncpa [#allocation5], 1 }

</bundles_post_ra>
